<compile_context>
chip_gen: v5e
topology: v5e:2x2
jax: 0.10.0
libtpu: 0.0.40
codegen_flags: <defaults>
</compile_context>

<pallas_src>
import functools

import jax
import jax.numpy as jnp
from jax.experimental import pallas as pl
from jax.experimental.pallas import tpu as pltpu

HIDDEN = 48
IN_FEATURES = 2
GATE_PAD = 128  # each 48-wide gate block padded to one 128-lane tile


def lstm_turnover_kernel(
    x_ref,       # (T*Bp, 2)    f32  time-major flattened input
    wih0_ref,    # (2, 4*Hp)    f32  layer-0 input weights (gate-padded, transposed)
    b0_ref,      # (1, 4*Hp)    f32  layer-0 combined bias (gate-padded)
    whh0_ref,    # (H, 4*Hp)    bf16 layer-0 recurrent weights
    w1_ref,      # (2H, 4*Hp)   bf16 layer-1 stacked [W_ih1; W_hh1]
    b1_ref,      # (1, 4*Hp)    f32  layer-1 combined bias
    wlin_ref,    # (H, 1)       f32  final linear weight (transposed)
    blin_ref,    # (1, 1)       f32  final linear bias
    out_ref,     # (T*Bp, 1)    f32
    xb_ref,      # scratch (T*Bp, 4*Hp) f32
    h1s_ref,     # scratch (T*Bp, H)    f32
    *,
    T,
    B,
):
    H = whh0_ref.shape[0]
    Hp = whh0_ref.shape[1] // 4

    # (1) Hoisted layer-0 input projection + bias: one MXU push for all steps.
    xb_ref[...] = (
        jnp.dot(x_ref[...], wih0_ref[...], preferred_element_type=jnp.float32)
        + b0_ref[...]
    )

    # Hoisted bias broadcast (JAX does not CSE broadcast_in_dim across the unroll).
    b1 = jnp.broadcast_to(b1_ref[...], (B, 4 * Hp))

    h0 = jnp.zeros((B, H), jnp.float32)
    c0 = jnp.zeros((B, H), jnp.float32)
    h1 = jnp.zeros((B, H), jnp.float32)
    c1 = jnp.zeros((B, H), jnp.float32)

    for t in range(T):  # static unroll; T is small
        # ---- layer 0: single recurrent matmul (bf16 operands, f32 accumulate)
        g0 = xb_ref[pl.ds(t * B, B), :] + jnp.dot(
            h0.astype(jnp.bfloat16), whh0_ref[...],
            preferred_element_type=jnp.float32)
        # gate slices start at 128-lane boundaries: 0, 128, 256, 384
        i0 = jax.nn.sigmoid(g0[:, 0 * Hp:0 * Hp + H])
        f0 = jax.nn.sigmoid(g0[:, 1 * Hp:1 * Hp + H])
        u0 = jnp.tanh(g0[:, 2 * Hp:2 * Hp + H])
        o0 = jax.nn.sigmoid(g0[:, 3 * Hp:3 * Hp + H])
        c0 = f0 * c0 + i0 * u0
        h0 = o0 * jnp.tanh(c0)

        # ---- layer 1: fused [W_ih1; W_hh1] matmul over concat([h0, h1])
        hh = jnp.concatenate([h0, h1], axis=1).astype(jnp.bfloat16)  # (B, 2H)
        g1 = jnp.dot(hh, w1_ref[...], preferred_element_type=jnp.float32) + b1
        i1 = jax.nn.sigmoid(g1[:, 0 * Hp:0 * Hp + H])
        f1 = jax.nn.sigmoid(g1[:, 1 * Hp:1 * Hp + H])
        u1 = jnp.tanh(g1[:, 2 * Hp:2 * Hp + H])
        o1 = jax.nn.sigmoid(g1[:, 3 * Hp:3 * Hp + H])
        c1 = f1 * c1 + i1 * u1
        h1 = o1 * jnp.tanh(c1)

        # stash h1 for the deferred output projection
        h1s_ref[pl.ds(t * B, B), :] = h1

    # (2) Deferred Linear(H -> 1): one (T*Bp, H) x (H, 1) matmul after the loop.
    out_ref[...] = (
        jnp.dot(h1s_ref[...], wlin_ref[...], preferred_element_type=jnp.float32)
        + blin_ref[...]
    )


def lstm_turnover_forward(x, params, *, hidden=HIDDEN):
    B, T, F = x.shape
    Bp = ((B + 7) // 8) * 8  # pad batch to a sublane multiple
    if Bp != B:
        x = jnp.pad(x, ((0, Bp - B), (0, 0), (0, 0)))
    # time-major, flattened: row index = t * Bp + b
    x_flat = jnp.transpose(x, (1, 0, 2)).reshape(T * Bp, F)

    Hp = GATE_PAD
    kernel = functools.partial(lstm_turnover_kernel, T=T, B=Bp)
    vmem = pl.BlockSpec(memory_space=pltpu.MemorySpace.VMEM)
    out_flat = pl.pallas_call(
        kernel,
        out_shape=jax.ShapeDtypeStruct((T * Bp, 1), jnp.float32),
        in_specs=[vmem] * (1 + len(params)),
        out_specs=vmem,
        scratch_shapes=[
            pltpu.VMEM((T * Bp, 4 * Hp), jnp.float32),   # hoisted x-projection
            pltpu.VMEM((T * Bp, hidden), jnp.float32),   # stacked h1 outputs
        ],
    )(x_flat, *params)

    out = out_flat.reshape(T, Bp).T  # (Bp, T)
    return out[:B]                   # drop batch padding


def xavier_uniform(key, shape):
    """torch.nn.init.xavier_uniform_ for a (fan_out, fan_in) weight."""
    fan_out, fan_in = shape
    bound = (6.0 / (fan_in + fan_out)) ** 0.5
    return jax.random.uniform(key, shape, jnp.float32, -bound, bound)


def _gate_pad_cols(w_t, hidden, hp):
    """(K, 4H) with gates i,f,g,o concatenated -> (K, 4*hp), each gate block
    placed at a 128-lane-aligned column offset (rest zero)."""
    k = w_t.shape[0]
    out = jnp.zeros((k, 4 * hp), w_t.dtype)
    for g in range(4):
        out = out.at[:, g * hp:g * hp + hidden].set(
            w_t[:, g * hidden:(g + 1) * hidden])
    return out


def init_params(key, hidden=HIDDEN, in_features=IN_FEATURES, hp=GATE_PAD):
    ks = jax.random.split(key, 5)
    # layer 0: LSTMCell(2, H); layer 1: LSTMCell(H, H); gate order i,f,g,o
    w_ih0 = xavier_uniform(ks[0], (4 * hidden, in_features))
    w_hh0 = xavier_uniform(ks[1], (4 * hidden, hidden))
    w_ih1 = xavier_uniform(ks[2], (4 * hidden, hidden))
    w_hh1 = xavier_uniform(ks[3], (4 * hidden, hidden))
    w_lin = xavier_uniform(ks[4], (1, hidden))

    b_gate = jnp.full((1, 4 * hidden), 0.02, jnp.float32)  # b_ih + b_hh (0.01 each)

    wih0_p = _gate_pad_cols(w_ih0.T, hidden, hp)                        # (2, 4*hp) f32
    whh0_p = _gate_pad_cols(w_hh0.T, hidden, hp).astype(jnp.bfloat16)   # (H, 4*hp) bf16
    w1_p = jnp.concatenate(
        [_gate_pad_cols(w_ih1.T, hidden, hp),
         _gate_pad_cols(w_hh1.T, hidden, hp)],
        axis=0).astype(jnp.bfloat16)                                    # (2H, 4*hp) bf16
    b0_p = _gate_pad_cols(b_gate, hidden, hp)                           # (1, 4*hp) f32
    b1_p = _gate_pad_cols(b_gate, hidden, hp)                           # (1, 4*hp) f32
    w_lin_col = w_lin.T                                                 # (H, 1) f32
    b_lin = jnp.full((1, 1), 0.01, jnp.float32)

    return (wih0_p, b0_p, whh0_p, w1_p, b1_p, w_lin_col, b_lin)


if __name__ == "__main__":
    key = jax.random.PRNGKey(0)
    k_x, k_p = jax.random.split(key)

    B, T = 4, 8
    x = jax.random.normal(k_x, (B, T, IN_FEATURES), jnp.float32)
    params = init_params(k_p)

    out = lstm_turnover_forward(x, params)
    jax.block_until_ready(out)
    assert out.shape == (B, T), out.shape
    print("KERNEL_OK")
</pallas_src>

<mosaic_0001>
module attributes {stable_mosaic.version = 11 : i64} {
  func.func @lstm_turnover_kernel(%arg0: memref<64x2xf32, #tpu.memory_space<vmem>>, %arg1: memref<2x512xf32, #tpu.memory_space<vmem>>, %arg2: memref<1x512xf32, #tpu.memory_space<vmem>>, %arg3: memref<48x512xbf16, #tpu.memory_space<vmem>>, %arg4: memref<96x512xbf16, #tpu.memory_space<vmem>>, %arg5: memref<1x512xf32, #tpu.memory_space<vmem>>, %arg6: memref<48x1xf32, #tpu.memory_space<vmem>>, %arg7: memref<1x1xf32, #tpu.memory_space<vmem>>, %arg8: memref<64x1xf32, #tpu.memory_space<vmem>>, %arg9: memref<64x512xf32, #tpu.memory_space<vmem>>, %arg10: memref<64x48xf32, #tpu.memory_space<vmem>>) attributes {dimension_semantics = [], scalar_prefetch = 0 : i64, scratch_operands = 2 : i64, tpu.core_type = #tpu.core_type<tc>} {
    %c0 = arith.constant 0 : index
    %c0_0 = arith.constant 0 : index
    %0 = vector.load %arg0[%c0, %c0_0] : memref<64x2xf32, #tpu.memory_space<vmem>>, vector<64x2xf32>
    %c0_1 = arith.constant 0 : index
    %c0_2 = arith.constant 0 : index
    %1 = vector.load %arg1[%c0_1, %c0_2] : memref<2x512xf32, #tpu.memory_space<vmem>>, vector<2x512xf32>
    %cst = arith.constant dense<0.000000e+00> : vector<64x512xf32>
    %2 = tpu.matmul %0, %1, %cst {dimension_numbers = #tpu.dot_dimension_numbers<[1], [0], [0], [1], [0, 0, 1, 1], [], []>} : vector<64x2xf32>, vector<2x512xf32>, vector<64x512xf32> -> vector<64x512xf32>
    %c0_3 = arith.constant 0 : index
    %c0_4 = arith.constant 0 : index
    %3 = vector.load %arg2[%c0_3, %c0_4] : memref<1x512xf32, #tpu.memory_space<vmem>>, vector<1x512xf32>
    %4 = vector.broadcast %3 : vector<1x512xf32> to vector<64x512xf32>
    %5 = arith.addf %2, %4 : vector<64x512xf32>
    %c0_5 = arith.constant 0 : index
    %c0_6 = arith.constant 0 : index
    %6 = vector.load %arg9[%c0_5, %c0_6] : memref<64x512xf32, #tpu.memory_space<vmem>>, vector<64x512xf32>
    tpu.vector_store %arg9[%c0_5, %c0_6], %5 {strides = array<i32>} : memref<64x512xf32, #tpu.memory_space<vmem>>, vector<64x512xf32>,
    %c0_7 = arith.constant 0 : index
    %c0_8 = arith.constant 0 : index
    %7 = vector.load %arg5[%c0_7, %c0_8] : memref<1x512xf32, #tpu.memory_space<vmem>>, vector<1x512xf32>
    %8 = vector.shape_cast %7 : vector<1x512xf32> to vector<1x512xf32>
    %9 = vector.broadcast %8 : vector<1x512xf32> to vector<8x512xf32>
    %cst_9 = arith.constant 0.000000e+00 : f32
    %10 = vector.broadcast %cst_9 : f32 to vector<8x48xf32>
    %cst_10 = arith.constant 0.000000e+00 : f32
    %11 = vector.broadcast %cst_10 : f32 to vector<8x48xf32>
    %cst_11 = arith.constant 0.000000e+00 : f32
    %12 = vector.broadcast %cst_11 : f32 to vector<8x48xf32>
    %cst_12 = arith.constant 0.000000e+00 : f32
    %13 = vector.broadcast %cst_12 : f32 to vector<8x48xf32>
    %c0_13 = arith.constant 0 : index
    %c0_14 = arith.constant 0 : index
    %14 = vector.load %arg9[%c0_13, %c0_14] : memref<64x512xf32, #tpu.memory_space<vmem>>, vector<8x512xf32>
    %15 = arith.truncf %10 : vector<8x48xf32> to vector<8x48xbf16>
    %c0_15 = arith.constant 0 : index
    %c0_16 = arith.constant 0 : index
    %16 = vector.load %arg3[%c0_15, %c0_16] : memref<48x512xbf16, #tpu.memory_space<vmem>>, vector<48x512xbf16>
    %cst_17 = arith.constant dense<0.000000e+00> : vector<8x512xf32>
    %17 = tpu.matmul %15, %16, %cst_17 {dimension_numbers = #tpu.dot_dimension_numbers<[1], [0], [0], [1], [0, 0, 1, 1], [], []>} : vector<8x48xbf16>, vector<48x512xbf16>, vector<8x512xf32> -> vector<8x512xf32>
    %18 = arith.addf %14, %17 : vector<8x512xf32>
    %19 = vector.extract_strided_slice %18 {offsets = [0, 0], sizes = [8, 48], strides = [1, 1]} : vector<8x512xf32> to vector<8x48xf32>
    %20 = arith.negf %19 : vector<8x48xf32>
    %21 = math.exp %20 : vector<8x48xf32>
    %cst_18 = arith.constant 1.000000e+00 : f32
    %22 = vector.broadcast %cst_18 : f32 to vector<8x48xf32>
    %23 = arith.addf %22, %21 : vector<8x48xf32>
    %24 = arith.divf %22, %23 : vector<8x48xf32>
    %25 = vector.extract_strided_slice %18 {offsets = [0, 128], sizes = [8, 48], strides = [1, 1]} : vector<8x512xf32> to vector<8x48xf32>
    %26 = arith.negf %25 : vector<8x48xf32>
    %27 = math.exp %26 : vector<8x48xf32>
    %cst_19 = arith.constant 1.000000e+00 : f32
    %28 = vector.broadcast %cst_19 : f32 to vector<8x48xf32>
    %29 = arith.addf %28, %27 : vector<8x48xf32>
    %30 = arith.divf %28, %29 : vector<8x48xf32>
    %31 = vector.extract_strided_slice %18 {offsets = [0, 256], sizes = [8, 48], strides = [1, 1]} : vector<8x512xf32> to vector<8x48xf32>
    %32 = math.tanh %31 : vector<8x48xf32>
    %33 = vector.extract_strided_slice %18 {offsets = [0, 384], sizes = [8, 48], strides = [1, 1]} : vector<8x512xf32> to vector<8x48xf32>
    %34 = arith.negf %33 : vector<8x48xf32>
    %35 = math.exp %34 : vector<8x48xf32>
    %cst_20 = arith.constant 1.000000e+00 : f32
    %36 = vector.broadcast %cst_20 : f32 to vector<8x48xf32>
    %37 = arith.addf %36, %35 : vector<8x48xf32>
    %38 = arith.divf %36, %37 : vector<8x48xf32>
    %39 = arith.mulf %30, %11 : vector<8x48xf32>
    %40 = arith.mulf %24, %32 : vector<8x48xf32>
    %41 = arith.addf %39, %40 : vector<8x48xf32>
    %42 = math.tanh %41 : vector<8x48xf32>
    %43 = arith.mulf %38, %42 : vector<8x48xf32>
    %44 = tpu.concatenate %43, %12 in 1 : vector<8x48xf32>, vector<8x48xf32> -> vector<8x96xf32>
    %45 = arith.truncf %44 : vector<8x96xf32> to vector<8x96xbf16>
    %c0_21 = arith.constant 0 : index
    %c0_22 = arith.constant 0 : index
    %46 = vector.load %arg4[%c0_21, %c0_22] : memref<96x512xbf16, #tpu.memory_space<vmem>>, vector<96x512xbf16>
    %cst_23 = arith.constant dense<0.000000e+00> : vector<8x512xf32>
    %47 = tpu.matmul %45, %46, %cst_23 {dimension_numbers = #tpu.dot_dimension_numbers<[1], [0], [0], [1], [0, 0, 1, 1], [], []>} : vector<8x96xbf16>, vector<96x512xbf16>, vector<8x512xf32> -> vector<8x512xf32>
    %48 = arith.addf %47, %9 : vector<8x512xf32>
    %49 = vector.extract_strided_slice %48 {offsets = [0, 0], sizes = [8, 48], strides = [1, 1]} : vector<8x512xf32> to vector<8x48xf32>
    %50 = arith.negf %49 : vector<8x48xf32>
    %51 = math.exp %50 : vector<8x48xf32>
    %cst_24 = arith.constant 1.000000e+00 : f32
    %52 = vector.broadcast %cst_24 : f32 to vector<8x48xf32>
    %53 = arith.addf %52, %51 : vector<8x48xf32>
    %54 = arith.divf %52, %53 : vector<8x48xf32>
    %55 = vector.extract_strided_slice %48 {offsets = [0, 128], sizes = [8, 48], strides = [1, 1]} : vector<8x512xf32> to vector<8x48xf32>
    %56 = arith.negf %55 : vector<8x48xf32>
    %57 = math.exp %56 : vector<8x48xf32>
    %cst_25 = arith.constant 1.000000e+00 : f32
    %58 = vector.broadcast %cst_25 : f32 to vector<8x48xf32>
    %59 = arith.addf %58, %57 : vector<8x48xf32>
    %60 = arith.divf %58, %59 : vector<8x48xf32>
    %61 = vector.extract_strided_slice %48 {offsets = [0, 256], sizes = [8, 48], strides = [1, 1]} : vector<8x512xf32> to vector<8x48xf32>
    %62 = math.tanh %61 : vector<8x48xf32>
    %63 = vector.extract_strided_slice %48 {offsets = [0, 384], sizes = [8, 48], strides = [1, 1]} : vector<8x512xf32> to vector<8x48xf32>
    %64 = arith.negf %63 : vector<8x48xf32>
    %65 = math.exp %64 : vector<8x48xf32>
    %cst_26 = arith.constant 1.000000e+00 : f32
    %66 = vector.broadcast %cst_26 : f32 to vector<8x48xf32>
    %67 = arith.addf %66, %65 : vector<8x48xf32>
    %68 = arith.divf %66, %67 : vector<8x48xf32>
    %69 = arith.mulf %60, %13 : vector<8x48xf32>
    %70 = arith.mulf %54, %62 : vector<8x48xf32>
    %71 = arith.addf %69, %70 : vector<8x48xf32>
    %72 = math.tanh %71 : vector<8x48xf32>
    %73 = arith.mulf %68, %72 : vector<8x48xf32>
    %c0_27 = arith.constant 0 : index
    %c0_28 = arith.constant 0 : index
    %74 = vector.load %arg10[%c0_27, %c0_28] : memref<64x48xf32, #tpu.memory_space<vmem>>, vector<8x48xf32>
    tpu.vector_store %arg10[%c0_27, %c0_28], %73 {strides = array<i32>} : memref<64x48xf32, #tpu.memory_space<vmem>>, vector<8x48xf32>,
    %c8 = arith.constant 8 : index
    %c0_29 = arith.constant 0 : index
    %75 = vector.load %arg9[%c8, %c0_29] : memref<64x512xf32, #tpu.memory_space<vmem>>, vector<8x512xf32>
    %76 = arith.truncf %43 : vector<8x48xf32> to vector<8x48xbf16>
    %c0_30 = arith.constant 0 : index
    %c0_31 = arith.constant 0 : index
    %77 = vector.load %arg3[%c0_30, %c0_31] : memref<48x512xbf16, #tpu.memory_space<vmem>>, vector<48x512xbf16>
    %cst_32 = arith.constant dense<0.000000e+00> : vector<8x512xf32>
    %78 = tpu.matmul %76, %77, %cst_32 {dimension_numbers = #tpu.dot_dimension_numbers<[1], [0], [0], [1], [0, 0, 1, 1], [], []>} : vector<8x48xbf16>, vector<48x512xbf16>, vector<8x512xf32> -> vector<8x512xf32>
    %79 = arith.addf %75, %78 : vector<8x512xf32>
    %80 = vector.extract_strided_slice %79 {offsets = [0, 0], sizes = [8, 48], strides = [1, 1]} : vector<8x512xf32> to vector<8x48xf32>
    %81 = arith.negf %80 : vector<8x48xf32>
    %82 = math.exp %81 : vector<8x48xf32>
    %cst_33 = arith.constant 1.000000e+00 : f32
    %83 = vector.broadcast %cst_33 : f32 to vector<8x48xf32>
    %84 = arith.addf %83, %82 : vector<8x48xf32>
    %85 = arith.divf %83, %84 : vector<8x48xf32>
    %86 = vector.extract_strided_slice %79 {offsets = [0, 128], sizes = [8, 48], strides = [1, 1]} : vector<8x512xf32> to vector<8x48xf32>
    %87 = arith.negf %86 : vector<8x48xf32>
    %88 = math.exp %87 : vector<8x48xf32>
    %cst_34 = arith.constant 1.000000e+00 : f32
    %89 = vector.broadcast %cst_34 : f32 to vector<8x48xf32>
    %90 = arith.addf %89, %88 : vector<8x48xf32>
    %91 = arith.divf %89, %90 : vector<8x48xf32>
    %92 = vector.extract_strided_slice %79 {offsets = [0, 256], sizes = [8, 48], strides = [1, 1]} : vector<8x512xf32> to vector<8x48xf32>
    %93 = math.tanh %92 : vector<8x48xf32>
    %94 = vector.extract_strided_slice %79 {offsets = [0, 384], sizes = [8, 48], strides = [1, 1]} : vector<8x512xf32> to vector<8x48xf32>
    %95 = arith.negf %94 : vector<8x48xf32>
    %96 = math.exp %95 : vector<8x48xf32>
    %cst_35 = arith.constant 1.000000e+00 : f32
    %97 = vector.broadcast %cst_35 : f32 to vector<8x48xf32>
    %98 = arith.addf %97, %96 : vector<8x48xf32>
    %99 = arith.divf %97, %98 : vector<8x48xf32>
    %100 = arith.mulf %91, %41 : vector<8x48xf32>
    %101 = arith.mulf %85, %93 : vector<8x48xf32>
    %102 = arith.addf %100, %101 : vector<8x48xf32>
    %103 = math.tanh %102 : vector<8x48xf32>
    %104 = arith.mulf %99, %103 : vector<8x48xf32>
    %105 = tpu.concatenate %104, %73 in 1 : vector<8x48xf32>, vector<8x48xf32> -> vector<8x96xf32>
    %106 = arith.truncf %105 : vector<8x96xf32> to vector<8x96xbf16>
    %c0_36 = arith.constant 0 : index
    %c0_37 = arith.constant 0 : index
    %107 = vector.load %arg4[%c0_36, %c0_37] : memref<96x512xbf16, #tpu.memory_space<vmem>>, vector<96x512xbf16>
    %cst_38 = arith.constant dense<0.000000e+00> : vector<8x512xf32>
    %108 = tpu.matmul %106, %107, %cst_38 {dimension_numbers = #tpu.dot_dimension_numbers<[1], [0], [0], [1], [0, 0, 1, 1], [], []>} : vector<8x96xbf16>, vector<96x512xbf16>, vector<8x512xf32> -> vector<8x512xf32>
    %109 = arith.addf %108, %9 : vector<8x512xf32>
    %110 = vector.extract_strided_slice %109 {offsets = [0, 0], sizes = [8, 48], strides = [1, 1]} : vector<8x512xf32> to vector<8x48xf32>
    %111 = arith.negf %110 : vector<8x48xf32>
    %112 = math.exp %111 : vector<8x48xf32>
    %cst_39 = arith.constant 1.000000e+00 : f32
    %113 = vector.broadcast %cst_39 : f32 to vector<8x48xf32>
    %114 = arith.addf %113, %112 : vector<8x48xf32>
    %115 = arith.divf %113, %114 : vector<8x48xf32>
    %116 = vector.extract_strided_slice %109 {offsets = [0, 128], sizes = [8, 48], strides = [1, 1]} : vector<8x512xf32> to vector<8x48xf32>
    %117 = arith.negf %116 : vector<8x48xf32>
    %118 = math.exp %117 : vector<8x48xf32>
    %cst_40 = arith.constant 1.000000e+00 : f32
    %119 = vector.broadcast %cst_40 : f32 to vector<8x48xf32>
    %120 = arith.addf %119, %118 : vector<8x48xf32>
    %121 = arith.divf %119, %120 : vector<8x48xf32>
    %122 = vector.extract_strided_slice %109 {offsets = [0, 256], sizes = [8, 48], strides = [1, 1]} : vector<8x512xf32> to vector<8x48xf32>
    %123 = math.tanh %122 : vector<8x48xf32>
    %124 = vector.extract_strided_slice %109 {offsets = [0, 384], sizes = [8, 48], strides = [1, 1]} : vector<8x512xf32> to vector<8x48xf32>
    %125 = arith.negf %124 : vector<8x48xf32>
    %126 = math.exp %125 : vector<8x48xf32>
    %cst_41 = arith.constant 1.000000e+00 : f32
    %127 = vector.broadcast %cst_41 : f32 to vector<8x48xf32>
    %128 = arith.addf %127, %126 : vector<8x48xf32>
    %129 = arith.divf %127, %128 : vector<8x48xf32>
    %130 = arith.mulf %121, %71 : vector<8x48xf32>
    %131 = arith.mulf %115, %123 : vector<8x48xf32>
    %132 = arith.addf %130, %131 : vector<8x48xf32>
    %133 = math.tanh %132 : vector<8x48xf32>
    %134 = arith.mulf %129, %133 : vector<8x48xf32>
    %c8_42 = arith.constant 8 : index
    %c0_43 = arith.constant 0 : index
    %135 = vector.load %arg10[%c8_42, %c0_43] : memref<64x48xf32, #tpu.memory_space<vmem>>, vector<8x48xf32>
    tpu.vector_store %arg10[%c8_42, %c0_43], %134 {strides = array<i32>} : memref<64x48xf32, #tpu.memory_space<vmem>>, vector<8x48xf32>,
    %c16 = arith.constant 16 : index
    %c0_44 = arith.constant 0 : index
    %136 = vector.load %arg9[%c16, %c0_44] : memref<64x512xf32, #tpu.memory_space<vmem>>, vector<8x512xf32>
    %137 = arith.truncf %104 : vector<8x48xf32> to vector<8x48xbf16>
    %c0_45 = arith.constant 0 : index
    %c0_46 = arith.constant 0 : index
    %138 = vector.load %arg3[%c0_45, %c0_46] : memref<48x512xbf16, #tpu.memory_space<vmem>>, vector<48x512xbf16>
    %cst_47 = arith.constant dense<0.000000e+00> : vector<8x512xf32>
    %139 = tpu.matmul %137, %138, %cst_47 {dimension_numbers = #tpu.dot_dimension_numbers<[1], [0], [0], [1], [0, 0, 1, 1], [], []>} : vector<8x48xbf16>, vector<48x512xbf16>, vector<8x512xf32> -> vector<8x512xf32>
    %140 = arith.addf %136, %139 : vector<8x512xf32>
    %141 = vector.extract_strided_slice %140 {offsets = [0, 0], sizes = [8, 48], strides = [1, 1]} : vector<8x512xf32> to vector<8x48xf32>
    %142 = arith.negf %141 : vector<8x48xf32>
    %143 = math.exp %142 : vector<8x48xf32>
    %cst_48 = arith.constant 1.000000e+00 : f32
    %144 = vector.broadcast %cst_48 : f32 to vector<8x48xf32>
    %145 = arith.addf %144, %143 : vector<8x48xf32>
    %146 = arith.divf %144, %145 : vector<8x48xf32>
    %147 = vector.extract_strided_slice %140 {offsets = [0, 128], sizes = [8, 48], strides = [1, 1]} : vector<8x512xf32> to vector<8x48xf32>
    %148 = arith.negf %147 : vector<8x48xf32>
    %149 = math.exp %148 : vector<8x48xf32>
    %cst_49 = arith.constant 1.000000e+00 : f32
    %150 = vector.broadcast %cst_49 : f32 to vector<8x48xf32>
    %151 = arith.addf %150, %149 : vector<8x48xf32>
    %152 = arith.divf %150, %151 : vector<8x48xf32>
    %153 = vector.extract_strided_slice %140 {offsets = [0, 256], sizes = [8, 48], strides = [1, 1]} : vector<8x512xf32> to vector<8x48xf32>
    %154 = math.tanh %153 : vector<8x48xf32>
    %155 = vector.extract_strided_slice %140 {offsets = [0, 384], sizes = [8, 48], strides = [1, 1]} : vector<8x512xf32> to vector<8x48xf32>
    %156 = arith.negf %155 : vector<8x48xf32>
    %157 = math.exp %156 : vector<8x48xf32>
    %cst_50 = arith.constant 1.000000e+00 : f32
    %158 = vector.broadcast %cst_50 : f32 to vector<8x48xf32>
    %159 = arith.addf %158, %157 : vector<8x48xf32>
    %160 = arith.divf %158, %159 : vector<8x48xf32>
    %161 = arith.mulf %152, %102 : vector<8x48xf32>
    %162 = arith.mulf %146, %154 : vector<8x48xf32>
    %163 = arith.addf %161, %162 : vector<8x48xf32>
    %164 = math.tanh %163 : vector<8x48xf32>
    %165 = arith.mulf %160, %164 : vector<8x48xf32>
    %166 = tpu.concatenate %165, %134 in 1 : vector<8x48xf32>, vector<8x48xf32> -> vector<8x96xf32>
    %167 = arith.truncf %166 : vector<8x96xf32> to vector<8x96xbf16>
    %c0_51 = arith.constant 0 : index
    %c0_52 = arith.constant 0 : index
    %168 = vector.load %arg4[%c0_51, %c0_52] : memref<96x512xbf16, #tpu.memory_space<vmem>>, vector<96x512xbf16>
    %cst_53 = arith.constant dense<0.000000e+00> : vector<8x512xf32>
    %169 = tpu.matmul %167, %168, %cst_53 {dimension_numbers = #tpu.dot_dimension_numbers<[1], [0], [0], [1], [0, 0, 1, 1], [], []>} : vector<8x96xbf16>, vector<96x512xbf16>, vector<8x512xf32> -> vector<8x512xf32>
    %170 = arith.addf %169, %9 : vector<8x512xf32>
    %171 = vector.extract_strided_slice %170 {offsets = [0, 0], sizes = [8, 48], strides = [1, 1]} : vector<8x512xf32> to vector<8x48xf32>
    %172 = arith.negf %171 : vector<8x48xf32>
    %173 = math.exp %172 : vector<8x48xf32>
    %cst_54 = arith.constant 1.000000e+00 : f32
    %174 = vector.broadcast %cst_54 : f32 to vector<8x48xf32>
    %175 = arith.addf %174, %173 : vector<8x48xf32>
    %176 = arith.divf %174, %175 : vector<8x48xf32>
    %177 = vector.extract_strided_slice %170 {offsets = [0, 128], sizes = [8, 48], strides = [1, 1]} : vector<8x512xf32> to vector<8x48xf32>
    %178 = arith.negf %177 : vector<8x48xf32>
    %179 = math.exp %178 : vector<8x48xf32>
    %cst_55 = arith.constant 1.000000e+00 : f32
    %180 = vector.broadcast %cst_55 : f32 to vector<8x48xf32>
    %181 = arith.addf %180, %179 : vector<8x48xf32>
    %182 = arith.divf %180, %181 : vector<8x48xf32>
    %183 = vector.extract_strided_slice %170 {offsets = [0, 256], sizes = [8, 48], strides = [1, 1]} : vector<8x512xf32> to vector<8x48xf32>
    %184 = math.tanh %183 : vector<8x48xf32>
    %185 = vector.extract_strided_slice %170 {offsets = [0, 384], sizes = [8, 48], strides = [1, 1]} : vector<8x512xf32> to vector<8x48xf32>
    %186 = arith.negf %185 : vector<8x48xf32>
    %187 = math.exp %186 : vector<8x48xf32>
    %cst_56 = arith.constant 1.000000e+00 : f32
    %188 = vector.broadcast %cst_56 : f32 to vector<8x48xf32>
    %189 = arith.addf %188, %187 : vector<8x48xf32>
    %190 = arith.divf %188, %189 : vector<8x48xf32>
    %191 = arith.mulf %182, %132 : vector<8x48xf32>
    %192 = arith.mulf %176, %184 : vector<8x48xf32>
    %193 = arith.addf %191, %192 : vector<8x48xf32>
    %194 = math.tanh %193 : vector<8x48xf32>
    %195 = arith.mulf %190, %194 : vector<8x48xf32>
    %c16_57 = arith.constant 16 : index
    %c0_58 = arith.constant 0 : index
    %196 = vector.load %arg10[%c16_57, %c0_58] : memref<64x48xf32, #tpu.memory_space<vmem>>, vector<8x48xf32>
    tpu.vector_store %arg10[%c16_57, %c0_58], %195 {strides = array<i32>} : memref<64x48xf32, #tpu.memory_space<vmem>>, vector<8x48xf32>,
    %c24 = arith.constant 24 : index
    %c0_59 = arith.constant 0 : index
    %197 = vector.load %arg9[%c24, %c0_59] : memref<64x512xf32, #tpu.memory_space<vmem>>, vector<8x512xf32>
    %198 = arith.truncf %165 : vector<8x48xf32> to vector<8x48xbf16>
    %c0_60 = arith.constant 0 : index
    %c0_61 = arith.constant 0 : index
    %199 = vector.load %arg3[%c0_60, %c0_61] : memref<48x512xbf16, #tpu.memory_space<vmem>>, vector<48x512xbf16>
    %cst_62 = arith.constant dense<0.000000e+00> : vector<8x512xf32>
    %200 = tpu.matmul %198, %199, %cst_62 {dimension_numbers = #tpu.dot_dimension_numbers<[1], [0], [0], [1], [0, 0, 1, 1], [], []>} : vector<8x48xbf16>, vector<48x512xbf16>, vector<8x512xf32> -> vector<8x512xf32>
    %201 = arith.addf %197, %200 : vector<8x512xf32>
    %202 = vector.extract_strided_slice %201 {offsets = [0, 0], sizes = [8, 48], strides = [1, 1]} : vector<8x512xf32> to vector<8x48xf32>
    %203 = arith.negf %202 : vector<8x48xf32>
    %204 = math.exp %203 : vector<8x48xf32>
    %cst_63 = arith.constant 1.000000e+00 : f32
    %205 = vector.broadcast %cst_63 : f32 to vector<8x48xf32>
    %206 = arith.addf %205, %204 : vector<8x48xf32>
    %207 = arith.divf %205, %206 : vector<8x48xf32>
    %208 = vector.extract_strided_slice %201 {offsets = [0, 128], sizes = [8, 48], strides = [1, 1]} : vector<8x512xf32> to vector<8x48xf32>
    %209 = arith.negf %208 : vector<8x48xf32>
    %210 = math.exp %209 : vector<8x48xf32>
    %cst_64 = arith.constant 1.000000e+00 : f32
    %211 = vector.broadcast %cst_64 : f32 to vector<8x48xf32>
    %212 = arith.addf %211, %210 : vector<8x48xf32>
    %213 = arith.divf %211, %212 : vector<8x48xf32>
    %214 = vector.extract_strided_slice %201 {offsets = [0, 256], sizes = [8, 48], strides = [1, 1]} : vector<8x512xf32> to vector<8x48xf32>
    %215 = math.tanh %214 : vector<8x48xf32>
    %216 = vector.extract_strided_slice %201 {offsets = [0, 384], sizes = [8, 48], strides = [1, 1]} : vector<8x512xf32> to vector<8x48xf32>
    %217 = arith.negf %216 : vector<8x48xf32>
    %218 = math.exp %217 : vector<8x48xf32>
    %cst_65 = arith.constant 1.000000e+00 : f32
    %219 = vector.broadcast %cst_65 : f32 to vector<8x48xf32>
    %220 = arith.addf %219, %218 : vector<8x48xf32>
    %221 = arith.divf %219, %220 : vector<8x48xf32>
    %222 = arith.mulf %213, %163 : vector<8x48xf32>
    %223 = arith.mulf %207, %215 : vector<8x48xf32>
    %224 = arith.addf %222, %223 : vector<8x48xf32>
    %225 = math.tanh %224 : vector<8x48xf32>
    %226 = arith.mulf %221, %225 : vector<8x48xf32>
    %227 = tpu.concatenate %226, %195 in 1 : vector<8x48xf32>, vector<8x48xf32> -> vector<8x96xf32>
    %228 = arith.truncf %227 : vector<8x96xf32> to vector<8x96xbf16>
    %c0_66 = arith.constant 0 : index
    %c0_67 = arith.constant 0 : index
    %229 = vector.load %arg4[%c0_66, %c0_67] : memref<96x512xbf16, #tpu.memory_space<vmem>>, vector<96x512xbf16>
    %cst_68 = arith.constant dense<0.000000e+00> : vector<8x512xf32>
    %230 = tpu.matmul %228, %229, %cst_68 {dimension_numbers = #tpu.dot_dimension_numbers<[1], [0], [0], [1], [0, 0, 1, 1], [], []>} : vector<8x96xbf16>, vector<96x512xbf16>, vector<8x512xf32> -> vector<8x512xf32>
    %231 = arith.addf %230, %9 : vector<8x512xf32>
    %232 = vector.extract_strided_slice %231 {offsets = [0, 0], sizes = [8, 48], strides = [1, 1]} : vector<8x512xf32> to vector<8x48xf32>
    %233 = arith.negf %232 : vector<8x48xf32>
    %234 = math.exp %233 : vector<8x48xf32>
    %cst_69 = arith.constant 1.000000e+00 : f32
    %235 = vector.broadcast %cst_69 : f32 to vector<8x48xf32>
    %236 = arith.addf %235, %234 : vector<8x48xf32>
    %237 = arith.divf %235, %236 : vector<8x48xf32>
    %238 = vector.extract_strided_slice %231 {offsets = [0, 128], sizes = [8, 48], strides = [1, 1]} : vector<8x512xf32> to vector<8x48xf32>
    %239 = arith.negf %238 : vector<8x48xf32>
    %240 = math.exp %239 : vector<8x48xf32>
    %cst_70 = arith.constant 1.000000e+00 : f32
    %241 = vector.broadcast %cst_70 : f32 to vector<8x48xf32>
    %242 = arith.addf %241, %240 : vector<8x48xf32>
    %243 = arith.divf %241, %242 : vector<8x48xf32>
    %244 = vector.extract_strided_slice %231 {offsets = [0, 256], sizes = [8, 48], strides = [1, 1]} : vector<8x512xf32> to vector<8x48xf32>
    %245 = math.tanh %244 : vector<8x48xf32>
    %246 = vector.extract_strided_slice %231 {offsets = [0, 384], sizes = [8, 48], strides = [1, 1]} : vector<8x512xf32> to vector<8x48xf32>
    %247 = arith.negf %246 : vector<8x48xf32>
    %248 = math.exp %247 : vector<8x48xf32>
    %cst_71 = arith.constant 1.000000e+00 : f32
    %249 = vector.broadcast %cst_71 : f32 to vector<8x48xf32>
    %250 = arith.addf %249, %248 : vector<8x48xf32>
    %251 = arith.divf %249, %250 : vector<8x48xf32>
    %252 = arith.mulf %243, %193 : vector<8x48xf32>
    %253 = arith.mulf %237, %245 : vector<8x48xf32>
    %254 = arith.addf %252, %253 : vector<8x48xf32>
    %255 = math.tanh %254 : vector<8x48xf32>
    %256 = arith.mulf %251, %255 : vector<8x48xf32>
    %c24_72 = arith.constant 24 : index
    %c0_73 = arith.constant 0 : index
    %257 = vector.load %arg10[%c24_72, %c0_73] : memref<64x48xf32, #tpu.memory_space<vmem>>, vector<8x48xf32>
    tpu.vector_store %arg10[%c24_72, %c0_73], %256 {strides = array<i32>} : memref<64x48xf32, #tpu.memory_space<vmem>>, vector<8x48xf32>,
    %c32 = arith.constant 32 : index
    %c0_74 = arith.constant 0 : index
    %258 = vector.load %arg9[%c32, %c0_74] : memref<64x512xf32, #tpu.memory_space<vmem>>, vector<8x512xf32>
    %259 = arith.truncf %226 : vector<8x48xf32> to vector<8x48xbf16>
    %c0_75 = arith.constant 0 : index
    %c0_76 = arith.constant 0 : index
    %260 = vector.load %arg3[%c0_75, %c0_76] : memref<48x512xbf16, #tpu.memory_space<vmem>>, vector<48x512xbf16>
    %cst_77 = arith.constant dense<0.000000e+00> : vector<8x512xf32>
    %261 = tpu.matmul %259, %260, %cst_77 {dimension_numbers = #tpu.dot_dimension_numbers<[1], [0], [0], [1], [0, 0, 1, 1], [], []>} : vector<8x48xbf16>, vector<48x512xbf16>, vector<8x512xf32> -> vector<8x512xf32>
    %262 = arith.addf %258, %261 : vector<8x512xf32>
    %263 = vector.extract_strided_slice %262 {offsets = [0, 0], sizes = [8, 48], strides = [1, 1]} : vector<8x512xf32> to vector<8x48xf32>
    %264 = arith.negf %263 : vector<8x48xf32>
    %265 = math.exp %264 : vector<8x48xf32>
    %cst_78 = arith.constant 1.000000e+00 : f32
    %266 = vector.broadcast %cst_78 : f32 to vector<8x48xf32>
    %267 = arith.addf %266, %265 : vector<8x48xf32>
    %268 = arith.divf %266, %267 : vector<8x48xf32>
    %269 = vector.extract_strided_slice %262 {offsets = [0, 128], sizes = [8, 48], strides = [1, 1]} : vector<8x512xf32> to vector<8x48xf32>
    %270 = arith.negf %269 : vector<8x48xf32>
    %271 = math.exp %270 : vector<8x48xf32>
    %cst_79 = arith.constant 1.000000e+00 : f32
    %272 = vector.broadcast %cst_79 : f32 to vector<8x48xf32>
    %273 = arith.addf %272, %271 : vector<8x48xf32>
    %274 = arith.divf %272, %273 : vector<8x48xf32>
    %275 = vector.extract_strided_slice %262 {offsets = [0, 256], sizes = [8, 48], strides = [1, 1]} : vector<8x512xf32> to vector<8x48xf32>
    %276 = math.tanh %275 : vector<8x48xf32>
    %277 = vector.extract_strided_slice %262 {offsets = [0, 384], sizes = [8, 48], strides = [1, 1]} : vector<8x512xf32> to vector<8x48xf32>
    %278 = arith.negf %277 : vector<8x48xf32>
    %279 = math.exp %278 : vector<8x48xf32>
    %cst_80 = arith.constant 1.000000e+00 : f32
    %280 = vector.broadcast %cst_80 : f32 to vector<8x48xf32>
    %281 = arith.addf %280, %279 : vector<8x48xf32>
    %282 = arith.divf %280, %281 : vector<8x48xf32>
    %283 = arith.mulf %274, %224 : vector<8x48xf32>
    %284 = arith.mulf %268, %276 : vector<8x48xf32>
    %285 = arith.addf %283, %284 : vector<8x48xf32>
    %286 = math.tanh %285 : vector<8x48xf32>
    %287 = arith.mulf %282, %286 : vector<8x48xf32>
    %288 = tpu.concatenate %287, %256 in 1 : vector<8x48xf32>, vector<8x48xf32> -> vector<8x96xf32>
    %289 = arith.truncf %288 : vector<8x96xf32> to vector<8x96xbf16>
    %c0_81 = arith.constant 0 : index
    %c0_82 = arith.constant 0 : index
    %290 = vector.load %arg4[%c0_81, %c0_82] : memref<96x512xbf16, #tpu.memory_space<vmem>>, vector<96x512xbf16>
    %cst_83 = arith.constant dense<0.000000e+00> : vector<8x512xf32>
    %291 = tpu.matmul %289, %290, %cst_83 {dimension_numbers = #tpu.dot_dimension_numbers<[1], [0], [0], [1], [0, 0, 1, 1], [], []>} : vector<8x96xbf16>, vector<96x512xbf16>, vector<8x512xf32> -> vector<8x512xf32>
    %292 = arith.addf %291, %9 : vector<8x512xf32>
    %293 = vector.extract_strided_slice %292 {offsets = [0, 0], sizes = [8, 48], strides = [1, 1]} : vector<8x512xf32> to vector<8x48xf32>
    %294 = arith.negf %293 : vector<8x48xf32>
    %295 = math.exp %294 : vector<8x48xf32>
    %cst_84 = arith.constant 1.000000e+00 : f32
    %296 = vector.broadcast %cst_84 : f32 to vector<8x48xf32>
    %297 = arith.addf %296, %295 : vector<8x48xf32>
    %298 = arith.divf %296, %297 : vector<8x48xf32>
    %299 = vector.extract_strided_slice %292 {offsets = [0, 128], sizes = [8, 48], strides = [1, 1]} : vector<8x512xf32> to vector<8x48xf32>
    %300 = arith.negf %299 : vector<8x48xf32>
    %301 = math.exp %300 : vector<8x48xf32>
    %cst_85 = arith.constant 1.000000e+00 : f32
    %302 = vector.broadcast %cst_85 : f32 to vector<8x48xf32>
    %303 = arith.addf %302, %301 : vector<8x48xf32>
    %304 = arith.divf %302, %303 : vector<8x48xf32>
    %305 = vector.extract_strided_slice %292 {offsets = [0, 256], sizes = [8, 48], strides = [1, 1]} : vector<8x512xf32> to vector<8x48xf32>
    %306 = math.tanh %305 : vector<8x48xf32>
    %307 = vector.extract_strided_slice %292 {offsets = [0, 384], sizes = [8, 48], strides = [1, 1]} : vector<8x512xf32> to vector<8x48xf32>
    %308 = arith.negf %307 : vector<8x48xf32>
    %309 = math.exp %308 : vector<8x48xf32>
    %cst_86 = arith.constant 1.000000e+00 : f32
    %310 = vector.broadcast %cst_86 : f32 to vector<8x48xf32>
    %311 = arith.addf %310, %309 : vector<8x48xf32>
    %312 = arith.divf %310, %311 : vector<8x48xf32>
    %313 = arith.mulf %304, %254 : vector<8x48xf32>
    %314 = arith.mulf %298, %306 : vector<8x48xf32>
    %315 = arith.addf %313, %314 : vector<8x48xf32>
    %316 = math.tanh %315 : vector<8x48xf32>
    %317 = arith.mulf %312, %316 : vector<8x48xf32>
    %c32_87 = arith.constant 32 : index
    %c0_88 = arith.constant 0 : index
    %318 = vector.load %arg10[%c32_87, %c0_88] : memref<64x48xf32, #tpu.memory_space<vmem>>, vector<8x48xf32>
    tpu.vector_store %arg10[%c32_87, %c0_88], %317 {strides = array<i32>} : memref<64x48xf32, #tpu.memory_space<vmem>>, vector<8x48xf32>,
    %c40 = arith.constant 40 : index
    %c0_89 = arith.constant 0 : index
    %319 = vector.load %arg9[%c40, %c0_89] : memref<64x512xf32, #tpu.memory_space<vmem>>, vector<8x512xf32>
    %320 = arith.truncf %287 : vector<8x48xf32> to vector<8x48xbf16>
    %c0_90 = arith.constant 0 : index
    %c0_91 = arith.constant 0 : index
    %321 = vector.load %arg3[%c0_90, %c0_91] : memref<48x512xbf16, #tpu.memory_space<vmem>>, vector<48x512xbf16>
    %cst_92 = arith.constant dense<0.000000e+00> : vector<8x512xf32>
    %322 = tpu.matmul %320, %321, %cst_92 {dimension_numbers = #tpu.dot_dimension_numbers<[1], [0], [0], [1], [0, 0, 1, 1], [], []>} : vector<8x48xbf16>, vector<48x512xbf16>, vector<8x512xf32> -> vector<8x512xf32>
    %323 = arith.addf %319, %322 : vector<8x512xf32>
    %324 = vector.extract_strided_slice %323 {offsets = [0, 0], sizes = [8, 48], strides = [1, 1]} : vector<8x512xf32> to vector<8x48xf32>
    %325 = arith.negf %324 : vector<8x48xf32>
    %326 = math.exp %325 : vector<8x48xf32>
    %cst_93 = arith.constant 1.000000e+00 : f32
    %327 = vector.broadcast %cst_93 : f32 to vector<8x48xf32>
    %328 = arith.addf %327, %326 : vector<8x48xf32>
    %329 = arith.divf %327, %328 : vector<8x48xf32>
    %330 = vector.extract_strided_slice %323 {offsets = [0, 128], sizes = [8, 48], strides = [1, 1]} : vector<8x512xf32> to vector<8x48xf32>
    %331 = arith.negf %330 : vector<8x48xf32>
    %332 = math.exp %331 : vector<8x48xf32>
    %cst_94 = arith.constant 1.000000e+00 : f32
    %333 = vector.broadcast %cst_94 : f32 to vector<8x48xf32>
    %334 = arith.addf %333, %332 : vector<8x48xf32>
    %335 = arith.divf %333, %334 : vector<8x48xf32>
    %336 = vector.extract_strided_slice %323 {offsets = [0, 256], sizes = [8, 48], strides = [1, 1]} : vector<8x512xf32> to vector<8x48xf32>
    %337 = math.tanh %336 : vector<8x48xf32>
    %338 = vector.extract_strided_slice %323 {offsets = [0, 384], sizes = [8, 48], strides = [1, 1]} : vector<8x512xf32> to vector<8x48xf32>
    %339 = arith.negf %338 : vector<8x48xf32>
    %340 = math.exp %339 : vector<8x48xf32>
    %cst_95 = arith.constant 1.000000e+00 : f32
    %341 = vector.broadcast %cst_95 : f32 to vector<8x48xf32>
    %342 = arith.addf %341, %340 : vector<8x48xf32>
    %343 = arith.divf %341, %342 : vector<8x48xf32>
    %344 = arith.mulf %335, %285 : vector<8x48xf32>
    %345 = arith.mulf %329, %337 : vector<8x48xf32>
    %346 = arith.addf %344, %345 : vector<8x48xf32>
    %347 = math.tanh %346 : vector<8x48xf32>
    %348 = arith.mulf %343, %347 : vector<8x48xf32>
    %349 = tpu.concatenate %348, %317 in 1 : vector<8x48xf32>, vector<8x48xf32> -> vector<8x96xf32>
    %350 = arith.truncf %349 : vector<8x96xf32> to vector<8x96xbf16>
    %c0_96 = arith.constant 0 : index
    %c0_97 = arith.constant 0 : index
    %351 = vector.load %arg4[%c0_96, %c0_97] : memref<96x512xbf16, #tpu.memory_space<vmem>>, vector<96x512xbf16>
    %cst_98 = arith.constant dense<0.000000e+00> : vector<8x512xf32>
    %352 = tpu.matmul %350, %351, %cst_98 {dimension_numbers = #tpu.dot_dimension_numbers<[1], [0], [0], [1], [0, 0, 1, 1], [], []>} : vector<8x96xbf16>, vector<96x512xbf16>, vector<8x512xf32> -> vector<8x512xf32>
    %353 = arith.addf %352, %9 : vector<8x512xf32>
    %354 = vector.extract_strided_slice %353 {offsets = [0, 0], sizes = [8, 48], strides = [1, 1]} : vector<8x512xf32> to vector<8x48xf32>
    %355 = arith.negf %354 : vector<8x48xf32>
    %356 = math.exp %355 : vector<8x48xf32>
    %cst_99 = arith.constant 1.000000e+00 : f32
    %357 = vector.broadcast %cst_99 : f32 to vector<8x48xf32>
    %358 = arith.addf %357, %356 : vector<8x48xf32>
    %359 = arith.divf %357, %358 : vector<8x48xf32>
    %360 = vector.extract_strided_slice %353 {offsets = [0, 128], sizes = [8, 48], strides = [1, 1]} : vector<8x512xf32> to vector<8x48xf32>
    %361 = arith.negf %360 : vector<8x48xf32>
    %362 = math.exp %361 : vector<8x48xf32>
    %cst_100 = arith.constant 1.000000e+00 : f32
    %363 = vector.broadcast %cst_100 : f32 to vector<8x48xf32>
    %364 = arith.addf %363, %362 : vector<8x48xf32>
    %365 = arith.divf %363, %364 : vector<8x48xf32>
    %366 = vector.extract_strided_slice %353 {offsets = [0, 256], sizes = [8, 48], strides = [1, 1]} : vector<8x512xf32> to vector<8x48xf32>
    %367 = math.tanh %366 : vector<8x48xf32>
    %368 = vector.extract_strided_slice %353 {offsets = [0, 384], sizes = [8, 48], strides = [1, 1]} : vector<8x512xf32> to vector<8x48xf32>
    %369 = arith.negf %368 : vector<8x48xf32>
    %370 = math.exp %369 : vector<8x48xf32>
    %cst_101 = arith.constant 1.000000e+00 : f32
    %371 = vector.broadcast %cst_101 : f32 to vector<8x48xf32>
    %372 = arith.addf %371, %370 : vector<8x48xf32>
    %373 = arith.divf %371, %372 : vector<8x48xf32>
    %374 = arith.mulf %365, %315 : vector<8x48xf32>
    %375 = arith.mulf %359, %367 : vector<8x48xf32>
    %376 = arith.addf %374, %375 : vector<8x48xf32>
    %377 = math.tanh %376 : vector<8x48xf32>
    %378 = arith.mulf %373, %377 : vector<8x48xf32>
    %c40_102 = arith.constant 40 : index
    %c0_103 = arith.constant 0 : index
    %379 = vector.load %arg10[%c40_102, %c0_103] : memref<64x48xf32, #tpu.memory_space<vmem>>, vector<8x48xf32>
    tpu.vector_store %arg10[%c40_102, %c0_103], %378 {strides = array<i32>} : memref<64x48xf32, #tpu.memory_space<vmem>>, vector<8x48xf32>,
    %c48 = arith.constant 48 : index
    %c0_104 = arith.constant 0 : index
    %380 = vector.load %arg9[%c48, %c0_104] : memref<64x512xf32, #tpu.memory_space<vmem>>, vector<8x512xf32>
    %381 = arith.truncf %348 : vector<8x48xf32> to vector<8x48xbf16>
    %c0_105 = arith.constant 0 : index
    %c0_106 = arith.constant 0 : index
    %382 = vector.load %arg3[%c0_105, %c0_106] : memref<48x512xbf16, #tpu.memory_space<vmem>>, vector<48x512xbf16>
    %cst_107 = arith.constant dense<0.000000e+00> : vector<8x512xf32>
    %383 = tpu.matmul %381, %382, %cst_107 {dimension_numbers = #tpu.dot_dimension_numbers<[1], [0], [0], [1], [0, 0, 1, 1], [], []>} : vector<8x48xbf16>, vector<48x512xbf16>, vector<8x512xf32> -> vector<8x512xf32>
    %384 = arith.addf %380, %383 : vector<8x512xf32>
    %385 = vector.extract_strided_slice %384 {offsets = [0, 0], sizes = [8, 48], strides = [1, 1]} : vector<8x512xf32> to vector<8x48xf32>
    %386 = arith.negf %385 : vector<8x48xf32>
    %387 = math.exp %386 : vector<8x48xf32>
    %cst_108 = arith.constant 1.000000e+00 : f32
    %388 = vector.broadcast %cst_108 : f32 to vector<8x48xf32>
    %389 = arith.addf %388, %387 : vector<8x48xf32>
    %390 = arith.divf %388, %389 : vector<8x48xf32>
    %391 = vector.extract_strided_slice %384 {offsets = [0, 128], sizes = [8, 48], strides = [1, 1]} : vector<8x512xf32> to vector<8x48xf32>
    %392 = arith.negf %391 : vector<8x48xf32>
    %393 = math.exp %392 : vector<8x48xf32>
    %cst_109 = arith.constant 1.000000e+00 : f32
    %394 = vector.broadcast %cst_109 : f32 to vector<8x48xf32>
    %395 = arith.addf %394, %393 : vector<8x48xf32>
    %396 = arith.divf %394, %395 : vector<8x48xf32>
    %397 = vector.extract_strided_slice %384 {offsets = [0, 256], sizes = [8, 48], strides = [1, 1]} : vector<8x512xf32> to vector<8x48xf32>
    %398 = math.tanh %397 : vector<8x48xf32>
    %399 = vector.extract_strided_slice %384 {offsets = [0, 384], sizes = [8, 48], strides = [1, 1]} : vector<8x512xf32> to vector<8x48xf32>
    %400 = arith.negf %399 : vector<8x48xf32>
    %401 = math.exp %400 : vector<8x48xf32>
    %cst_110 = arith.constant 1.000000e+00 : f32
    %402 = vector.broadcast %cst_110 : f32 to vector<8x48xf32>
    %403 = arith.addf %402, %401 : vector<8x48xf32>
    %404 = arith.divf %402, %403 : vector<8x48xf32>
    %405 = arith.mulf %396, %346 : vector<8x48xf32>
    %406 = arith.mulf %390, %398 : vector<8x48xf32>
    %407 = arith.addf %405, %406 : vector<8x48xf32>
    %408 = math.tanh %407 : vector<8x48xf32>
    %409 = arith.mulf %404, %408 : vector<8x48xf32>
    %410 = tpu.concatenate %409, %378 in 1 : vector<8x48xf32>, vector<8x48xf32> -> vector<8x96xf32>
    %411 = arith.truncf %410 : vector<8x96xf32> to vector<8x96xbf16>
    %c0_111 = arith.constant 0 : index
    %c0_112 = arith.constant 0 : index
    %412 = vector.load %arg4[%c0_111, %c0_112] : memref<96x512xbf16, #tpu.memory_space<vmem>>, vector<96x512xbf16>
    %cst_113 = arith.constant dense<0.000000e+00> : vector<8x512xf32>
    %413 = tpu.matmul %411, %412, %cst_113 {dimension_numbers = #tpu.dot_dimension_numbers<[1], [0], [0], [1], [0, 0, 1, 1], [], []>} : vector<8x96xbf16>, vector<96x512xbf16>, vector<8x512xf32> -> vector<8x512xf32>
    %414 = arith.addf %413, %9 : vector<8x512xf32>
    %415 = vector.extract_strided_slice %414 {offsets = [0, 0], sizes = [8, 48], strides = [1, 1]} : vector<8x512xf32> to vector<8x48xf32>
    %416 = arith.negf %415 : vector<8x48xf32>
    %417 = math.exp %416 : vector<8x48xf32>
    %cst_114 = arith.constant 1.000000e+00 : f32
    %418 = vector.broadcast %cst_114 : f32 to vector<8x48xf32>
    %419 = arith.addf %418, %417 : vector<8x48xf32>
    %420 = arith.divf %418, %419 : vector<8x48xf32>
    %421 = vector.extract_strided_slice %414 {offsets = [0, 128], sizes = [8, 48], strides = [1, 1]} : vector<8x512xf32> to vector<8x48xf32>
    %422 = arith.negf %421 : vector<8x48xf32>
    %423 = math.exp %422 : vector<8x48xf32>
    %cst_115 = arith.constant 1.000000e+00 : f32
    %424 = vector.broadcast %cst_115 : f32 to vector<8x48xf32>
    %425 = arith.addf %424, %423 : vector<8x48xf32>
    %426 = arith.divf %424, %425 : vector<8x48xf32>
    %427 = vector.extract_strided_slice %414 {offsets = [0, 256], sizes = [8, 48], strides = [1, 1]} : vector<8x512xf32> to vector<8x48xf32>
    %428 = math.tanh %427 : vector<8x48xf32>
    %429 = vector.extract_strided_slice %414 {offsets = [0, 384], sizes = [8, 48], strides = [1, 1]} : vector<8x512xf32> to vector<8x48xf32>
    %430 = arith.negf %429 : vector<8x48xf32>
    %431 = math.exp %430 : vector<8x48xf32>
    %cst_116 = arith.constant 1.000000e+00 : f32
    %432 = vector.broadcast %cst_116 : f32 to vector<8x48xf32>
    %433 = arith.addf %432, %431 : vector<8x48xf32>
    %434 = arith.divf %432, %433 : vector<8x48xf32>
    %435 = arith.mulf %426, %376 : vector<8x48xf32>
    %436 = arith.mulf %420, %428 : vector<8x48xf32>
    %437 = arith.addf %435, %436 : vector<8x48xf32>
    %438 = math.tanh %437 : vector<8x48xf32>
    %439 = arith.mulf %434, %438 : vector<8x48xf32>
    %c48_117 = arith.constant 48 : index
    %c0_118 = arith.constant 0 : index
    %440 = vector.load %arg10[%c48_117, %c0_118] : memref<64x48xf32, #tpu.memory_space<vmem>>, vector<8x48xf32>
    tpu.vector_store %arg10[%c48_117, %c0_118], %439 {strides = array<i32>} : memref<64x48xf32, #tpu.memory_space<vmem>>, vector<8x48xf32>,
    %c56 = arith.constant 56 : index
    %c0_119 = arith.constant 0 : index
    %441 = vector.load %arg9[%c56, %c0_119] : memref<64x512xf32, #tpu.memory_space<vmem>>, vector<8x512xf32>
    %442 = arith.truncf %409 : vector<8x48xf32> to vector<8x48xbf16>
    %c0_120 = arith.constant 0 : index
    %c0_121 = arith.constant 0 : index
    %443 = vector.load %arg3[%c0_120, %c0_121] : memref<48x512xbf16, #tpu.memory_space<vmem>>, vector<48x512xbf16>
    %cst_122 = arith.constant dense<0.000000e+00> : vector<8x512xf32>
    %444 = tpu.matmul %442, %443, %cst_122 {dimension_numbers = #tpu.dot_dimension_numbers<[1], [0], [0], [1], [0, 0, 1, 1], [], []>} : vector<8x48xbf16>, vector<48x512xbf16>, vector<8x512xf32> -> vector<8x512xf32>
    %445 = arith.addf %441, %444 : vector<8x512xf32>
    %446 = vector.extract_strided_slice %445 {offsets = [0, 0], sizes = [8, 48], strides = [1, 1]} : vector<8x512xf32> to vector<8x48xf32>
    %447 = arith.negf %446 : vector<8x48xf32>
    %448 = math.exp %447 : vector<8x48xf32>
    %cst_123 = arith.constant 1.000000e+00 : f32
    %449 = vector.broadcast %cst_123 : f32 to vector<8x48xf32>
    %450 = arith.addf %449, %448 : vector<8x48xf32>
    %451 = arith.divf %449, %450 : vector<8x48xf32>
    %452 = vector.extract_strided_slice %445 {offsets = [0, 128], sizes = [8, 48], strides = [1, 1]} : vector<8x512xf32> to vector<8x48xf32>
    %453 = arith.negf %452 : vector<8x48xf32>
    %454 = math.exp %453 : vector<8x48xf32>
    %cst_124 = arith.constant 1.000000e+00 : f32
    %455 = vector.broadcast %cst_124 : f32 to vector<8x48xf32>
    %456 = arith.addf %455, %454 : vector<8x48xf32>
    %457 = arith.divf %455, %456 : vector<8x48xf32>
    %458 = vector.extract_strided_slice %445 {offsets = [0, 256], sizes = [8, 48], strides = [1, 1]} : vector<8x512xf32> to vector<8x48xf32>
    %459 = math.tanh %458 : vector<8x48xf32>
    %460 = vector.extract_strided_slice %445 {offsets = [0, 384], sizes = [8, 48], strides = [1, 1]} : vector<8x512xf32> to vector<8x48xf32>
    %461 = arith.negf %460 : vector<8x48xf32>
    %462 = math.exp %461 : vector<8x48xf32>
    %cst_125 = arith.constant 1.000000e+00 : f32
    %463 = vector.broadcast %cst_125 : f32 to vector<8x48xf32>
    %464 = arith.addf %463, %462 : vector<8x48xf32>
    %465 = arith.divf %463, %464 : vector<8x48xf32>
    %466 = arith.mulf %457, %407 : vector<8x48xf32>
    %467 = arith.mulf %451, %459 : vector<8x48xf32>
    %468 = arith.addf %466, %467 : vector<8x48xf32>
    %469 = math.tanh %468 : vector<8x48xf32>
    %470 = arith.mulf %465, %469 : vector<8x48xf32>
    %471 = tpu.concatenate %470, %439 in 1 : vector<8x48xf32>, vector<8x48xf32> -> vector<8x96xf32>
    %472 = arith.truncf %471 : vector<8x96xf32> to vector<8x96xbf16>
    %c0_126 = arith.constant 0 : index
    %c0_127 = arith.constant 0 : index
    %473 = vector.load %arg4[%c0_126, %c0_127] : memref<96x512xbf16, #tpu.memory_space<vmem>>, vector<96x512xbf16>
    %cst_128 = arith.constant dense<0.000000e+00> : vector<8x512xf32>
    %474 = tpu.matmul %472, %473, %cst_128 {dimension_numbers = #tpu.dot_dimension_numbers<[1], [0], [0], [1], [0, 0, 1, 1], [], []>} : vector<8x96xbf16>, vector<96x512xbf16>, vector<8x512xf32> -> vector<8x512xf32>
    %475 = arith.addf %474, %9 : vector<8x512xf32>
    %476 = vector.extract_strided_slice %475 {offsets = [0, 0], sizes = [8, 48], strides = [1, 1]} : vector<8x512xf32> to vector<8x48xf32>
    %477 = arith.negf %476 : vector<8x48xf32>
    %478 = math.exp %477 : vector<8x48xf32>
    %cst_129 = arith.constant 1.000000e+00 : f32
    %479 = vector.broadcast %cst_129 : f32 to vector<8x48xf32>
    %480 = arith.addf %479, %478 : vector<8x48xf32>
    %481 = arith.divf %479, %480 : vector<8x48xf32>
    %482 = vector.extract_strided_slice %475 {offsets = [0, 128], sizes = [8, 48], strides = [1, 1]} : vector<8x512xf32> to vector<8x48xf32>
    %483 = arith.negf %482 : vector<8x48xf32>
    %484 = math.exp %483 : vector<8x48xf32>
    %cst_130 = arith.constant 1.000000e+00 : f32
    %485 = vector.broadcast %cst_130 : f32 to vector<8x48xf32>
    %486 = arith.addf %485, %484 : vector<8x48xf32>
    %487 = arith.divf %485, %486 : vector<8x48xf32>
    %488 = vector.extract_strided_slice %475 {offsets = [0, 256], sizes = [8, 48], strides = [1, 1]} : vector<8x512xf32> to vector<8x48xf32>
    %489 = math.tanh %488 : vector<8x48xf32>
    %490 = vector.extract_strided_slice %475 {offsets = [0, 384], sizes = [8, 48], strides = [1, 1]} : vector<8x512xf32> to vector<8x48xf32>
    %491 = arith.negf %490 : vector<8x48xf32>
    %492 = math.exp %491 : vector<8x48xf32>
    %cst_131 = arith.constant 1.000000e+00 : f32
    %493 = vector.broadcast %cst_131 : f32 to vector<8x48xf32>
    %494 = arith.addf %493, %492 : vector<8x48xf32>
    %495 = arith.divf %493, %494 : vector<8x48xf32>
    %496 = arith.mulf %487, %437 : vector<8x48xf32>
    %497 = arith.mulf %481, %489 : vector<8x48xf32>
    %498 = arith.addf %496, %497 : vector<8x48xf32>
    %499 = math.tanh %498 : vector<8x48xf32>
    %500 = arith.mulf %495, %499 : vector<8x48xf32>
    %c56_132 = arith.constant 56 : index
    %c0_133 = arith.constant 0 : index
    %501 = vector.load %arg10[%c56_132, %c0_133] : memref<64x48xf32, #tpu.memory_space<vmem>>, vector<8x48xf32>
    tpu.vector_store %arg10[%c56_132, %c0_133], %500 {strides = array<i32>} : memref<64x48xf32, #tpu.memory_space<vmem>>, vector<8x48xf32>,
    %c0_134 = arith.constant 0 : index
    %c0_135 = arith.constant 0 : index
    %502 = vector.load %arg10[%c0_134, %c0_135] : memref<64x48xf32, #tpu.memory_space<vmem>>, vector<64x48xf32>
    %c0_136 = arith.constant 0 : index
    %c0_137 = arith.constant 0 : index
    %503 = vector.load %arg6[%c0_136, %c0_137] : memref<48x1xf32, #tpu.memory_space<vmem>>, vector<48x1xf32>
    %cst_138 = arith.constant dense<0.000000e+00> : vector<64x1xf32>
    %504 = tpu.matmul %502, %503, %cst_138 {dimension_numbers = #tpu.dot_dimension_numbers<[1], [0], [0], [1], [0, 0, 1, 1], [], []>} : vector<64x48xf32>, vector<48x1xf32>, vector<64x1xf32> -> vector<64x1xf32>
    %c0_139 = arith.constant 0 : index
    %c0_140 = arith.constant 0 : index
    %505 = vector.load %arg7[%c0_139, %c0_140] : memref<1x1xf32, #tpu.memory_space<vmem>>, vector<1x1xf32>
    %506 = vector.broadcast %505 : vector<1x1xf32> to vector<64x1xf32>
    %507 = arith.addf %504, %506 : vector<64x1xf32>
    %c0_141 = arith.constant 0 : index
    %c0_142 = arith.constant 0 : index
    %508 = vector.load %arg8[%c0_141, %c0_142] : memref<64x1xf32, #tpu.memory_space<vmem>>, vector<64x1xf32>
    tpu.vector_store %arg8[%c0_141, %c0_142], %507 {strides = array<i32>} : memref<64x1xf32, #tpu.memory_space<vmem>>, vector<64x1xf32>,
    return
  }
}

</mosaic_0001>

<bundles_post_ra>
// kernel: tpu_custom_call.1
= control target key start
LH: loop header
LB: loop body
LE: loop exit
PB: predicated region body
PF: predicated region fallthrough
CT: control target
= control target key end

     0   :  { %s7922_s0 = inlined_call_operand.vmem [shape: f32[64,2], index: 0, kind: input, shape index: {}]   ;;  %s7923_s1 = inlined_call_operand.vmem [shape: f32[2,512], index: 1, kind: input, shape index: {}]   ;;  %s7924_s2 = inlined_call_operand.vmem [shape: f32[1,512], index: 2, kind: input, shape index: {}]   ;;  %s7925_s3 = inlined_call_operand.vmem [shape: bf16[48,512], index: 3, kind: input, shape index: {}]   ;;  %s7926_s4 = inlined_call_operand.hbm [shape: bf16[96,512], index: 4, kind: input, shape index: {}]   ;;  %s7927_s5 = inlined_call_operand.vmem [shape: f32[1,512], index: 5, kind: input, shape index: {}]   ;;  %s7928_s6 = inlined_call_operand.vmem [shape: f32[48,1], index: 6, kind: input, shape index: {}]   ;;  %s7929_s7 = inlined_call_operand.<no memory space> [shape: f32[1,1], index: 7, kind: input, shape index: {}]   ;;  %s7930_s8 = inlined_call_operand.vmem [shape: f32[64,1], index: 8, kind: output, shape index: {}]  }
   0x1   :  { %v13_v0 = vstv %s7929_s7 }
   0x2   :  { %14 = vst [vmem:[#allocation4] sm:$0x1] %v13_v0 }
   0x3   :  { %15 = vsyncpa [#allocation6], 0  ;;  %s28_s9 = sshll.u32 %s7926_s4, 4  ;;  %s6033_s10 = smov [#allocation5]   ;;  %s29_s9 = int_to_ptr.hbm [resolvable:$true] %s28_s9 }
   0x4   :  { %s30_s11 = sshll.u32 %s6033_s10, 4  ;;  %s6034_s12 = smov 256   ;;  %s31_s11 = int_to_ptr.vmem [resolvable:$true] %s30_s11 }
   0x5   :  { %s6035_s13 = smov 16  }
   0x6   :  { %36 = dma.hbm_to_vmem [thread:$0]  %s29_s9, 3072, %s31_s11, [#allocation6], %s6034_s12, %s6034_s12, %s6035_s13  }
   0x7   :  { %6031 = dma.done.wait [#allocation6], 3072  }
   0x8   :  { %6032 = vsyncadd [#allocation6], 4294964224  ;;  %v56_v1 = vld [vmem:[%s7923_s1] sm:$0xff]  ;;  %vm98_vm0 = vcmask 1041408   ;;  %v6095_v2 = vld [vmem:[%s7922_s0 + $0x28] sm:$0xff]  ;;  %vm73_vm1 = vcmask 15360  }
   0x9   :  { %68 = vst [vmem:[#allocation1] ss:$4 sm:$0xff] %v56_v1  ;;  %v4221_v3 = vld [vmem:[%s7925_s3 + $0x40] sm:$0xf]  ;;  %v5465_v4 = vld [vmem:[%s7925_s3 + $0x4c] sm:$0xf0] }
   0xa   :  { %v6106_v5 = vld [vmem:[%s7922_s0 + $0x30] sm:$0xff]  ;;  %v48_v6 = vld [vmem:[%s7922_s0] sm:$0xff]  ;;  %v5464_v7 = vld [vmem:[%s7925_s3 + $0x4c] sm:$0xf]  ;;  %v4222_v14 = vor.u32 %v5465_v4, %v4221_v3  ;;  %v6036_v50 = vmov 0   ;;  %vm389_vm14 = vcmask 392192  }
   0xb   :  { %v4231_v8 = vld [vmem:[%s7925_s3 + $0x58] sm:$0xf0]  ;;  %v4205_v9 = vld [vmem:[%s7925_s3 + $0x20] sm:$0xf]  ;;  %v4229_v10 = vld [vmem:[%s7925_s3 + $0x48] sm:$0xf] }
   0xc   :  { %v5466_v11 = vld [vmem:[%s7925_s3 + $0x54] sm:$0xf0]  ;;  %v4234_v16 = vor.u32 %v5464_v7, %v4231_v8  ;;  %v5461_v17 = vld [vmem:[%s7925_s3 + $0x2c] sm:$0xf0]  ;;  %v49_v22 = vld [vmem:[%s7922_s0 + $0x8] sm:$0xff]  ;;  %vm658_vm15 = vcmask 785408  }
   0xd   :  { %v4230_v19 = vor.u32 %v5466_v11, %v4229_v10  ;;  %v4206_v20 = vor.u32 %v5461_v17, %v4205_v9  ;;  %v6144_v21 = vld [vmem:[%s7922_s0 + $0x38] sm:$0xff]  ;;  %v4189_v23 = vld [vmem:[%s7925_s3] sm:$0xf]  ;;  %v5457_v24 = vld [vmem:[%s7925_s3 + $0xc] sm:$0xf0] }
   0xe   :  { %v5460_v25 = vld [vmem:[%s7925_s3 + $0x2c] sm:$0xf]  ;;  %v4190_v26 = vor.u32 %v5457_v24, %v4189_v23  ;;  %v4215_v27 = vld [vmem:[%s7925_s3 + $0x38] sm:$0xf0]  ;;  %v50_v29 = vld [vmem:[%s7922_s0 + $0x10] sm:$0xff] }
   0xf   :  { %v4218_v28 = vor.u32 %v5460_v25, %v4215_v27  ;;  %v4213_v30 = vld [vmem:[%s7925_s3 + $0x28] sm:$0xf]  ;;  %v5462_v31 = vld [vmem:[%s7925_s3 + $0x34] sm:$0xf0]  ;;  %v52_v34 = vld [vmem:[%s7922_s0 + $0x20] sm:$0xff] }
  0x10   :  { %v69_v12 = vld.sshfl [vmem:[#allocation1] sm:$0xff pattern:$0x73625140]  ;;  %v70_v13 = vld.sshfl [vmem:[#allocation1 + $0x8] sm:$0xff pattern:$0x73625140]  ;;  %v4214_v32 = vor.u32 %v5462_v31, %v4213_v30 }
  0x11   :  { %5743 = vmatpush.msk.msra.mxu2 %vm98_vm0, %v69_v12  ;;  %5744 = vmatpush.msk.msra.mxu3 %vm98_vm0, %v69_v12  ;;  %v72_v15 = vld.sshfl [vmem:[#allocation1 + $0x18] sm:$0xff pattern:$0x73625140]  ;;  %v71_v18 = vld.sshfl [vmem:[#allocation1 + $0x10] sm:$0xff pattern:$0x73625140] }
  0x12   :  { %4160 = vmatpush.msk.msra.mxu1 %vm98_vm0, %v70_v13  ;;  %4157 = vmatmul.msk.f32.vlgmr.msra.gmra.mxu2 %vm73_vm1, %v6095_v2  ;;  %v51_v33 = vld [vmem:[%s7922_s0 + $0x18] sm:$0xff]  ;;  %v5463_v35 = vld [vmem:[%s7925_s3 + $0x44] sm:$0xf]  ;;  %v4223_v36 = vld [vmem:[%s7925_s3 + $0x50] sm:$0xf0] }
  0x13   :  { %4158 = vmatmul.msk.f32.vlgmr.msra.gmra.mxu3 %vm73_vm1, %v6106_v5  ;;  %4161 = vmatmul.msk.f32.vlgmr.msra.gmra.mxu1 %vm73_vm1, %v48_v6  ;;  %v5456_v37 = vld [vmem:[%s7925_s3 + $0xc] sm:$0xf]  ;;  %v4226_v38 = vor.u32 %v5463_v35, %v4223_v36  ;;  %v4199_v39 = vld [vmem:[%s7925_s3 + $0x18] sm:$0xf0]  ;;  %v4197_v40 = vld [vmem:[%s7925_s3 + $0x8] sm:$0xf] }
  0x14   :  { %398 = vmatpush.bf16.msrb.mxu1 %v4222_v14  ;;  %4178 = vmatpush.msk.msrb.mxu3 %vm98_vm0, %v72_v15  ;;  %v5458_v41 = vld [vmem:[%s7925_s3 + $0x14] sm:$0xf0]  ;;  %v4202_v42 = vor.u32 %v5456_v37, %v4199_v39  ;;  %v5459_v44 = vld [vmem:[%s7925_s3 + $0x24] sm:$0xf]  ;;  %v4207_v45 = vld [vmem:[%s7925_s3 + $0x30] sm:$0xf0] }
  0x15   :  { %4169 = vmatpush.msk.msrb.mxu2 %vm98_vm0, %v71_v18  ;;  %4151 = vmatpush.msk.msra.mxu0 %vm98_vm0, %v69_v12  ;;  %v4198_v43 = vor.u32 %v5458_v41, %v4197_v40  ;;  %v4210_v46 = vor.u32 %v5459_v44, %v4207_v45  ;;  %v5455_v47 = vld [vmem:[%s7925_s3 + $0x4] sm:$0xf]  ;;  %v4191_v48 = vld [vmem:[%s7925_s3 + $0x10] sm:$0xf0]  ;;  %v57_v55 = vld [vmem:[%s7924_s2] sm:$0xf] }
  0x16   :  { %437 = vmatpush.bf16.msra.mxu3 %v4234_v16  ;;  %4152 = vmatmul.msk.f32.vlgmr.msra.gmra.mxu0 %vm73_vm1, %v48_v6  ;;  %v4194_v49 = vor.u32 %v5455_v47, %v4191_v48  ;;  %v6259_v58 = vperm.slane %v57_v55, 1  ;;  %v6270_v0 = vperm.slane %v57_v55, 2  ;;  %v4320_v31 = vld [vmem:[#allocation5 + $0xa0] sm:$0xf]  ;;  %v4322_v36 = vld [vmem:[#allocation5 + $0xb0] sm:$0xf0] }
  0x17   :  { %424 = vmatpush.bf16.msra.mxu2 %v4230_v19  ;;  %v4328_v37 = vld [vmem:[#allocation5 + $0xa8] sm:$0xf]  ;;  %v4304_v45 = vld [vmem:[#allocation5 + $0x80] sm:$0xf]  ;;  %v5483_v47 = vld [vmem:[#allocation5 + $0x84] sm:$0xf] }
  0x18   :  { %399 = vmatpush.bf16.msrb.mxu1 %v4206_v20 }
  0x1a   :  { %4170 = vmatmul.msk.f32.vlgmr.msrb.gmra.mxu2 %vm73_vm1, %v48_v6  ;;  %438 = vmatpush.bf16.msra.mxu3 %v4218_v28 }
  0x1b   :  { %4159 = vmatmul.msk.f32.gmra.mxu3 %vm73_vm1, %v6144_v21  ;;  %4162 = vmatmul.msk.f32.gmra.mxu1 %vm73_vm1, %v49_v22 }
  0x1c   :  { %400 = vmatpush.bf16.msrb.mxu1 %v4190_v26  ;;  %425 = vmatpush.bf16.msra.mxu2 %v4214_v32  ;;  %v5489_v32 = vld [vmem:[#allocation5 + $0xac] sm:$0xf0] }
  0x1d   :  { %v4321_v35 = vor.u32 %v5489_v32, %v4320_v31  ;;  %v5477_v31 = vld [vmem:[#allocation5 + $0x4c] sm:$0xf0] }
  0x1e   :  { %4153 = vmatmul.msk.f32.gmra.mxu0 %vm73_vm1, %v49_v22  ;;  %439 = vmatpush.bf16.msra.mxu3 %v4202_v42  ;;  %v5488_v42 = vld [vmem:[#allocation5 + $0xac] sm:$0xf] }
  0x1f   :  { %664 = vmatpush.bf16.msrb.mxu0 %v4321_v35  ;;  %v4290_v35 = vld [vmem:[#allocation5 + $0x70] sm:$0xf0] }
  0x20   :  { %411 = vmatpush.bf16.msra.mxu1 %v4226_v38  ;;  %426 = vmatpush.bf16.msra.mxu2 %v4198_v43  ;;  %v5490_v38 = vld [vmem:[#allocation5 + $0xb4] sm:$0xf0]  ;;  %v4330_v43 = vld [vmem:[#allocation5 + $0xb8] sm:$0xf0] }
  0x21   :  { %v4329_v41 = vor.u32 %v5490_v38, %v4328_v37  ;;  %v4333_v44 = vor.u32 %v5488_v42, %v4330_v43  ;;  %v5480_v42 = vld [vmem:[#allocation5 + $0x6c] sm:$0xf]  ;;  %v4298_v43 = vld [vmem:[#allocation5 + $0x78] sm:$0xf0] }
  0x22   :  { %4171 = vmatmul.msk.f32.gmra.mxu2 %vm73_vm1, %v49_v22 }
  0x23   :  { %4163 = vmatmul.msk.f32.gmra.mxu1 %vm73_vm1, %v50_v29  ;;  %4179 = vmatmul.msk.f32.vlgmr.msrb.gmra.mxu3 %vm73_vm1, %v48_v6  ;;  %v6280_v6 = vperm.slane %v57_v55, 3 }
  0x24   :  { %412 = vmatpush.bf16.msra.mxu1 %v4210_v46  ;;  %v5485_v46 = vld [vmem:[#allocation5 + $0x8c] sm:$0xf0]  ;;  %690 = vmatpush.bf16.msrb.mxu2 %v4329_v41 }
  0x25   :  { %703 = vmatpush.bf16.msrb.mxu3 %v4333_v44  ;;  %v4256_v44 = vld [vmem:[#allocation5 + $0x20] sm:$0xf] }
  0x26   :  { %4154 = vmatmul.msk.f32.gmra.mxu0 %vm73_vm1, %v50_v29 }
  0x28   :  { %413 = vmatpush.bf16.msra.mxu1 %v4194_v49  ;;  %v4305_v49 = vor.u32 %v5485_v46, %v4304_v45  ;;  %v4301_v45 = vor.u32 %v5480_v42, %v4298_v43  ;;  %v5473_v46 = vld [vmem:[#allocation5 + $0x2c] sm:$0xf0] }
  0x2a   :  { %4172 = vmatmul.msk.f32.gmra.mxu2 %vm73_vm1, %v50_v29  ;;  %665 = vmatpush.bf16.msrb.mxu0 %v4305_v49  ;;  %v4280_v49 = vld [vmem:[#allocation5 + $0x48] sm:$0xf] }
  0x2b   :  { %4164 = vmatmul.msk.f32.gmra.mxu1 %vm73_vm1, %v51_v33  ;;  %4180 = vmatmul.msk.f32.gmra.mxu3 %vm73_vm1, %v49_v22 }
  0x2e   :  { %4155 = vmatmul.msk.f32.gmra.mxu0 %vm73_vm1, %v51_v33 }
  0x32   :  { %4173 = vmatmul.msk.f32.gmra.mxu2 %vm73_vm1, %v51_v33 }
  0x33   :  { %4165 = vmatmul.msk.f32.gmra.mxu1 %vm73_vm1, %v52_v34  ;;  %4181 = vmatmul.msk.f32.gmra.mxu3 %vm73_vm1, %v50_v29 }
  0x36   :  { %4156 = vmatmul.msk.f32.gmra.mxu0 %vm73_vm1, %v52_v34 }
  0x3a   :  { %4174 = vmatmul.msk.f32.gmra.mxu2 %vm73_vm1, %v52_v34 }
  0x3b   :  { %4166 = vmatmul.msk.f32.gmra.mxu1 %vm73_vm1, %v6095_v2  ;;  %4182 = vmatmul.msk.f32.gmra.mxu3 %vm73_vm1, %v51_v33  ;;  %v5487_v33 = vld [vmem:[#allocation5 + $0xa4] sm:$0xf] }
  0x3c   :  { %v4325_v40 = vor.u32 %v5487_v33, %v4322_v36  ;;  %v5479_v33 = vld [vmem:[#allocation5 + $0x64] sm:$0xf] }
  0x3d   :  { %v4293_v38 = vor.u32 %v5479_v33, %v4290_v35  ;;  %v5474_v35 = vld [vmem:[#allocation5 + $0x34] sm:$0xf0] }
  0x42   :  { %4175 = vmatmul.msk.f32.gmra.mxu2 %vm73_vm1, %v6095_v2 }
  0x43   :  { %4167 = vmatmul.msk.f32.gmra.mxu1 %vm73_vm1, %v6106_v5  ;;  %4183 = vmatmul.msk.f32.gmra.mxu3 %vm73_vm1, %v52_v34 }
  0x4a   :  { %4176 = vmatmul.msk.f32.gmra.mxu2 %vm73_vm1, %v6106_v5 }
  0x4b   :  { %4168 = vmatmul.msk.f32.gmra.mxu1 %vm73_vm1, %v6144_v21  ;;  %4184 = vmatmul.msk.f32.gmra.mxu3 %vm73_vm1, %v6095_v2 }
  0x52   :  { %4177 = vmatmul.msk.f32.gmra.mxu2 %vm73_vm1, %v6144_v21 }
  0x53   :  { %4185 = vmatmul.msk.f32.gmra.mxu3 %vm73_vm1, %v6106_v5  ;;  %401 = vmatmul.bf16.vlgmr.msrb.gmra.mxu1 %v6036_v50 }
  0x54   :  { %677 = vmatpush.bf16.msrb.mxu1 %v4325_v40  ;;  %v5482_v40 = vld [vmem:[#allocation5 + $0x74] sm:$0xf0] }
  0x5a   :  { %427 = vmatmul.bf16.vlgmr.msra.gmra.mxu2 %v6036_v50 }
  0x5b   :  { %4186 = vmatmul.msk.f32.gmra.mxu3 %vm73_vm1, %v6144_v21  ;;  %v6304_v21 = vperm.slane %v57_v55, 0  ;;  %v4312_v55 = vld [vmem:[#allocation5 + $0x88] sm:$0xf] }
  0x63   :  { %414 = vmatmul.bf16.vlgmr.msra.gmra.mxu1 %v6036_v50  ;;  %440 = vmatmul.bf16.vlgmr.msra.gmra.mxu3 %v6036_v50  ;;  %v4306_v50 = vld [vmem:[#allocation5 + $0x90] sm:$0xf0] }
  0x90   :  { %v6244_v51 = vpop.f32.mrf.mxu1 }
  0x93   :  { %v124_v20 = vpop.f32.mrf.mxu0 }
  0x94   :  { %v125_v22 = vadd.f32 %v124_v20, %v6304_v21 }
  0x95   :  { %v6246_v52 = vpop.f32.mrf.mxu2 }
  0x96   :  { %v6248_v53 = vpop.f32.mrf.mxu3 }
  0x98   :  { %v6250_v54 = vpop.f32.mrf.mxu1 }
  0x9d   :  { %v6255_v56 = vpop.f32.mrf.mxu2 }
  0x9e   :  { %v6257_v57 = vpop.f32.mrf.mxu3 }
  0x9f   :  { %7931 = vst [vmem:[#allocation8_spill] sm:$0xff] %v6257_v57 }
  0xa0   :  { %v171_v59 = vpop.f32.mrf.mxu1 }
  0xa1   :  { %v6262_v60 = vadd.f32 %v171_v59, %v6259_v58  ;;  %v5486_v59 = vld [vmem:[#allocation5 + $0x94] sm:$0xf0] }
  0xa5   :  { %v6264_v61 = vpop.f32.mrf.mxu2 }
  0xa6   :  { %v6266_v62 = vpop.f32.mrf.mxu3 }
  0xa8   :  { %v6268_v63 = vpop.f32.mrf.mxu1 }
  0xad   :  { %v212_v1 = vpop.f32.mrf.mxu2 }
  0xae   :  { %v6273_v2 = vadd.f32 %v212_v1, %v6270_v0  ;;  %v6275_v3 = vpop.f32.mrf.mxu3 }
  0xb0   :  { %v177_v4 = vpop.f32.mrf.mxu1 }
  0xb1   :  { %v6278_v5 = vadd.f32 %v177_v4, %v6259_v58  ;;  %v4309_v4 = vor.u32 %v5483_v47, %v4306_v50  ;;  %v5475_v47 = vld [vmem:[#allocation5 + $0x44] sm:$0xf]  ;;  %v5478_v50 = vld [vmem:[#allocation5 + $0x54] sm:$0xf0] }
  0xb3   :  { %678 = vmatpush.bf16.msrb.mxu1 %v4309_v4 }
  0xb5   :  { %v6282_v7 = vpop.f32.mrf.mxu2 }
  0xb6   :  { %v253_v8 = vpop.f32.mrf.mxu3 }
  0xb7   :  { %v6285_v9 = vadd.f32 %v253_v8, %v6280_v6  ;;  %v4313_v8 = vor.u32 %v5486_v59, %v4312_v55  ;;  %679 = vmatpush.bf16.msrb.mxu1 %v4293_v38  ;;  %v248_v59 = vadd.f32 %v6266_v62, %v6280_v6 }
  0xb8   :  { %v6287_v10 = vpop.f32.mrf.mxu1 }
  0xb9   :  { %691 = vmatpush.bf16.msrb.mxu2 %v4313_v8  ;;  %v4257_v8 = vor.u32 %v5473_v46, %v4256_v44  ;;  %v4248_v46 = vld [vmem:[#allocation5 + $0x8] sm:$0xf] }
  0xbd   :  { %v218_v11 = vpop.f32.mrf.mxu2 }
  0xbe   :  { %v6290_v12 = vadd.f32 %v218_v11, %v6270_v0  ;;  %v6292_v13 = vpop.f32.mrf.mxu3  ;;  %v5484_v11 = vld [vmem:[#allocation5 + $0x8c] sm:$0xf] }
  0xc0   :  { %v183_v14 = vpop.f32.mrf.mxu1 }
  0xc1   :  { %v6295_v15 = vadd.f32 %v183_v14, %v6259_v58  ;;  %v4314_v14 = vld [vmem:[#allocation5 + $0x98] sm:$0xf0] }
  0xc2   :  { %v4317_v20 = vor.u32 %v5484_v11, %v4314_v14  ;;  %v5476_v14 = vld [vmem:[#allocation5 + $0x4c] sm:$0xf] }
  0xc4   :  { %704 = vmatpush.bf16.msrb.mxu3 %v4317_v20  ;;  %v4282_v20 = vld [vmem:[#allocation5 + $0x58] sm:$0xf0] }
  0xc5   :  { %v6297_v16 = vpop.f32.mrf.mxu2 }
  0xc6   :  { %v259_v17 = vpop.f32.mrf.mxu3 }
  0xc7   :  { %v6300_v18 = vadd.f32 %v259_v17, %v6280_v6 }
  0xc8   :  { %v6302_v19 = vpop.f32.mrf.mxu1  ;;  %705 = vmatpush.bf16.msrb.mxu3 %v4301_v45  ;;  %v4242_v45 = vld [vmem:[#allocation5 + $0x10] sm:$0xf0] }
  0xc9   :  { %7932 = vst [vmem:[#allocation9_spill] sm:$0xff] %v6302_v19 }
  0xcd   :  { %v224_v23 = vpop.f32.mrf.mxu2 }
  0xce   :  { %v6308_v24 = vadd.f32 %v224_v23, %v6270_v0  ;;  %v6310_v25 = vpop.f32.mrf.mxu3  ;;  %v4288_v23 = vld [vmem:[#allocation5 + $0x60] sm:$0xf] }
  0xd0   :  { %7933 = vst [vmem:[#allocation10_spill] sm:$0xff] %v6308_v24  ;;  %v402_v26 = vpop.f32.mrf.mxu1 }
  0xd1   :  { %v445_v27 = vadd.f32 %v402_v26, %v125_v22  ;;  %v5481_v26 = vld [vmem:[#allocation5 + $0x6c] sm:$0xf0] }
  0xd3   :  { %v4235_v28 = vmul.f32 -1.442695, %v445_v27  ;;  %v166_v27 = vadd.f32 %v6244_v51, %v6259_v58 }
  0xd5   :  { %5751 = vpow2.f32 %v4235_v28  ;;  %v6312_v29 = vpop.f32.mrf.mxu2  ;;  %v4289_v28 = vor.u32 %v5481_v26, %v4288_v23  ;;  %v5471_v23 = vld [vmem:[#allocation5 + $0x24] sm:$0xf] }
  0xd6   :  { %7934 = vst [vmem:[#allocation11_spill] sm:$0xff] %v6312_v29  ;;  %v265_v30 = vpop.f32.mrf.mxu3  ;;  %v4488_v29 = vld [vmem:[#allocation5 + $0xb8] sm:$0xf0] }
  0xd7   :  { %v6315_v34 = vadd.f32 %v265_v30, %v6280_v6  ;;  %v4272_v30 = vld [vmem:[#allocation5 + $0x40] sm:$0xf]  ;;  %666 = vmatpush.bf16.msrb.mxu0 %v4289_v28  ;;  %v4285_v28 = vor.u32 %v5476_v14, %v4282_v20 }
  0xd8   :  { %v404_v39 = vpop.f32.mrf.mxu1  ;;  %v4273_v37 = vor.u32 %v5477_v31, %v4272_v30  ;;  %v4258_v30 = vld [vmem:[#allocation5 + $0x30] sm:$0xf0]  ;;  %v4264_v31 = vld [vmem:[#allocation5 + $0x28] sm:$0xf] }
  0xd9   :  { %7935 = vst [vmem:[#allocation12_spill] sm:$0xff] %v6315_v34  ;;  %v4296_v39 = vld [vmem:[#allocation5 + $0x68] sm:$0xf]  ;;  %v4261_v33 = vor.u32 %v5471_v23, %v4258_v30  ;;  %v4265_v38 = vor.u32 %v5474_v35, %v4264_v31  ;;  %706 = vmatpush.bf16.msrb.mxu3 %v4285_v28  ;;  %v207_v30 = vadd.f32 %v6255_v56, %v6270_v0  ;;  %v5502_v56 = vld [vmem:[%s7925_s3 + $0x54] sm:$0xf0] }
  0xda   :  { %v4297_v41 = vor.u32 %v5482_v40, %v4296_v39  ;;  %v4266_v39 = vld [vmem:[#allocation5 + $0x38] sm:$0xf0]  ;;  %v4240_v40 = vld [vmem:[#allocation5] sm:$0xf]  ;;  %v4377_v35 = vld [vmem:[%s7925_s3 + $0x50] sm:$0xf0] }
  0xdb   :  { %v5752_v48 = vpop.eup %5751  ;;  %667 = vmatpush.bf16.msrb.mxu0 %v4273_v37 }
  0xdc   :  { %v6317_v1 = vadd.f32 1.0, %v5752_v48  ;;  %692 = vmatpush.bf16.msrb.mxu2 %v4297_v41  ;;  %v4274_v48 = vld [vmem:[#allocation5 + $0x50] sm:$0xf0]  ;;  %v5469_v41 = vld [vmem:[#allocation5 + $0xc] sm:$0xf0] }
  0xdd   :  { %v6319_v17 = vpop.f32.mrf.mxu2  ;;  %v4277_v11 = vor.u32 %v5475_v47, %v4274_v48  ;;  %v4241_v44 = vor.u32 %v5469_v41, %v4240_v40  ;;  %v5470_v47 = vld [vmem:[#allocation5 + $0x14] sm:$0xf0]  ;;  %v5468_v48 = vld [vmem:[#allocation5 + $0xc] sm:$0xf]  ;;  %v5500_v40 = vld [vmem:[%s7925_s3 + $0x4c] sm:$0xf] }
  0xde   :  { %v6321_v22 = vpop.f32.mrf.mxu3  ;;  %5753 = vrcp.f32 %v6317_v1  ;;  %v4249_v14 = vor.u32 %v5470_v47, %v4248_v46  ;;  %v462_v31 = vand.u32 2147483647, %v6317_v1  ;;  %v4385_v41 = vld [vmem:[%s7925_s3 + $0x58] sm:$0xf0]  ;;  %vm458_vm3 = vweird.f32 %v6317_v1 }
  0xdf   :  { %7936 = vst [vmem:[#allocation13_spill] sm:$0xff] %v6321_v22  ;;  %680 = vmatpush.bf16.msrb.mxu1 %v4277_v11  ;;  %668 = vmatpush.bf16.msrb.mxu0 %v4257_v8  ;;  %v4388_v46 = vor.u32 %v5500_v40, %v4385_v41  ;;  %v5492_v40 = vld [vmem:[%s7925_s3 + $0xc] sm:$0xf] }
  0xe0   :  { %v415_v32 = vpop.f32.mrf.mxu1  ;;  %vm463_vm6 = vcmp.eq.f32.partialorder %v462_v31, 8.507059e+37 }
  0xe1   :  { %v446_v36 = vadd.f32 %v415_v32, %v166_v27  ;;  %v4281_v27 = vor.u32 %v5478_v50, %v4280_v49 }
  0xe3   :  { %v4236_v51 = vmul.f32 -1.442695, %v446_v36  ;;  %v5472_v36 = vld [vmem:[#allocation5 + $0x2c] sm:$0xf]  ;;  %693 = vmatpush.bf16.msrb.mxu2 %v4281_v27  ;;  %681 = vmatpush.bf16.msrb.mxu1 %v4261_v33  ;;  %v5501_v27 = vld [vmem:[%s7925_s3 + $0x4c] sm:$0xf0] }
  0xe4   :  { %v6326_v55 = vpop.eup %5753  ;;  %v4269_v43 = vor.u32 %v5472_v36, %v4266_v39  ;;  %669 = vmatpush.bf16.msrb.mxu0 %v4241_v44  ;;  %v5499_v33 = vld [vmem:[%s7925_s3 + $0x44] sm:$0xf] }
  0xe5   :  { %5755 = vpow2.f32 %v4236_v51  ;;  %v430_v4 = vpop.f32.mrf.mxu2  ;;  %v454_v62 = vmul.f32 %v6326_v55, %v6317_v1  ;;  %v5467_v51 = vld [vmem:[#allocation5 + $0x4] sm:$0xf]  ;;  %vm459_vm2 = vweird.f32 %v6326_v55 }
  0xe6   :  { %v441_v26 = vpop.f32.mrf.mxu3  ;;  %v4245_v50 = vor.u32 %v5467_v51, %v4242_v45  ;;  %707 = vmatpush.bf16.msrb.mxu3 %v4269_v43  ;;  %v5497_v51 = vld [vmem:[%s7925_s3 + $0x2c] sm:$0xf0]  ;;  %vm6399_vm4 = vmor %vm458_vm3, %vm459_vm2 }
  0xe7   :  { %v448_v32 = vadd.f32 %v441_v26, %v248_v59  ;;  %v4250_v59 = vld [vmem:[#allocation5 + $0x18] sm:$0xf0]  ;;  %v455_v4 = vsub.f32 1.0, %v454_v62  ;;  %694 = vmatpush.bf16.msrb.mxu2 %v4265_v38  ;;  %v4375_v26 = vld [vmem:[%s7925_s3 + $0x40] sm:$0xf]  ;;  %v4380_v62 = vor.u32 %v5499_v33, %v4377_v35  ;;  %v447_v38 = vadd.f32 %v6319_v17, %v207_v30 }
  0xe8   :  { %v417_v37 = vpop.f32.mrf.mxu1  ;;  %v4253_v8 = vor.u32 %v5468_v48, %v4250_v59  ;;  %682 = vmatpush.bf16.msrb.mxu1 %v4245_v50  ;;  %v464_v17 = vand.u32 2147483648, %v6317_v1  ;;  %v5495_v48 = vld [vmem:[%s7925_s3 + $0x24] sm:$0xf]  ;;  %v4367_v50 = vld [vmem:[%s7925_s3 + $0x28] sm:$0xf] }
  0xe9   :  { %v4237_v42 = vmul.f32 -1.442695, %v448_v32  ;;  %v456_v23 = vmul.f32 %v6326_v55, %v455_v4  ;;  %v4376_v32 = vor.u32 %v5501_v27, %v4375_v26  ;;  %v4383_v37 = vld [vmem:[%s7925_s3 + $0x48] sm:$0xf]  ;;  %v4369_v27 = vld [vmem:[%s7925_s3 + $0x38] sm:$0xf0] }
  0xea   :  { %708 = vmatpush.bf16.msrb.mxu3 %v4253_v8  ;;  %v4384_v39 = vor.u32 %v5502_v56, %v4383_v37  ;;  %v5496_v8 = vld [vmem:[%s7925_s3 + $0x2c] sm:$0xf]  ;;  %v5493_v33 = vld [vmem:[%s7925_s3 + $0xc] sm:$0xf0]  ;;  %v5491_v35 = vld [vmem:[%s7925_s3 + $0x4] sm:$0xf] }
  0xeb   :  { %v5756_v49 = vpop.eup %5755  ;;  %5757 = vpow2.f32 %v4237_v42  ;;  %695 = vmatpush.bf16.msrb.mxu2 %v4249_v14  ;;  %863 = vmatpush.bf16.msra.mxu0 %v4376_v32  ;;  %v4359_v42 = vld [vmem:[%s7925_s3 + $0x20] sm:$0xf]  ;;  %v457_v44 = vadd.f32 %v6326_v55, %v456_v23  ;;  %v5498_v14 = vld [vmem:[%s7925_s3 + $0x34] sm:$0xf0]  ;;  %v4372_v32 = vor.u32 %v5496_v8, %v4369_v27 }
  0xec   :  { %v6332_v11 = vadd.f32 1.0, %v5756_v49  ;;  %876 = vmatpush.bf16.msra.mxu1 %v4380_v62  ;;  %v4360_v47 = vor.u32 %v5497_v51, %v4359_v42  ;;  %v4361_v49 = vld [vmem:[%s7925_s3 + $0x30] sm:$0xf0]  ;;  %v4368_v26 = vor.u32 %v5498_v14, %v4367_v50  ;;  %v465_v42 = vor.u32 1.1754944e-38, %v464_v17  ;;  %v4353_v51 = vld [vmem:[%s7925_s3 + $0x18] sm:$0xf0] }
  0xed   :  { %v4364_v4 = vor.u32 %v5495_v48, %v4361_v49  ;;  %v461_v30 = vsel %vm6399_vm4, %v6326_v55, %v457_v44  ;;  %v4345_v62 = vld [vmem:[%s7925_s3 + $0x10] sm:$0xf0] }
  0xee   :  { %5759 = vrcp.f32 %v6332_v11  ;;  %v443_v20 = vpop.f32.mrf.mxu3  ;;  %v481_v59 = vand.u32 2147483647, %v6332_v11  ;;  %v483_v1 = vand.u32 2147483648, %v6332_v11  ;;  %902 = vmatpush.bf16.msra.mxu3 %v4388_v46  ;;  %v4348_v56 = vor.u32 %v5491_v35, %v4345_v62  ;;  %v127_v35 = vpop.f32.mrf.mxu0 }
  0xef   :  { %889 = vmatpush.bf16.msra.mxu2 %v4384_v39  ;;  %864 = vmatpush.bf16.msra.mxu0 %v4360_v47  ;;  %v5494_v39 = vld [vmem:[%s7925_s3 + $0x14] sm:$0xf0]  ;;  %vm477_vm7 = vweird.f32 %v6332_v11  ;;  %v4356_v47 = vor.u32 %v5492_v40, %v4353_v51  ;;  %v466_v48 = vsel %vm463_vm6, %v465_v42, %v461_v30 }
  0xf0   :  { %877 = vmatpush.bf16.msra.mxu1 %v4364_v4  ;;  %v484_v31 = vor.u32 1.1754944e-38, %v483_v1  ;;  %vm482_vm9 = vcmp.eq.f32.partialorder %v481_v59, 8.507059e+37 }
  0xf1   :  { %v5758_v28 = vpop.eup %5757 }
  0xf2   :  { %v6351_v36 = vadd.f32 1.0, %v5758_v28  ;;  %v4343_v28 = vld [vmem:[%s7925_s3] sm:$0xf]  ;;  %903 = vmatpush.bf16.msra.mxu3 %v4372_v32 }
  0xf3   :  { %890 = vmatpush.bf16.msra.mxu2 %v4368_v26  ;;  %v4344_v55 = vor.u32 %v5493_v33, %v4343_v28 }
  0xf4   :  { %v6369_v43 = vpop.eup %5759  ;;  %5761 = vrcp.f32 %v6351_v36  ;;  %878 = vmatpush.bf16.msra.mxu1 %v4348_v56  ;;  %v503_v26 = vand.u32 2147483648, %v6351_v36  ;;  %vm497_vm11 = vweird.f32 %v6351_v36  ;;  %v303_v56 = vld [vmem:[%s7927_s5] sm:$0xf]  ;;  %s6037_s5 = smov 48  }
  0xf5   :  { %v473_v45 = vmul.f32 %v6369_v43, %v6332_v11  ;;  %5763 = vtanh.f32 %v447_v38  ;;  %vm478_vm5 = vweird.f32 %v6369_v43  ;;  %v4351_v38 = vld [vmem:[%s7925_s3 + $0x8] sm:$0xf]  ;;  %865 = vmatpush.bf16.msra.mxu0 %v4344_v55 }
  0xf6   :  { %v4352_v44 = vor.u32 %v5494_v39, %v4351_v38  ;;  %vm479_vm8 = vmor %vm477_vm7, %vm478_vm5  ;;  %904 = vmatpush.bf16.msra.mxu3 %v4356_v47  ;;  %v504_v1 = vor.u32 1.1754944e-38, %v503_v26  ;;  %v6457_v62 = vpop.f32.mrf.mxu0  ;;  %v6466_v38 = vperm.slane %v303_v56, 0  ;;  %v6468_v39 = vperm.slane %v303_v56, 1 }
  0xf7   :  { %v474_v23 = vsub.f32 1.0, %v473_v45  ;;  %v169_v26 = vadd.f32 %v6250_v54, %v6259_v58 }
  0xf8   :  { %891 = vmatpush.bf16.msra.mxu2 %v4352_v44 }
  0xf9   :  { %v475_v37 = vmul.f32 %v6369_v43, %v474_v23 }
  0xfa   :  { %v5762_v41 = vpop.eup %5761 }
  0xfb   :  { %v476_v45 = vadd.f32 %v6369_v43, %v475_v37  ;;  %v493_v46 = vmul.f32 %v5762_v41, %v6351_v36  ;;  %v5764_v50 = vpop.eup %5763  ;;  %vm498_vm10 = vweird.f32 %v5762_v41 }
  0xfc   :  { %v508_v14 = vmul.f32 %v5764_v50, %v466_v48  ;;  %vm499_vm12 = vmor %vm497_vm11, %vm498_vm10 }
  0xfd   :  { %v480_v17 = vsel %vm479_vm8, %v6369_v43, %v476_v45  ;;  %v494_v49 = vsub.f32 1.0, %v493_v46  ;;  %v501_v43 = vand.u32 2147483647, %v6351_v36  ;;  %v6472_v46 = vperm.slane %v303_v56, 3 }
  0xfe   :  { %v485_v4 = vsel %vm482_vm9, %v484_v31, %v480_v17  ;;  %v6459_v37 = vpop.f32.mrf.mxu0 }
  0xff   :  { %v507_v11 = vmul.f32 0.0, %v485_v4  ;;  %v495_v8 = vmul.f32 %v5762_v41, %v494_v49  ;;  %vm502_vm13 = vcmp.eq.f32.partialorder %v501_v43, 8.507059e+37  ;;  %v128_v43 = vadd.f32 %v127_v35, %v6304_v21 }
 0x101   :  { %v6442_v20 = vadd.f32 %v508_v14, %v507_v11  ;;  %v496_v23 = vadd.f32 %v5762_v41, %v495_v8  ;;  %v6477_v8 = vperm.slane %v303_v56, 2 }
 0x103   :  { %5765 = vtanh.f32 %v6442_v20  ;;  %v500_v59 = vsel %vm499_vm12, %v5762_v41, %v496_v23 }
 0x104   :  { %v505_v28 = vsel %vm502_vm13, %v504_v1, %v500_v59 }
 0x106   :  { %v6461_v55 = vpop.f32.mrf.mxu0 }
 0x109   :  { %v5766_v27 = vpop.eup %5765 }
 0x10a   :  { %v511_v30 = vmul.f32 %v5766_v27, %v505_v28 }
 0x10c   :  { %v512_v32 = vsel %vm389_vm14, %v511_v30, 0.0  ;;  %v782_v36 = vpack.c.bf16 %v511_v30, %v511_v30 }
 0x10d   :  { %v513_v33 = vpack.c.bf16 %v512_v32, %v512_v32 }
 0x10f   :  { %4334 = vmatmul.msk.bf16.vlgmr.msrb.gmra.mxu0 %vm658_vm15, %v513_v33  ;;  %4335 = vmatmul.msk.bf16.vlgmr.msrb.gmra.mxu1 %vm658_vm15, %v513_v33 }
 0x110   :  { %4336 = vmatmul.msk.bf16.vlgmr.msrb.gmra.mxu2 %vm658_vm15, %v513_v33  ;;  %4337 = vmatmul.msk.bf16.vlgmr.msrb.gmra.mxu3 %vm658_vm15, %v513_v33 }
 0x11f   :  { %4389 = vmatmul.msk.bf16.vlgmr.msra.gmra.mxu0 %vm389_vm14, %v782_v36  ;;  %4390 = vmatmul.msk.bf16.vlgmr.msra.gmra.mxu1 %vm389_vm14, %v782_v36 }
 0x120   :  { %4391 = vmatmul.msk.bf16.vlgmr.msra.gmra.mxu2 %vm389_vm14, %v782_v36  ;;  %4392 = vmatmul.msk.bf16.vlgmr.msra.gmra.mxu3 %vm389_vm14, %v782_v36 }
 0x18c   :  { %v671_v40 = vpop.f32.mrf.mxu0  ;;  %v684_v41 = vpop.f32.mrf.mxu1 }
 0x18d   :  { %v672_v42 = vadd.f32 %v671_v40, %v6466_v38  ;;  %v685_v44 = vadd.f32 %v684_v41, %v6468_v39 }
 0x18f   :  { %v4338_v51 = vmul.f32 -1.442695, %v672_v42  ;;  %v4339_v45 = vmul.f32 -1.442695, %v685_v44 }
 0x191   :  { %5767 = vpow2.f32 %v4338_v51 }
 0x192   :  { %5769 = vpow2.f32 %v4339_v45  ;;  %v210_v45 = vadd.f32 %v6264_v61, %v6270_v0  ;;  %v4480_v61 = vld [vmem:[#allocation5 + $0xb0] sm:$0xf0] }
 0x193   :  { %v697_v47 = vpop.f32.mrf.mxu2  ;;  %v710_v48 = vpop.f32.mrf.mxu3 }
 0x194   :  { %v711_v31 = vadd.f32 %v710_v48, %v6472_v46  ;;  %v673_v17 = vpop.f32.mrf.mxu0  ;;  %v686_v49 = vpop.f32.mrf.mxu1  ;;  %v698_v27 = vadd.f32 %v697_v47, %v6477_v8 }
 0x195   :  { %v5525_v17 = vld [vmem:[#allocation5 + $0xac] sm:$0xf0]  ;;  %v251_v49 = vadd.f32 %v6275_v3, %v6280_v6  ;;  %v5524_v3 = vld [vmem:[#allocation5 + $0xac] sm:$0xf] }
 0x196   :  { %v4340_v50 = vmul.f32 -1.442695, %v711_v31  ;;  %v4478_v31 = vld [vmem:[#allocation5 + $0xa0] sm:$0xf] }
 0x197   :  { %v5768_v4 = vpop.eup %5767 }
 0x198   :  { %v5770_v14 = vpop.eup %5769  ;;  %v6475_v11 = vadd.f32 1.0, %v5768_v4  ;;  %5771 = vpow2.f32 %v4340_v50  ;;  %v5523_v4 = vld [vmem:[#allocation5 + $0xa4] sm:$0xf] }
 0x199   :  { %v6479_v23 = vadd.f32 1.0, %v5770_v14  ;;  %v4486_v14 = vld [vmem:[#allocation5 + $0xa8] sm:$0xf] }
 0x19a   :  { %5773 = vrcp.f32 %v6475_v11  ;;  %v727_v56 = vand.u32 2147483647, %v6475_v11  ;;  %v729_v44 = vand.u32 2147483648, %v6475_v11  ;;  %vm723_vm0 = vweird.f32 %v6475_v11 }
 0x19b   :  { %5775 = vrcp.f32 %v6479_v23  ;;  %v699_v59 = vpop.f32.mrf.mxu2  ;;  %v712_v1 = vpop.f32.mrf.mxu3  ;;  %v748_v35 = vand.u32 2147483648, %v6479_v23  ;;  %v746_v48 = vand.u32 2147483647, %v6479_v23  ;;  %vm742_vm4 = vweird.f32 %v6479_v23 }
 0x19c   :  { %v867_v28 = vpop.f32.mrf.mxu0  ;;  %v880_v30 = vpop.f32.mrf.mxu1  ;;  %5777 = vtanh.f32 %v698_v27  ;;  %vm6507_vm1 = vcmp.eq.f32.partialorder %v727_v56, 8.507059e+37  ;;  %v4479_v27 = vor.u32 %v5525_v17, %v4478_v31  ;;  %v5521_v31 = vld [vmem:[#allocation5 + $0x8c] sm:$0xf0]  ;;  %v5519_v17 = vld [vmem:[#allocation5 + $0x84] sm:$0xf] }
 0x19d   :  { %v910_v32 = vadd.f32 %v867_v28, %v128_v43  ;;  %v911_v33 = vadd.f32 %v880_v30, %v169_v26  ;;  %v5526_v28 = vld [vmem:[#allocation5 + $0xb4] sm:$0xf0]  ;;  %vm6528_vm6 = vcmp.eq.f32.partialorder %v746_v48, 8.507059e+37  ;;  %v4454_v43 = vld [vmem:[#allocation5 + $0x68] sm:$0xf] }
 0x19e   :  { %v5772_v36 = vpop.eup %5771  ;;  %1132 = vmatpush.bf16.msrb.mxu0 %v4479_v27  ;;  %v4487_v19 = vor.u32 %v5526_v28, %v4486_v14  ;;  %v5522_v14 = vld [vmem:[#allocation5 + $0x94] sm:$0xf0]  ;;  %v4472_v27 = vld [vmem:[#allocation5 + $0x98] sm:$0xf0] }
 0x19f   :  { %v6488_v40 = vadd.f32 1.0, %v5772_v36  ;;  %v4393_v41 = vmul.f32 -1.442695, %v910_v32  ;;  %v4394_v42 = vmul.f32 -1.442695, %v911_v33  ;;  %v730_v32 = vor.u32 1.1754944e-38, %v729_v44 }
 0x1a0   :  { %v6490_v54 = vpop.eup %5773  ;;  %1158 = vmatpush.bf16.msrb.mxu2 %v4487_v19 }
 0x1a1   :  { %v6494_v51 = vpop.eup %5775  ;;  %v719_v47 = vmul.f32 %v6490_v54, %v6475_v11  ;;  %5779 = vrcp.f32 %v6488_v40  ;;  %vm724_vm2 = vweird.f32 %v6490_v54  ;;  %vm762_vm9 = vweird.f32 %v6488_v40 }
 0x1a2   :  { %v738_v50 = vmul.f32 %v6494_v51, %v6479_v23  ;;  %5781 = vpow2.f32 %v4393_v41  ;;  %v5778_v57 = vpop.eup %5777  ;;  %vm743_vm3 = vweird.f32 %v6494_v51  ;;  %vm725_vm5 = vmor %vm723_vm0, %vm724_vm2 }
 0x1a3   :  { %v720_v26 = vsub.f32 1.0, %v719_v47  ;;  %5783 = vpow2.f32 %v4394_v42  ;;  %v893_v59 = vpop.f32.mrf.mxu2  ;;  %v906_v1 = vpop.f32.mrf.mxu3  ;;  %v4462_v47 = vld [vmem:[#allocation5 + $0x80] sm:$0xf]  ;;  %v4483_v42 = vor.u32 %v5523_v4, %v4480_v61  ;;  %vm744_vm7 = vmor %vm742_vm4, %vm743_vm3 }
 0x1a4   :  { %v739_v30 = vsub.f32 1.0, %v738_v50  ;;  %v6511_v33 = vadd.f32 %v893_v59, %v210_v45  ;;  %v6513_v36 = vadd.f32 %v906_v1, %v251_v49  ;;  %v869_v41 = vpop.f32.mrf.mxu0  ;;  %v882_v22 = vpop.f32.mrf.mxu1  ;;  %v749_v45 = vor.u32 1.1754944e-38, %v748_v35  ;;  %v4464_v50 = vld [vmem:[#allocation5 + $0x90] sm:$0xf0]  ;;  %v5520_v1 = vld [vmem:[#allocation5 + $0x8c] sm:$0xf] }
 0x1a5   :  { %v721_v56 = vmul.f32 %v6490_v54, %v720_v26  ;;  %v4491_v49 = vor.u32 %v5524_v3, %v4488_v29  ;;  %v4470_v22 = vld [vmem:[#allocation5 + $0x88] sm:$0xf]  ;;  %1145 = vmatpush.bf16.msrb.mxu1 %v4483_v42  ;;  %v4463_v4 = vor.u32 %v5521_v31, %v4462_v47  ;;  %v4467_v61 = vor.u32 %v5519_v17, %v4464_v50 }
 0x1a6   :  { %v740_v44 = vmul.f32 %v6494_v51, %v739_v30  ;;  %v766_v3 = vand.u32 2147483647, %v6488_v40  ;;  %v4471_v48 = vor.u32 %v5522_v14, %v4470_v22  ;;  %v4475_v47 = vor.u32 %v5520_v1, %v4472_v27  ;;  %v5516_v1 = vld [vmem:[#allocation5 + $0x6c] sm:$0xf]  ;;  %v4456_v27 = vld [vmem:[#allocation5 + $0x78] sm:$0xf0] }
 0x1a7   :  { %v6519_v59 = vpop.eup %5779  ;;  %v722_v26 = vadd.f32 %v6490_v54, %v721_v56  ;;  %1171 = vmatpush.bf16.msrb.mxu3 %v4491_v49  ;;  %1133 = vmatpush.bf16.msrb.mxu0 %v4463_v4  ;;  %v4446_v56 = vld [vmem:[#allocation5 + $0x60] sm:$0xf]  ;;  %v5515_v49 = vld [vmem:[#allocation5 + $0x64] sm:$0xf]  ;;  %v4448_v4 = vld [vmem:[#allocation5 + $0x70] sm:$0xf0] }
 0x1a8   :  { %v5782_v28 = vpop.eup %5781  ;;  %v741_v29 = vadd.f32 %v6494_v51, %v740_v44  ;;  %v758_v19 = vmul.f32 %v6519_v59, %v6488_v40  ;;  %1159 = vmatpush.bf16.msrb.mxu2 %v4471_v48  ;;  %vm763_vm8 = vweird.f32 %v6519_v59  ;;  %v5514_v48 = vld [vmem:[#allocation5 + $0x54] sm:$0xf0]  ;;  %vm6557_vm10 = vcmp.eq.f32.partialorder %v766_v3, 8.507059e+37 }
 0x1a9   :  { %v5784_v30 = vpop.eup %5783  ;;  %v726_v41 = vsel %vm725_vm5, %v6490_v54, %v722_v26  ;;  %v6540_v11 = vadd.f32 1.0, %v5782_v28  ;;  %v5517_v54 = vld [vmem:[#allocation5 + $0x6c] sm:$0xf0]  ;;  %1146 = vmatpush.bf16.msrb.mxu1 %v4467_v61  ;;  %vm6562_vm11 = vmor %vm762_vm9, %vm763_vm8 }
 0x1aa   :  { %v731_v42 = vsel %vm6507_vm1, %v730_v32, %v726_v41  ;;  %v745_v31 = vsel %vm744_vm7, %v6494_v51, %v741_v29  ;;  %v6545_v17 = vadd.f32 1.0, %v5784_v30  ;;  %v759_v44 = vsub.f32 1.0, %v758_v19  ;;  %v5518_v32 = vld [vmem:[#allocation5 + $0x74] sm:$0xf0]  ;;  %v5513_v28 = vld [vmem:[#allocation5 + $0x4c] sm:$0xf0] }
 0x1ab   :  { %v750_v23 = vsel %vm6528_vm6, %v749_v45, %v745_v31  ;;  %v773_v50 = vmul.f32 %v5778_v57, %v731_v42  ;;  %5785 = vrcp.f32 %v6540_v11  ;;  %v895_v26 = vpop.f32.mrf.mxu2  ;;  %v908_v22 = vpop.f32.mrf.mxu3  ;;  %v768_v51 = vand.u32 2147483648, %v6488_v40  ;;  %1172 = vmatpush.bf16.msrb.mxu3 %v4475_v47  ;;  %v4430_v57 = vld [vmem:[#allocation5 + $0x40] sm:$0xf]  ;;  %v5511_v29 = vld [vmem:[#allocation5 + $0x44] sm:$0xf] }
 0x1ac   :  { %v772_v14 = vmul.f32 0.0, %v750_v23  ;;  %5787 = vrcp.f32 %v6545_v17  ;;  %v760_v45 = vmul.f32 %v6519_v59, %v759_v44  ;;  %v4447_v35 = vor.u32 %v5517_v54, %v4446_v56  ;;  %v4432_v30 = vld [vmem:[#allocation5 + $0x50] sm:$0xf0]  ;;  %v4438_v41 = vld [vmem:[#allocation5 + $0x48] sm:$0xf] }
 0x1ad   :  { %v4451_v19 = vor.u32 %v5515_v49, %v4448_v4  ;;  %v5512_v42 = vld [vmem:[#allocation5 + $0x4c] sm:$0xf]  ;;  %v4455_v56 = vor.u32 %v5518_v32, %v4454_v43  ;;  %v4459_v54 = vor.u32 %v5516_v1, %v4456_v27  ;;  %v4440_v49 = vld [vmem:[#allocation5 + $0x58] sm:$0xf0]  ;;  %v4414_v23 = vld [vmem:[#allocation5 + $0x20] sm:$0xf]  ;;  %v4431_v3 = vor.u32 %v5513_v28, %v4430_v57 }
 0x1ae   :  { %v6554_v61 = vadd.f32 %v773_v50, %v772_v14  ;;  %v761_v31 = vadd.f32 %v6519_v59, %v760_v45  ;;  %1134 = vmatpush.bf16.msrb.mxu0 %v4447_v35  ;;  %v4435_v50 = vor.u32 %v5511_v29, %v4432_v30  ;;  %v4439_v26 = vor.u32 %v5514_v48, %v4438_v41  ;;  %v5509_v22 = vld [vmem:[#allocation5 + $0x2c] sm:$0xf0]  ;;  %v5507_v4 = vld [vmem:[#allocation5 + $0x24] sm:$0xf]  ;;  %v4416_v14 = vld [vmem:[#allocation5 + $0x30] sm:$0xf0] }
 0x1af   :  { %1147 = vmatpush.bf16.msrb.mxu1 %v4451_v19  ;;  %v769_v35 = vor.u32 1.1754944e-38, %v768_v51  ;;  %1160 = vmatpush.bf16.msrb.mxu2 %v4455_v56  ;;  %v4443_v43 = vor.u32 %v5512_v42, %v4440_v49  ;;  %v4422_v32 = vld [vmem:[#allocation5 + $0x28] sm:$0xf]  ;;  %v5510_v27 = vld [vmem:[#allocation5 + $0x34] sm:$0xf0]  ;;  %v948_v19 = vand.u32 2147483648, %v6545_v17  ;;  %v4415_v30 = vor.u32 %v5509_v22, %v4414_v23 }
 0x1b0   :  { %5789 = vtanh.f32 %v6554_v61  ;;  %v765_v24 = vsel %vm6562_vm11, %v6519_v59, %v761_v31  ;;  %1173 = vmatpush.bf16.msrb.mxu3 %v4459_v54  ;;  %v5508_v57 = vld [vmem:[#allocation5 + $0x2c] sm:$0xf]  ;;  %v4424_v28 = vld [vmem:[#allocation5 + $0x38] sm:$0xf0]  ;;  %v4419_v41 = vor.u32 %v5507_v4, %v4416_v14  ;;  %v927_v51 = vand.u32 2147483647, %v6540_v11 }
 0x1b1   :  { %v5786_v40 = vpop.eup %5785  ;;  %5791 = vtanh.f32 %v6511_v33  ;;  %v929_v48 = vand.u32 2147483648, %v6540_v11  ;;  %v770_v42 = vsel %vm6557_vm10, %v769_v35, %v765_v24  ;;  %v4427_v44 = vor.u32 %v5508_v57, %v4424_v28  ;;  %v5503_v57 = vld [vmem:[#allocation5 + $0x4] sm:$0xf] }
 0x1b2   :  { %v5788_v45 = vpop.eup %5787  ;;  %v919_v34 = vmul.f32 %v5786_v40, %v6540_v11  ;;  %1135 = vmatpush.bf16.msrb.mxu0 %v4431_v3  ;;  %vm924_vm12 = vweird.f32 %v5786_v40  ;;  %v946_v54 = vand.u32 2147483647, %v6545_v17  ;;  %vm923_vm0 = vweird.f32 %v6540_v11 }
 0x1b3   :  { %v938_v1 = vmul.f32 %v5788_v45, %v6545_v17  ;;  %1148 = vmatpush.bf16.msrb.mxu1 %v4435_v50  ;;  %1161 = vmatpush.bf16.msrb.mxu2 %v4439_v26  ;;  %vm943_vm13 = vweird.f32 %v5788_v45  ;;  %vm942_vm1 = vweird.f32 %v6545_v17  ;;  %vm925_vm2 = vmor %vm923_vm0, %vm924_vm12  ;;  %v930_v24 = vor.u32 1.1754944e-38, %v929_v48  ;;  %v5537_v48 = vld [vmem:[%s7925_s3 + $0x4c] sm:$0xf0] }
 0x1b4   :  { %v920_v29 = vsub.f32 1.0, %v919_v34  ;;  %1174 = vmatpush.bf16.msrb.mxu3 %v4443_v43  ;;  %v4423_v34 = vor.u32 %v5510_v27, %v4422_v32  ;;  %vm944_vm3 = vmor %vm942_vm1, %vm943_vm13  ;;  %v949_v50 = vor.u32 1.1754944e-38, %v948_v19  ;;  %vm928_vm4 = vcmp.eq.f32.partialorder %v927_v51, 8.507059e+37  ;;  %v5505_v27 = vld [vmem:[#allocation5 + $0xc] sm:$0xf0] }
 0x1b5   :  { %v939_v59 = vsub.f32 1.0, %v938_v1  ;;  %vm947_vm5 = vcmp.eq.f32.partialorder %v946_v54, 8.507059e+37  ;;  %v4395_v43 = vmul.f32 -1.442695, %v6513_v36  ;;  %v5506_v19 = vld [vmem:[#allocation5 + $0x14] sm:$0xf0] }
 0x1b6   :  { %v5790_v31 = vpop.eup %5789  ;;  %v921_v33 = vmul.f32 %v5786_v40, %v920_v29  ;;  %1136 = vmatpush.bf16.msrb.mxu0 %v4415_v30  ;;  %v4406_v29 = vld [vmem:[#allocation5 + $0x8] sm:$0xf]  ;;  %v4533_v36 = vld [vmem:[%s7925_s3 + $0x40] sm:$0xf] }
 0x1b7   :  { %v940_v56 = vmul.f32 %v5788_v45, %v939_v59  ;;  %v776_v49 = vmul.f32 %v5790_v31, %v770_v42  ;;  %1149 = vmatpush.bf16.msrb.mxu1 %v4419_v41  ;;  %v5792_v3 = vpop.eup %5791  ;;  %1162 = vmatpush.bf16.msrb.mxu2 %v4423_v34  ;;  %5793 = vpow2.f32 %v4395_v43  ;;  %v4407_v41 = vor.u32 %v5506_v19, %v4406_v29  ;;  %v4408_v59 = vld [vmem:[#allocation5 + $0x18] sm:$0xf0]  ;;  %v5532_v43 = vld [vmem:[%s7925_s3 + $0x2c] sm:$0xf]  ;;  %v4503_v19 = vld [vmem:[%s7925_s3 + $0x10] sm:$0xf0] }
 0x1b8   :  { %v922_v23 = vadd.f32 %v5786_v40, %v921_v33  ;;  %1175 = vmatpush.bf16.msrb.mxu3 %v4427_v44  ;;  %v5535_v42 = vld [vmem:[%s7925_s3 + $0x44] sm:$0xf]  ;;  %v4534_v31 = vor.u32 %v5537_v48, %v4533_v36  ;;  %v4535_v33 = vld [vmem:[%s7925_s3 + $0x50] sm:$0xf0]  ;;  %v4541_v34 = vld [vmem:[%s7925_s3 + $0x48] sm:$0xf] }
 0x1b9   :  { %v941_v47 = vadd.f32 %v5788_v45, %v940_v56  ;;  %978 = vrot.lane.b32.xlu0 %v776_v49, %s6037_s5  ;;  %777 = vst.msk [vmem:[#allocation3] sm:$0xff] %vm389_vm14, %v776_v49  ;;  %v5538_v44 = vld [vmem:[%s7925_s3 + $0x54] sm:$0xf0]  ;;  %v4538_v56 = vor.u32 %v5535_v42, %v4535_v33  ;;  %v5536_v49 = vld [vmem:[%s7925_s3 + $0x4c] sm:$0xf] }
 0x1ba   :  { %v926_v26 = vsel %vm925_vm2, %v5786_v40, %v922_v23  ;;  %v4398_v40 = vld [vmem:[#allocation5] sm:$0xf]  ;;  %v4542_v54 = vor.u32 %v5538_v44, %v4541_v34  ;;  %v4543_v23 = vld [vmem:[%s7925_s3 + $0x58] sm:$0xf0]  ;;  %v5527_v29 = vld [vmem:[%s7925_s3 + $0x4] sm:$0xf] }
 0x1bb   :  { %v931_v11 = vsel %vm928_vm4, %v930_v24, %v926_v26  ;;  %v945_v22 = vsel %vm944_vm3, %v5788_v45, %v941_v47  ;;  %v4399_v28 = vor.u32 %v5505_v27, %v4398_v40  ;;  %v4400_v45 = vld [vmem:[#allocation5 + $0x10] sm:$0xf0]  ;;  %1163 = vmatpush.bf16.msrb.mxu2 %v4407_v41  ;;  %v4546_v47 = vor.u32 %v5536_v49, %v4543_v23  ;;  %v5531_v26 = vld [vmem:[%s7925_s3 + $0x24] sm:$0xf] }
 0x1bc   :  { %v950_v17 = vsel %vm947_vm5, %v949_v50, %v945_v22  ;;  %v973_v4 = vmul.f32 %v5792_v3, %v931_v11  ;;  %v4403_v30 = vor.u32 %v5503_v57, %v4400_v45  ;;  %v4517_v3 = vld [vmem:[%s7925_s3 + $0x20] sm:$0xf]  ;;  %v5533_v50 = vld [vmem:[%s7925_s3 + $0x2c] sm:$0xf0]  ;;  %v4519_v11 = vld [vmem:[%s7925_s3 + $0x30] sm:$0xf0]  ;;  %v4506_v36 = vor.u32 %v5527_v29, %v4503_v19 }
 0x1bd   :  { %v972_v14 = vmul.f32 %v950_v17, %v6442_v20  ;;  %v5794_v32 = vpop.eup %5793  ;;  %v5504_v20 = vld [vmem:[#allocation5 + $0xc] sm:$0xf]  ;;  %1137 = vmatpush.bf16.msrb.mxu0 %v4399_v28  ;;  %v4518_v22 = vor.u32 %v5533_v50, %v4517_v3  ;;  %v4522_v17 = vor.u32 %v5531_v26, %v4519_v11  ;;  %v4527_v40 = vld [vmem:[%s7925_s3 + $0x38] sm:$0xf0]  ;;  %v4501_v27 = vld [vmem:[%s7925_s3] sm:$0xf] }
 0x1be   :  { %v6589_v1 = vadd.f32 1.0, %v5794_v32  ;;  %v4411_v51 = vor.u32 %v5504_v20, %v4408_v59  ;;  %1150 = vmatpush.bf16.msrb.mxu1 %v4403_v30  ;;  %v5529_v57 = vld [vmem:[%s7925_s3 + $0xc] sm:$0xf0]  ;;  %v4530_v45 = vor.u32 %v5532_v43, %v4527_v40  ;;  %v4509_v30 = vld [vmem:[%s7925_s3 + $0x8] sm:$0xf] }
 0x1bf   :  { %v6586_v35 = vadd.f32 %v973_v4, %v972_v14  ;;  %1357 = vmatpush.bf16.msra.mxu2 %v4542_v54  ;;  %v4525_v4 = vld [vmem:[%s7925_s3 + $0x28] sm:$0xf]  ;;  %v5534_v14 = vld [vmem:[%s7925_s3 + $0x34] sm:$0xf0]  ;;  %v4502_v41 = vor.u32 %v5529_v57, %v4501_v27  ;;  %v5528_v59 = vld [vmem:[%s7925_s3 + $0xc] sm:$0xf] }
 0x1c0   :  { %5795 = vrcp.f32 %v6589_v1  ;;  %1176 = vmatpush.bf16.msrb.mxu3 %v4411_v51  ;;  %v4526_v32 = vor.u32 %v5534_v14, %v4525_v4  ;;  %v5530_v20 = vld [vmem:[%s7925_s3 + $0x14] sm:$0xf0]  ;;  %v4511_v51 = vld [vmem:[%s7925_s3 + $0x18] sm:$0xf0]  ;;  %v968_v44 = vand.u32 2147483648, %v6589_v1  ;;  %vm962_vm7 = vweird.f32 %v6589_v1 }
 0x1c1   :  { %1331 = vmatpush.bf16.msra.mxu0 %v4534_v31  ;;  %v4510_v48 = vor.u32 %v5530_v20, %v4509_v30  ;;  %v4514_v42 = vor.u32 %v5528_v59, %v4511_v51  ;;  %5797 = vtanh.f32 %v6586_v35  ;;  %v131_v20 = vadd.f32 %v6457_v62, %v6304_v21 }
 0x1c2   :  { %1344 = vmatpush.bf16.msra.mxu1 %v4538_v56  ;;  %v966_v56 = vand.u32 2147483647, %v6589_v1  ;;  %v969_v23 = vor.u32 1.1754944e-38, %v968_v44 }
 0x1c3   :  { %1358 = vmatpush.bf16.msra.mxu2 %v4526_v32 }
 0x1c4   :  { %1370 = vmatpush.bf16.msra.mxu3 %v4546_v47  ;;  %vm967_vm9 = vcmp.eq.f32.partialorder %v966_v56, 8.507059e+37 }
 0x1c5   :  { %1332 = vmatpush.bf16.msra.mxu0 %v4518_v22 }
 0x1c6   :  { %v5796_v24 = vpop.eup %5795  ;;  %1345 = vmatpush.bf16.msra.mxu1 %v4522_v17 }
 0x1c7   :  { %v958_v28 = vmul.f32 %v5796_v24, %v6589_v1  ;;  %1359 = vmatpush.bf16.msra.mxu2 %v4510_v48  ;;  %vm963_vm6 = vweird.f32 %v5796_v24  ;;  %v5798_v49 = vpop.eup %5797 }
 0x1c8   :  { %1371 = vmatpush.bf16.msra.mxu3 %v4530_v45  ;;  %vm964_vm8 = vmor %vm962_vm7, %vm963_vm6 }
 0x1c9   :  { %v959_v31 = vsub.f32 1.0, %v958_v28  ;;  %1333 = vmatpush.bf16.msra.mxu0 %v4502_v41 }
 0x1ca   :  { %1346 = vmatpush.bf16.msra.mxu1 %v4506_v36 }
 0x1cb   :  { %v960_v33 = vmul.f32 %v5796_v24, %v959_v31 }
 0x1cc   :  { %1372 = vmatpush.bf16.msra.mxu3 %v4514_v42 }
 0x1cd   :  { %v961_v34 = vadd.f32 %v5796_v24, %v960_v33 }
 0x1cf   :  { %v965_v54 = vsel %vm964_vm8, %v5796_v24, %v961_v34 }
 0x1d0   :  { %v970_v3 = vsel %vm967_vm9, %v969_v23, %v965_v54 }
 0x1d1   :  { %v976_v47 = vmul.f32 %v5798_v49, %v970_v3 }
 0x1d3   :  { %v1250_v1 = vpack.c.bf16 %v976_v47, %v976_v47 }
 0x22b   :  { %v979_v50 = vpop.permute.xlu0 %978 }
 0x22c   :  { %v981_v26 = vsel %vm389_vm14, %v976_v47, %v979_v50 }
 0x22d   :  { %v982_v11 = vpack.c.bf16 %v981_v26, %v981_v26 }
 0x22f   :  { %4492 = vmatmul.msk.bf16.vlgmr.msrb.gmra.mxu0 %vm658_vm15, %v982_v11  ;;  %4493 = vmatmul.msk.bf16.vlgmr.msrb.gmra.mxu1 %vm658_vm15, %v982_v11 }
 0x230   :  { %4494 = vmatmul.msk.bf16.vlgmr.msrb.gmra.mxu2 %vm658_vm15, %v982_v11  ;;  %4495 = vmatmul.msk.bf16.vlgmr.msrb.gmra.mxu3 %vm658_vm15, %v982_v11  ;;  %v4636_v11 = vld [vmem:[#allocation5 + $0xa0] sm:$0xf] }
 0x23f   :  { %4547 = vmatmul.msk.bf16.vlgmr.msra.gmra.mxu0 %vm389_vm14, %v1250_v1  ;;  %4548 = vmatmul.msk.bf16.vlgmr.msra.gmra.mxu1 %vm389_vm14, %v1250_v1 }
 0x240   :  { %4549 = vmatmul.msk.bf16.vlgmr.msra.gmra.mxu2 %vm389_vm14, %v1250_v1  ;;  %4550 = vmatmul.msk.bf16.vlgmr.msra.gmra.mxu3 %vm389_vm14, %v1250_v1  ;;  %v5561_v1 = vld [vmem:[#allocation5 + $0xac] sm:$0xf0] }
 0x2ac   :  { %v1139_v24 = vpop.f32.mrf.mxu0  ;;  %v1152_v22 = vpop.f32.mrf.mxu1 }
 0x2ad   :  { %v1140_v17 = vadd.f32 %v1139_v24, %v6466_v38  ;;  %v1153_v4 = vadd.f32 %v1152_v22, %v6468_v39  ;;  %v5559_v22 = vld [vmem:[#allocation5 + $0xa4] sm:$0xf] }
 0x2af   :  { %v4496_v14 = vmul.f32 -1.442695, %v1140_v17  ;;  %v4497_v43 = vmul.f32 -1.442695, %v1153_v4  ;;  %v4638_v17 = vld [vmem:[#allocation5 + $0xb0] sm:$0xf0] }
 0x2b0   :  { %v4644_v4 = vld [vmem:[#allocation5 + $0xa8] sm:$0xf] }
 0x2b1   :  { %5799 = vpow2.f32 %v4496_v14 }
 0x2b2   :  { %5801 = vpow2.f32 %v4497_v43 }
 0x2b3   :  { %v1165_v32 = vpop.f32.mrf.mxu2  ;;  %v1178_v40 = vpop.f32.mrf.mxu3 }
 0x2b4   :  { %v1179_v27 = vadd.f32 %v1178_v40, %v6472_v46  ;;  %v1141_v57 = vpop.f32.mrf.mxu0  ;;  %v1154_v28 = vpop.f32.mrf.mxu1  ;;  %v1166_v36 = vadd.f32 %v1165_v32, %v6477_v8 }
 0x2b5   :  { %v5562_v57 = vld [vmem:[#allocation5 + $0xb4] sm:$0xf0]  ;;  %v5560_v28 = vld [vmem:[#allocation5 + $0xac] sm:$0xf] }
 0x2b6   :  { %v4498_v45 = vmul.f32 -1.442695, %v1179_v27  ;;  %v4637_v27 = vor.u32 %v5561_v1, %v4636_v11 }
 0x2b7   :  { %v5800_v29 = vpop.eup %5799 }
 0x2b8   :  { %v5802_v19 = vpop.eup %5801  ;;  %v6681_v30 = vadd.f32 1.0, %v5800_v29  ;;  %5803 = vpow2.f32 %v4498_v45  ;;  %1600 = vmatpush.bf16.msrb.mxu0 %v4637_v27 }
 0x2b9   :  { %v6683_v41 = vadd.f32 1.0, %v5802_v19 }
 0x2ba   :  { %5805 = vrcp.f32 %v6681_v30  ;;  %v1195_v31 = vand.u32 2147483647, %v6681_v30  ;;  %v1197_v56 = vand.u32 2147483648, %v6681_v30  ;;  %vm1191_vm11 = vweird.f32 %v6681_v30 }
 0x2bb   :  { %5807 = vrcp.f32 %v6683_v41  ;;  %v1167_v59 = vpop.f32.mrf.mxu2  ;;  %v1180_v51 = vpop.f32.mrf.mxu3  ;;  %v1216_v3 = vand.u32 2147483648, %v6683_v41  ;;  %v1214_v47 = vand.u32 2147483647, %v6683_v41  ;;  %vm1210_vm1 = vweird.f32 %v6683_v41 }
 0x2bc   :  { %v1335_v48 = vpop.f32.mrf.mxu0  ;;  %v1348_v42 = vpop.f32.mrf.mxu1  ;;  %5809 = vtanh.f32 %v1166_v36  ;;  %vm6703_vm10 = vcmp.eq.f32.partialorder %v1195_v31, 8.507059e+37  ;;  %v1198_v43 = vor.u32 1.1754944e-38, %v1197_v56  ;;  %v4646_v36 = vld [vmem:[#allocation5 + $0xb8] sm:$0xf0]  ;;  %v4641_v31 = vor.u32 %v5559_v22, %v4638_v17  ;;  %v5558_v22 = vld [vmem:[#allocation5 + $0x94] sm:$0xf0] }
 0x2bd   :  { %v1378_v33 = vadd.f32 %v1335_v48, %v131_v20  ;;  %v1379_v34 = vadd.f32 %v1348_v42, %v6262_v60  ;;  %v1217_v29 = vor.u32 1.1754944e-38, %v1216_v3  ;;  %v4620_v48 = vld [vmem:[#allocation5 + $0x80] sm:$0xf]  ;;  %vm6721_vm0 = vcmp.eq.f32.partialorder %v1214_v47, 8.507059e+37  ;;  %v4628_v3 = vld [vmem:[#allocation5 + $0x88] sm:$0xf] }
 0x2be   :  { %v5804_v44 = vpop.eup %5803  ;;  %1613 = vmatpush.bf16.msrb.mxu1 %v4641_v31  ;;  %v5556_v17 = vld [vmem:[#allocation5 + $0x8c] sm:$0xf]  ;;  %v4604_v31 = vld [vmem:[#allocation5 + $0x60] sm:$0xf]  ;;  %v4606_v60 = vld [vmem:[#allocation5 + $0x70] sm:$0xf0] }
 0x2bf   :  { %v6693_v54 = vadd.f32 1.0, %v5804_v44  ;;  %v4551_v49 = vmul.f32 -1.442695, %v1378_v33  ;;  %v4552_v62 = vmul.f32 -1.442695, %v1379_v34  ;;  %v4645_v33 = vor.u32 %v5562_v57, %v4644_v4 }
 0x2c0   :  { %v6695_v23 = vpop.eup %5805  ;;  %v5557_v34 = vld [vmem:[#allocation5 + $0x8c] sm:$0xf0]  ;;  %v5555_v44 = vld [vmem:[#allocation5 + $0x84] sm:$0xf]  ;;  %v4630_v4 = vld [vmem:[#allocation5 + $0x98] sm:$0xf0] }
 0x2c1   :  { %v6699_v50 = vpop.eup %5807  ;;  %v1187_v26 = vmul.f32 %v6695_v23, %v6681_v30  ;;  %5811 = vrcp.f32 %v6693_v54  ;;  %vm1192_vm12 = vweird.f32 %v6695_v23  ;;  %1626 = vmatpush.bf16.msrb.mxu2 %v4645_v33  ;;  %v4621_v1 = vor.u32 %v5557_v34, %v4620_v48  ;;  %v5553_v33 = vld [vmem:[#allocation5 + $0x6c] sm:$0xf0] }
 0x2c2   :  { %v1206_v24 = vmul.f32 %v6699_v50, %v6683_v41  ;;  %5813 = vpow2.f32 %v4551_v49  ;;  %v5810_v56 = vpop.eup %5809  ;;  %vm1211_vm13 = vweird.f32 %v6699_v50  ;;  %v4649_v49 = vor.u32 %v5560_v28, %v4646_v36  ;;  %vm1193_vm2 = vmor %vm1191_vm11, %vm1192_vm12 }
 0x2c3   :  { %v1188_v14 = vsub.f32 1.0, %v1187_v26  ;;  %5815 = vpow2.f32 %v4552_v62  ;;  %v1361_v32 = vpop.f32.mrf.mxu2  ;;  %v1374_v40 = vpop.f32.mrf.mxu3  ;;  %v4622_v62 = vld [vmem:[#allocation5 + $0x90] sm:$0xf0]  ;;  %v1236_v27 = vand.u32 2147483648, %v6693_v54  ;;  %vm1212_vm3 = vmor %vm1210_vm1, %vm1211_vm13  ;;  %1601 = vmatpush.bf16.msrb.mxu0 %v4621_v1  ;;  %vm1230_vm5 = vweird.f32 %v6693_v54 }
 0x2c4   :  { %v1207_v45 = vsub.f32 1.0, %v1206_v24  ;;  %v6712_v19 = vadd.f32 %v1361_v32, %v6273_v2  ;;  %v6715_v20 = vadd.f32 %v1374_v40, %v6285_v9  ;;  %v1337_v59 = vpop.f32.mrf.mxu0  ;;  %v1350_v51 = vpop.f32.mrf.mxu1  ;;  %v4625_v24 = vor.u32 %v5555_v44, %v4622_v62  ;;  %1639 = vmatpush.bf16.msrb.mxu3 %v4649_v49  ;;  %v5554_v49 = vld [vmem:[#allocation5 + $0x74] sm:$0xf0]  ;;  %v5552_v62 = vld [vmem:[#allocation5 + $0x6c] sm:$0xf] }
 0x2c5   :  { %v1189_v42 = vmul.f32 %v6695_v23, %v1188_v14  ;;  %v1234_v40 = vand.u32 2147483647, %v6693_v54  ;;  %v4633_v59 = vor.u32 %v5556_v17, %v4630_v4  ;;  %v5549_v9 = vld [vmem:[#allocation5 + $0x4c] sm:$0xf0]  ;;  %v4590_v17 = vld [vmem:[#allocation5 + $0x50] sm:$0xf0] }
 0x2c6   :  { %v1208_v2 = vmul.f32 %v6699_v50, %v1207_v45  ;;  %v4629_v45 = vor.u32 %v5558_v22, %v4628_v3  ;;  %1614 = vmatpush.bf16.msrb.mxu1 %v4625_v24  ;;  %v4614_v3 = vld [vmem:[#allocation5 + $0x78] sm:$0xf0]  ;;  %v4605_v24 = vor.u32 %v5553_v33, %v4604_v31  ;;  %v4596_v4 = vld [vmem:[#allocation5 + $0x48] sm:$0xf]  ;;  %v5545_v33 = vld [vmem:[#allocation5 + $0x2c] sm:$0xf0] }
 0x2c7   :  { %v6725_v26 = vpop.eup %5811  ;;  %v1190_v11 = vadd.f32 %v6695_v23, %v1189_v42  ;;  %vm6760_vm6 = vcmp.eq.f32.partialorder %v1234_v40, 8.507059e+37 }
 0x2c8   :  { %v5814_v47 = vpop.eup %5813  ;;  %v1209_v14 = vadd.f32 %v6699_v50, %v1208_v2  ;;  %v1226_v32 = vmul.f32 %v6725_v26, %v6693_v54  ;;  %1627 = vmatpush.bf16.msrb.mxu2 %v4629_v45  ;;  %v5551_v2 = vld [vmem:[#allocation5 + $0x64] sm:$0xf]  ;;  %1640 = vmatpush.bf16.msrb.mxu3 %v4633_v59  ;;  %vm1231_vm4 = vweird.f32 %v6725_v26  ;;  %v4617_v45 = vor.u32 %v5552_v62, %v4614_v3  ;;  %v4598_v59 = vld [vmem:[#allocation5 + $0x58] sm:$0xf0]  ;;  %v5546_v62 = vld [vmem:[#allocation5 + $0x34] sm:$0xf0] }
 0x2c9   :  { %v5816_v57 = vpop.eup %5815  ;;  %v1194_v28 = vsel %vm1193_vm2, %v6695_v23, %v1190_v11  ;;  %v6743_v30 = vadd.f32 1.0, %v5814_v47  ;;  %v5547_v11 = vld [vmem:[#allocation5 + $0x44] sm:$0xf]  ;;  %v4609_v22 = vor.u32 %v5551_v2, %v4606_v60  ;;  %vm6765_vm7 = vmor %vm1230_vm5, %vm1231_vm4  ;;  %1602 = vmatpush.bf16.msrb.mxu0 %v4605_v24  ;;  %v1237_v60 = vor.u32 1.1754944e-38, %v1236_v27  ;;  %v5544_v3 = vld [vmem:[#allocation5 + $0x2c] sm:$0xf] }
 0x2ca   :  { %v1199_v51 = vsel %vm6703_vm10, %v1198_v43, %v1194_v28  ;;  %v1213_v36 = vsel %vm1212_vm3, %v6699_v50, %v1209_v14  ;;  %v6748_v48 = vadd.f32 1.0, %v5816_v57  ;;  %v1227_v42 = vsub.f32 1.0, %v1226_v32  ;;  %v4612_v43 = vld [vmem:[#allocation5 + $0x68] sm:$0xf]  ;;  %v5548_v14 = vld [vmem:[#allocation5 + $0x4c] sm:$0xf] }
 0x2cb   :  { %v1218_v41 = vsel %vm6721_vm0, %v1217_v29, %v1213_v36  ;;  %v1241_v34 = vmul.f32 %v5810_v56, %v1199_v51  ;;  %5817 = vrcp.f32 %v6743_v30  ;;  %v1363_v23 = vpop.f32.mrf.mxu2  ;;  %v1376_v44 = vpop.f32.mrf.mxu3  ;;  %v4588_v56 = vld [vmem:[#allocation5 + $0x40] sm:$0xf]  ;;  %1615 = vmatpush.bf16.msrb.mxu1 %v4609_v22  ;;  %v4613_v28 = vor.u32 %v5554_v49, %v4612_v43 }
 0x2cc   :  { %v1240_v50 = vmul.f32 %v1218_v41, %v6554_v61  ;;  %5819 = vrcp.f32 %v6748_v48  ;;  %v1228_v29 = vmul.f32 %v6725_v26, %v1227_v42  ;;  %v5550_v61 = vld [vmem:[#allocation5 + $0x54] sm:$0xf0]  ;;  %v4572_v51 = vld [vmem:[#allocation5 + $0x20] sm:$0xf]  ;;  %v4589_v40 = vor.u32 %v5549_v9, %v4588_v56  ;;  %v5543_v41 = vld [vmem:[#allocation5 + $0x24] sm:$0xf]  ;;  %1641 = vmatpush.bf16.msrb.mxu3 %v4617_v45 }
 0x2cd   :  { %v4593_v42 = vor.u32 %v5547_v11, %v4590_v17  ;;  %v4597_v31 = vor.u32 %v5550_v61, %v4596_v4  ;;  %1628 = vmatpush.bf16.msrb.mxu2 %v4613_v28  ;;  %v4601_v43 = vor.u32 %v5548_v14, %v4598_v59  ;;  %v1416_v9 = vand.u32 2147483648, %v6748_v48 }
 0x2ce   :  { %v6757_v1 = vadd.f32 %v1241_v34, %v1240_v50  ;;  %v1229_v32 = vadd.f32 %v6725_v26, %v1228_v29  ;;  %v4574_v34 = vld [vmem:[#allocation5 + $0x30] sm:$0xf0]  ;;  %v4580_v50 = vld [vmem:[#allocation5 + $0x28] sm:$0xf]  ;;  %v4582_v29 = vld [vmem:[#allocation5 + $0x38] sm:$0xf0]  ;;  %1603 = vmatpush.bf16.msrb.mxu0 %v4589_v40  ;;  %vm1391_vm10 = vweird.f32 %v6743_v30  ;;  %vm1410_vm11 = vweird.f32 %v6748_v48 }
 0x2cf   :  { %1616 = vmatpush.bf16.msrb.mxu1 %v4593_v42  ;;  %v4577_v11 = vor.u32 %v5543_v41, %v4574_v34  ;;  %v1395_v27 = vand.u32 2147483647, %v6743_v30  ;;  %v1397_v24 = vand.u32 2147483648, %v6743_v30  ;;  %v4581_v4 = vor.u32 %v5546_v62, %v4580_v50  ;;  %v5542_v62 = vld [vmem:[#allocation5 + $0x14] sm:$0xf0] }
 0x2d0   :  { %5821 = vtanh.f32 %v6757_v1  ;;  %v1233_v2 = vsel %vm6765_vm7, %v6725_v26, %v1229_v32  ;;  %v4573_v26 = vor.u32 %v5545_v33, %v4572_v51  ;;  %1642 = vmatpush.bf16.msrb.mxu3 %v4601_v43  ;;  %v4585_v61 = vor.u32 %v5544_v3, %v4582_v29  ;;  %v5539_v43 = vld [vmem:[#allocation5 + $0x4] sm:$0xf] }
 0x2d1   :  { %v5818_v36 = vpop.eup %5817  ;;  %5823 = vtanh.f32 %v6712_v19  ;;  %v1238_v22 = vsel %vm6760_vm6, %v1237_v60, %v1233_v2  ;;  %1629 = vmatpush.bf16.msrb.mxu2 %v4597_v31  ;;  %v1414_v32 = vand.u32 2147483647, %v6748_v48  ;;  %v1398_v47 = vor.u32 1.1754944e-38, %v1397_v24  ;;  %v5541_v60 = vld [vmem:[#allocation5 + $0xc] sm:$0xf0] }
 0x2d2   :  { %v5820_v23 = vpop.eup %5819  ;;  %v1387_v44 = vmul.f32 %v5818_v36, %v6743_v30  ;;  %vm1392_vm8 = vweird.f32 %v5818_v36  ;;  %1604 = vmatpush.bf16.msrb.mxu0 %v4573_v26  ;;  %v1417_v51 = vor.u32 1.1754944e-38, %v1416_v9  ;;  %vm1396_vm0 = vcmp.eq.f32.partialorder %v1395_v27, 8.507059e+37  ;;  %v5573_v26 = vld [vmem:[%s7925_s3 + $0x4c] sm:$0xf0]  ;;  %v4693_v27 = vld [vmem:[%s7925_s3 + $0x50] sm:$0xf0] }
 0x2d3   :  { %v1406_v49 = vmul.f32 %v5820_v23, %v6748_v48  ;;  %vm1411_vm9 = vweird.f32 %v5820_v23  ;;  %1617 = vmatpush.bf16.msrb.mxu1 %v4577_v11  ;;  %vm1393_vm12 = vmor %vm1391_vm10, %vm1392_vm8  ;;  %vm1415_vm1 = vcmp.eq.f32.partialorder %v1414_v32, 8.507059e+37  ;;  %v4553_v34 = vmul.f32 -1.442695, %v6715_v20  ;;  %v4691_v20 = vld [vmem:[%s7925_s3 + $0x40] sm:$0xf] }
 0x2d4   :  { %v1388_v56 = vsub.f32 1.0, %v1387_v44  ;;  %vm1412_vm13 = vmor %vm1410_vm11, %vm1411_vm9  ;;  %1643 = vmatpush.bf16.msrb.mxu3 %v4585_v61  ;;  %v5571_v11 = vld [vmem:[%s7925_s3 + $0x44] sm:$0xf]  ;;  %v4699_v24 = vld [vmem:[%s7925_s3 + $0x48] sm:$0xf] }
 0x2d5   :  { %v1407_v54 = vsub.f32 1.0, %v1406_v49  ;;  %1630 = vmatpush.bf16.msrb.mxu2 %v4581_v4  ;;  %5825 = vpow2.f32 %v4553_v34  ;;  %v4564_v49 = vld [vmem:[#allocation5 + $0x8] sm:$0xf]  ;;  %v5572_v4 = vld [vmem:[%s7925_s3 + $0x4c] sm:$0xf] }
 0x2d6   :  { %v5822_v17 = vpop.eup %5821  ;;  %v1389_v19 = vmul.f32 %v5818_v36, %v1388_v56  ;;  %v4565_v29 = vor.u32 %v5542_v62, %v4564_v49  ;;  %v4566_v56 = vld [vmem:[#allocation5 + $0x18] sm:$0xf0]  ;;  %v4701_v61 = vld [vmem:[%s7925_s3 + $0x58] sm:$0xf0]  ;;  %v5565_v34 = vld [vmem:[%s7925_s3 + $0xc] sm:$0xf0] }
 0x2d7   :  { %v1408_v14 = vmul.f32 %v5820_v23, %v1407_v54  ;;  %v1244_v57 = vmul.f32 %v5822_v17, %v1238_v22  ;;  %v5824_v45 = vpop.eup %5823  ;;  %v4692_v54 = vor.u32 %v5573_v26, %v4691_v20  ;;  %v5574_v22 = vld [vmem:[%s7925_s3 + $0x54] sm:$0xf0]  ;;  %v4696_v17 = vor.u32 %v5571_v11, %v4693_v27  ;;  %v5564_v62 = vld [vmem:[%s7925_s3 + $0xc] sm:$0xf] }
 0x2d8   :  { %v1390_v28 = vadd.f32 %v5818_v36, %v1389_v19  ;;  %v4700_v19 = vor.u32 %v5574_v22, %v4699_v24  ;;  %v5566_v49 = vld [vmem:[%s7925_s3 + $0x14] sm:$0xf0] }
 0x2d9   :  { %v1409_v59 = vadd.f32 %v5820_v23, %v1408_v14  ;;  %1446 = vrot.lane.b32.xlu0 %v1244_v57, %s6037_s5  ;;  %1245 = vst.msk [vmem:[#allocation3 + $0x8] sm:$0xff] %vm389_vm14, %v1244_v57  ;;  %1631 = vmatpush.bf16.msrb.mxu2 %v4565_v29  ;;  %v4675_v14 = vld [vmem:[%s7925_s3 + $0x20] sm:$0xf]  ;;  %v4704_v57 = vor.u32 %v5572_v4, %v4701_v61 }
 0x2da   :  { %v1394_v40 = vsel %vm1393_vm12, %v5818_v36, %v1390_v28  ;;  %v4556_v36 = vld [vmem:[#allocation5] sm:$0xf]  ;;  %v5569_v28 = vld [vmem:[%s7925_s3 + $0x2c] sm:$0xf0] }
 0x2db   :  { %v1399_v30 = vsel %vm1396_vm0, %v1398_v47, %v1394_v40  ;;  %v1413_v42 = vsel %vm1412_vm13, %v5820_v23, %v1409_v59  ;;  %v5826_v44 = vpop.eup %5825  ;;  %v4557_v50 = vor.u32 %v5541_v60, %v4556_v36  ;;  %v4558_v23 = vld [vmem:[#allocation5 + $0x10] sm:$0xf0]  ;;  %v4677_v47 = vld [vmem:[%s7925_s3 + $0x30] sm:$0xf0]  ;;  %v4676_v59 = vor.u32 %v5569_v28, %v4675_v14  ;;  %v4683_v40 = vld [vmem:[%s7925_s3 + $0x28] sm:$0xf] }
 0x2dc   :  { %v1418_v31 = vsel %vm1415_vm1, %v1417_v51, %v1413_v42  ;;  %v1441_v33 = vmul.f32 %v5824_v45, %v1399_v30  ;;  %v6793_v2 = vadd.f32 1.0, %v5826_v44  ;;  %v4561_v3 = vor.u32 %v5539_v43, %v4558_v23  ;;  %v5567_v45 = vld [vmem:[%s7925_s3 + $0x24] sm:$0xf]  ;;  %v5570_v30 = vld [vmem:[%s7925_s3 + $0x34] sm:$0xf0] }
 0x2dd   :  { %v1440_v48 = vmul.f32 %v1418_v31, %v6586_v35  ;;  %v5540_v35 = vld [vmem:[#allocation5 + $0xc] sm:$0xf]  ;;  %1605 = vmatpush.bf16.msrb.mxu0 %v4557_v50  ;;  %1825 = vmatpush.bf16.msra.mxu2 %v4700_v19  ;;  %v4680_v51 = vor.u32 %v5567_v45, %v4677_v47  ;;  %v5568_v42 = vld [vmem:[%s7925_s3 + $0x2c] sm:$0xf]  ;;  %v4684_v31 = vor.u32 %v5570_v30, %v4683_v40  ;;  %v5563_v60 = vld [vmem:[%s7925_s3 + $0x4] sm:$0xf] }
 0x2de   :  { %5827 = vrcp.f32 %v6793_v2  ;;  %v4569_v9 = vor.u32 %v5540_v35, %v4566_v56  ;;  %1618 = vmatpush.bf16.msrb.mxu1 %v4561_v3  ;;  %v4661_v43 = vld [vmem:[%s7925_s3 + $0x10] sm:$0xf0]  ;;  %v4667_v50 = vld [vmem:[%s7925_s3 + $0x8] sm:$0xf]  ;;  %v4669_v3 = vld [vmem:[%s7925_s3 + $0x18] sm:$0xf0]  ;;  %vm1430_vm3 = vweird.f32 %v6793_v2 }
 0x2df   :  { %v6790_v41 = vadd.f32 %v1441_v33, %v1440_v48  ;;  %v4685_v33 = vld [vmem:[%s7925_s3 + $0x38] sm:$0xf0]  ;;  %v4659_v48 = vld [vmem:[%s7925_s3] sm:$0xf]  ;;  %v4664_v29 = vor.u32 %v5563_v60, %v4661_v43  ;;  %v4668_v35 = vor.u32 %v5566_v49, %v4667_v50  ;;  %v4672_v56 = vor.u32 %v5564_v62, %v4669_v3 }
 0x2e0   :  { %1644 = vmatpush.bf16.msrb.mxu3 %v4569_v9  ;;  %v4688_v36 = vor.u32 %v5568_v42, %v4685_v33  ;;  %v4660_v23 = vor.u32 %v5565_v34, %v4659_v48  ;;  %v1436_v11 = vand.u32 2147483648, %v6793_v2  ;;  %v175_v60 = vadd.f32 %v6268_v63, %v6259_v58 }
 0x2e1   :  { %1799 = vmatpush.bf16.msra.mxu0 %v4692_v54  ;;  %1826 = vmatpush.bf16.msra.mxu2 %v4684_v31  ;;  %5829 = vtanh.f32 %v6790_v41  ;;  %v1434_v54 = vand.u32 2147483647, %v6793_v2  ;;  %v134_v43 = vadd.f32 %v6459_v37, %v6304_v21 }
 0x2e2   :  { %1812 = vmatpush.bf16.msra.mxu1 %v4696_v17  ;;  %v1437_v22 = vor.u32 1.1754944e-38, %v1436_v11 }
 0x2e3   :  { %vm1435_vm5 = vcmp.eq.f32.partialorder %v1434_v54, 8.507059e+37 }
 0x2e4   :  { %v5828_v32 = vpop.eup %5827  ;;  %1838 = vmatpush.bf16.msra.mxu3 %v4704_v57 }
 0x2e5   :  { %v1426_v44 = vmul.f32 %v5828_v32, %v6793_v2  ;;  %1800 = vmatpush.bf16.msra.mxu0 %v4676_v59  ;;  %1827 = vmatpush.bf16.msra.mxu2 %v4668_v35  ;;  %vm1431_vm2 = vweird.f32 %v5828_v32 }
 0x2e6   :  { %1813 = vmatpush.bf16.msra.mxu1 %v4680_v51  ;;  %vm1432_vm4 = vmor %vm1430_vm3, %vm1431_vm2 }
 0x2e7   :  { %v1427_v9 = vsub.f32 1.0, %v1426_v44  ;;  %v5830_v24 = vpop.eup %5829 }
 0x2e8   :  { %1839 = vmatpush.bf16.msra.mxu3 %v4688_v36 }
 0x2e9   :  { %1801 = vmatpush.bf16.msra.mxu0 %v4660_v23  ;;  %v1428_v20 = vmul.f32 %v5828_v32, %v1427_v9 }
 0x2ea   :  { %1814 = vmatpush.bf16.msra.mxu1 %v4664_v29 }
 0x2eb   :  { %v1429_v26 = vadd.f32 %v5828_v32, %v1428_v20 }
 0x2ec   :  { %1840 = vmatpush.bf16.msra.mxu3 %v4672_v56 }
 0x2ed   :  { %v1433_v27 = vsel %vm1432_vm4, %v5828_v32, %v1429_v26 }
 0x2ee   :  { %v1438_v17 = vsel %vm1435_vm5, %v1437_v22, %v1433_v27  ;;  %v216_v22 = vadd.f32 %v6282_v7, %v6270_v0  ;;  %v5595_v7 = vld [vmem:[#allocation5 + $0xa4] sm:$0xf] }
 0x2ef   :  { %v1444_v19 = vmul.f32 %v5830_v24, %v1438_v17 }
 0x2f1   :  { %v1718_v2 = vpack.c.bf16 %v1444_v19, %v1444_v19 }
 0x34b   :  { %v1447_v4 = vpop.permute.xlu0 %1446 }
 0x34c   :  { %v1449_v61 = vsel %vm389_vm14, %v1444_v19, %v1447_v4  ;;  %v4794_v4 = vld [vmem:[#allocation5 + $0xa0] sm:$0xf]  ;;  %v4764_v19 = vld [vmem:[#allocation5 + $0x70] sm:$0xf0] }
 0x34d   :  { %v1450_v14 = vpack.c.bf16 %v1449_v61, %v1449_v61  ;;  %v5597_v61 = vld [vmem:[#allocation5 + $0xac] sm:$0xf0] }
 0x34f   :  { %4650 = vmatmul.msk.bf16.vlgmr.msrb.gmra.mxu0 %vm658_vm15, %v1450_v14  ;;  %4651 = vmatmul.msk.bf16.vlgmr.msrb.gmra.mxu1 %vm658_vm15, %v1450_v14 }
 0x350   :  { %4652 = vmatmul.msk.bf16.vlgmr.msrb.gmra.mxu2 %vm658_vm15, %v1450_v14  ;;  %4653 = vmatmul.msk.bf16.vlgmr.msrb.gmra.mxu3 %vm658_vm15, %v1450_v14  ;;  %v257_v14 = vadd.f32 %v6292_v13, %v6280_v6 }
 0x35f   :  { %4705 = vmatmul.msk.bf16.vlgmr.msra.gmra.mxu0 %vm389_vm14, %v1718_v2  ;;  %4706 = vmatmul.msk.bf16.vlgmr.msra.gmra.mxu1 %vm389_vm14, %v1718_v2 }
 0x360   :  { %4707 = vmatmul.msk.bf16.vlgmr.msra.gmra.mxu2 %vm389_vm14, %v1718_v2  ;;  %4708 = vmatmul.msk.bf16.vlgmr.msra.gmra.mxu3 %vm389_vm14, %v1718_v2 }
 0x3cc   :  { %v1607_v32 = vpop.f32.mrf.mxu0  ;;  %v1620_v57 = vpop.f32.mrf.mxu1 }
 0x3cd   :  { %v1608_v28 = vadd.f32 %v1607_v32, %v6466_v38  ;;  %v1621_v45 = vadd.f32 %v1620_v57, %v6468_v39  ;;  %v4796_v32 = vld [vmem:[#allocation5 + $0xb0] sm:$0xf0]  ;;  %v4802_v57 = vld [vmem:[#allocation5 + $0xa8] sm:$0xf] }
 0x3cf   :  { %v4654_v47 = vmul.f32 -1.442695, %v1608_v28  ;;  %v4655_v59 = vmul.f32 -1.442695, %v1621_v45 }
 0x3d1   :  { %5831 = vpow2.f32 %v4654_v47 }
 0x3d2   :  { %5833 = vpow2.f32 %v4655_v59 }
 0x3d3   :  { %v1633_v51 = vpop.f32.mrf.mxu2  ;;  %v1646_v40 = vpop.f32.mrf.mxu3 }
 0x3d4   :  { %v1647_v30 = vadd.f32 %v1646_v40, %v6472_v46  ;;  %v1609_v42 = vpop.f32.mrf.mxu0  ;;  %v1622_v31 = vpop.f32.mrf.mxu1  ;;  %v1634_v49 = vadd.f32 %v1633_v51, %v6477_v8  ;;  %v4795_v51 = vor.u32 %v5597_v61, %v4794_v4  ;;  %v5598_v40 = vld [vmem:[#allocation5 + $0xb4] sm:$0xf0]  ;;  %v5592_v61 = vld [vmem:[#allocation5 + $0x8c] sm:$0xf] }
 0x3d5   :  { %v5594_v4 = vld [vmem:[#allocation5 + $0x94] sm:$0xf0] }
 0x3d6   :  { %v4656_v33 = vmul.f32 -1.442695, %v1647_v30  ;;  %v5596_v30 = vld [vmem:[#allocation5 + $0xac] sm:$0xf]  ;;  %2068 = vmatpush.bf16.msrb.mxu0 %v4795_v51 }
 0x3d7   :  { %v5832_v48 = vpop.eup %5831 }
 0x3d8   :  { %v5834_v34 = vpop.eup %5833  ;;  %v6885_v44 = vadd.f32 1.0, %v5832_v48  ;;  %5835 = vpow2.f32 %v4656_v33 }
 0x3d9   :  { %v6887_v36 = vadd.f32 1.0, %v5834_v34 }
 0x3da   :  { %5837 = vrcp.f32 %v6885_v44  ;;  %v1663_v29 = vand.u32 2147483647, %v6885_v44  ;;  %v1665_v20 = vand.u32 2147483648, %v6885_v44  ;;  %vm1659_vm7 = vweird.f32 %v6885_v44 }
 0x3db   :  { %5839 = vrcp.f32 %v6887_v36  ;;  %v1635_v50 = vpop.f32.mrf.mxu2  ;;  %v1648_v23 = vpop.f32.mrf.mxu3  ;;  %v1684_v54 = vand.u32 2147483648, %v6887_v36  ;;  %v1682_v27 = vand.u32 2147483647, %v6887_v36  ;;  %vm1678_vm11 = vweird.f32 %v6887_v36 }
 0x3dc   :  { %v1803_v62 = vpop.f32.mrf.mxu0  ;;  %v1816_v3 = vpop.f32.mrf.mxu1  ;;  %5841 = vtanh.f32 %v1634_v49  ;;  %vm6910_vm6 = vcmp.eq.f32.partialorder %v1663_v29, 8.507059e+37  ;;  %v1666_v45 = vor.u32 1.1754944e-38, %v1665_v20  ;;  %v4799_v23 = vor.u32 %v5595_v7, %v4796_v32  ;;  %v4780_v20 = vld [vmem:[#allocation5 + $0x90] sm:$0xf0] }
 0x3dd   :  { %v1846_v35 = vadd.f32 %v1803_v62, %v134_v43  ;;  %v1847_v56 = vadd.f32 %v1816_v3, %v175_v60  ;;  %v1685_v31 = vor.u32 1.1754944e-38, %v1684_v54  ;;  %v4804_v60 = vld [vmem:[#allocation5 + $0xb8] sm:$0xf0]  ;;  %v4778_v43 = vld [vmem:[#allocation5 + $0x80] sm:$0xf]  ;;  %v4803_v49 = vor.u32 %v5598_v40, %v4802_v57 }
 0x3de   :  { %v5836_v9 = vpop.eup %5835  ;;  %v5593_v62 = vld [vmem:[#allocation5 + $0x8c] sm:$0xf0]  ;;  %v5591_v3 = vld [vmem:[#allocation5 + $0x84] sm:$0xf]  ;;  %vm6928_vm10 = vcmp.eq.f32.partialorder %v1682_v27, 8.507059e+37  ;;  %2081 = vmatpush.bf16.msrb.mxu1 %v4799_v23 }
 0x3df   :  { %v6898_v26 = vadd.f32 1.0, %v5836_v9  ;;  %v4709_v63 = vmul.f32 -1.442695, %v1846_v35  ;;  %v4710_v11 = vmul.f32 -1.442695, %v1847_v56  ;;  %v4807_v9 = vor.u32 %v5596_v30, %v4804_v60  ;;  %2094 = vmatpush.bf16.msrb.mxu2 %v4803_v49 }
 0x3e0   :  { %v6900_v37 = vpop.eup %5837  ;;  %v5589_v60 = vld [vmem:[#allocation5 + $0x6c] sm:$0xf0]  ;;  %v5587_v23 = vld [vmem:[#allocation5 + $0x64] sm:$0xf]  ;;  %v5590_v49 = vld [vmem:[#allocation5 + $0x74] sm:$0xf0] }
 0x3e1   :  { %v6904_v24 = vpop.eup %5839  ;;  %v1655_v17 = vmul.f32 %v6900_v37, %v6885_v44  ;;  %5843 = vrcp.f32 %v6898_v26  ;;  %vm1660_vm8 = vweird.f32 %v6900_v37  ;;  %v1702_v32 = vand.u32 2147483647, %v6898_v26  ;;  %2107 = vmatpush.bf16.msrb.mxu3 %v4807_v9  ;;  %v5583_v56 = vld [vmem:[#allocation5 + $0x44] sm:$0xf] }
 0x3e2   :  { %v1674_v2 = vmul.f32 %v6904_v24, %v6887_v36  ;;  %5845 = vpow2.f32 %v4709_v63  ;;  %v5842_v29 = vpop.eup %5841  ;;  %vm1679_vm9 = vweird.f32 %v6904_v24  ;;  %v4786_v63 = vld [vmem:[#allocation5 + $0x88] sm:$0xf]  ;;  %vm1661_vm12 = vmor %vm1659_vm7, %vm1660_vm8  ;;  %v1704_v57 = vand.u32 2147483648, %v6898_v26 }
 0x3e3   :  { %v1656_v28 = vsub.f32 1.0, %v1655_v17  ;;  %5847 = vpow2.f32 %v4710_v11  ;;  %v1829_v47 = vpop.f32.mrf.mxu2  ;;  %v1842_v59 = vpop.f32.mrf.mxu3  ;;  %v4783_v17 = vor.u32 %v5591_v3, %v4780_v20  ;;  %vm1680_vm13 = vmor %vm1678_vm11, %vm1679_vm9  ;;  %v4772_v3 = vld [vmem:[#allocation5 + $0x78] sm:$0xf0]  ;;  %vm1698_vm1 = vweird.f32 %v6898_v26 }
 0x3e4   :  { %v1675_v42 = vsub.f32 1.0, %v1674_v2  ;;  %v6920_v13 = vadd.f32 %v1829_v47, %v216_v22  ;;  %v6922_v33 = vadd.f32 %v1842_v59, %v257_v14  ;;  %v1805_v48 = vpop.f32.mrf.mxu0  ;;  %v1818_v34 = vpop.f32.mrf.mxu1  ;;  %v4779_v22 = vor.u32 %v5593_v62, %v4778_v43  ;;  %v4788_v14 = vld [vmem:[#allocation5 + $0x98] sm:$0xf0]  ;;  %v5588_v62 = vld [vmem:[#allocation5 + $0x6c] sm:$0xf] }
 0x3e5   :  { %v1657_v50 = vmul.f32 %v6900_v37, %v1656_v28  ;;  %v4787_v59 = vor.u32 %v5594_v4, %v4786_v63  ;;  %v4791_v51 = vor.u32 %v5592_v61, %v4788_v14  ;;  %v4762_v34 = vld [vmem:[#allocation5 + $0x60] sm:$0xf]  ;;  %2082 = vmatpush.bf16.msrb.mxu1 %v4783_v17  ;;  %v4767_v63 = vor.u32 %v5587_v23, %v4764_v19  ;;  %v5584_v4 = vld [vmem:[#allocation5 + $0x4c] sm:$0xf]  ;;  %v5582_v19 = vld [vmem:[#allocation5 + $0x34] sm:$0xf0] }
 0x3e6   :  { %v1676_v35 = vmul.f32 %v6904_v24, %v1675_v42  ;;  %2069 = vmatpush.bf16.msrb.mxu0 %v4779_v22  ;;  %v4763_v20 = vor.u32 %v5589_v60, %v4762_v34  ;;  %v4754_v22 = vld [vmem:[#allocation5 + $0x48] sm:$0xf]  ;;  %vm6967_vm2 = vcmp.eq.f32.partialorder %v1702_v32, 8.507059e+37 }
 0x3e7   :  { %v6932_v11 = vpop.eup %5843  ;;  %v1658_v54 = vadd.f32 %v6900_v37, %v1657_v50  ;;  %2095 = vmatpush.bf16.msrb.mxu2 %v4787_v59  ;;  %2108 = vmatpush.bf16.msrb.mxu3 %v4791_v51 }
 0x3e8   :  { %v5846_v27 = vpop.eup %5845  ;;  %v1677_v2 = vadd.f32 %v6904_v24, %v1676_v35  ;;  %v1694_v7 = vmul.f32 %v6932_v11, %v6898_v26  ;;  %vm1699_vm0 = vweird.f32 %v6932_v11  ;;  %v5585_v35 = vld [vmem:[#allocation5 + $0x4c] sm:$0xf0] }
 0x3e9   :  { %v5848_v28 = vpop.eup %5847  ;;  %v1662_v47 = vsel %vm1661_vm12, %v6900_v37, %v1658_v54  ;;  %v6950_v44 = vadd.f32 1.0, %v5846_v27  ;;  %v4748_v54 = vld [vmem:[#allocation5 + $0x50] sm:$0xf0]  ;;  %vm6972_vm3 = vmor %vm1698_vm1, %vm1699_vm0  ;;  %2083 = vmatpush.bf16.msrb.mxu1 %v4767_v63 }
 0x3ea   :  { %v1667_v40 = vsel %vm6910_vm6, %v1666_v45, %v1662_v47  ;;  %v1681_v30 = vsel %vm1680_vm13, %v6904_v24, %v1677_v2  ;;  %v6955_v42 = vadd.f32 1.0, %v5848_v28  ;;  %v1695_v48 = vsub.f32 1.0, %v1694_v7  ;;  %v4770_v45 = vld [vmem:[#allocation5 + $0x68] sm:$0xf]  ;;  %2070 = vmatpush.bf16.msrb.mxu0 %v4763_v20  ;;  %v4756_v7 = vld [vmem:[#allocation5 + $0x58] sm:$0xf0] }
 0x3eb   :  { %v1686_v36 = vsel %vm6928_vm10, %v1685_v31, %v1681_v30  ;;  %v1709_v43 = vmul.f32 %v5842_v29, %v1667_v40  ;;  %5849 = vrcp.f32 %v6950_v44  ;;  %v1831_v37 = vpop.f32.mrf.mxu2  ;;  %v1844_v50 = vpop.f32.mrf.mxu3  ;;  %v4746_v29 = vld [vmem:[#allocation5 + $0x40] sm:$0xf]  ;;  %v4771_v27 = vor.u32 %v5590_v49, %v4770_v45  ;;  %v5581_v40 = vld [vmem:[#allocation5 + $0x2c] sm:$0xf0]  ;;  %v5579_v30 = vld [vmem:[#allocation5 + $0x24] sm:$0xf] }
 0x3ec   :  { %v1708_v24 = vmul.f32 %v1686_v36, %v6757_v1  ;;  %5851 = vrcp.f32 %v6955_v42  ;;  %v1696_v31 = vmul.f32 %v6932_v11, %v1695_v48  ;;  %v5586_v1 = vld [vmem:[#allocation5 + $0x54] sm:$0xf0]  ;;  %v4775_v2 = vor.u32 %v5588_v62, %v4772_v3  ;;  %v4730_v28 = vld [vmem:[#allocation5 + $0x20] sm:$0xf]  ;;  %v4732_v48 = vld [vmem:[#allocation5 + $0x30] sm:$0xf0] }
 0x3ed   :  { %v4747_v32 = vor.u32 %v5585_v35, %v4746_v29  ;;  %v4751_v59 = vor.u32 %v5583_v56, %v4748_v54  ;;  %v4755_v51 = vor.u32 %v5586_v1, %v4754_v22  ;;  %2096 = vmatpush.bf16.msrb.mxu2 %v4771_v27  ;;  %v4759_v37 = vor.u32 %v5584_v4, %v4756_v7  ;;  %v4738_v50 = vld [vmem:[#allocation5 + $0x28] sm:$0xf]  ;;  %v5580_v45 = vld [vmem:[#allocation5 + $0x2c] sm:$0xf] }
 0x3ee   :  { %v6964_v9 = vadd.f32 %v1709_v43, %v1708_v24  ;;  %v1697_v61 = vadd.f32 %v6932_v11, %v1696_v31  ;;  %v1705_v43 = vor.u32 1.1754944e-38, %v1704_v57  ;;  %2109 = vmatpush.bf16.msrb.mxu3 %v4775_v2  ;;  %v4740_v24 = vld [vmem:[#allocation5 + $0x38] sm:$0xf0]  ;;  %v1884_v62 = vand.u32 2147483648, %v6955_v42 }
 0x3ef   :  { %2071 = vmatpush.bf16.msrb.mxu0 %v4747_v32  ;;  %2084 = vmatpush.bf16.msrb.mxu1 %v4751_v59  ;;  %v4735_v3 = vor.u32 %v5579_v30, %v4732_v48  ;;  %v1863_v57 = vand.u32 2147483647, %v6950_v44  ;;  %v1865_v31 = vand.u32 2147483648, %v6950_v44  ;;  %v4739_v56 = vor.u32 %v5582_v19, %v4738_v50  ;;  %v5577_v30 = vld [vmem:[#allocation5 + $0xc] sm:$0xf0] }
 0x3f0   :  { %5853 = vtanh.f32 %v6964_v9  ;;  %v1701_v36 = vsel %vm6972_vm3, %v6932_v11, %v1697_v61  ;;  %v4731_v11 = vor.u32 %v5581_v40, %v4730_v28  ;;  %v4743_v20 = vor.u32 %v5580_v45, %v4740_v24  ;;  %v5575_v48 = vld [vmem:[#allocation5 + $0x4] sm:$0xf]  ;;  %v5607_v24 = vld [vmem:[%s7925_s3 + $0x44] sm:$0xf] }
 0x3f1   :  { %v5850_v47 = vpop.eup %5849  ;;  %5855 = vtanh.f32 %v6920_v13  ;;  %v1706_v29 = vsel %vm6967_vm2, %v1705_v43, %v1701_v36  ;;  %2097 = vmatpush.bf16.msrb.mxu2 %v4755_v51  ;;  %v1882_v54 = vand.u32 2147483647, %v6955_v42  ;;  %vm1859_vm6 = vweird.f32 %v6950_v44  ;;  %v4722_v36 = vld [vmem:[#allocation5 + $0x8] sm:$0xf]  ;;  %v5578_v43 = vld [vmem:[#allocation5 + $0x14] sm:$0xf0] }
 0x3f2   :  { %v5852_v34 = vpop.eup %5851  ;;  %v1855_v60 = vmul.f32 %v5850_v47, %v6950_v44  ;;  %vm1860_vm4 = vweird.f32 %v5850_v47  ;;  %2110 = vmatpush.bf16.msrb.mxu3 %v4759_v37  ;;  %vm1878_vm7 = vweird.f32 %v6955_v42  ;;  %v1866_v17 = vor.u32 1.1754944e-38, %v1865_v31  ;;  %v5609_v45 = vld [vmem:[%s7925_s3 + $0x4c] sm:$0xf0]  ;;  %v5608_v31 = vld [vmem:[%s7925_s3 + $0x4c] sm:$0xf] }
 0x3f3   :  { %v1874_v23 = vmul.f32 %v5852_v34, %v6955_v42  ;;  %vm1879_vm5 = vweird.f32 %v5852_v34  ;;  %2072 = vmatpush.bf16.msrb.mxu0 %v4731_v11  ;;  %2085 = vmatpush.bf16.msrb.mxu1 %v4735_v3  ;;  %vm1861_vm8 = vmor %vm1859_vm6, %vm1860_vm4  ;;  %v1885_v14 = vor.u32 1.1754944e-38, %v1884_v62  ;;  %vm1864_vm10 = vcmp.eq.f32.partialorder %v1863_v57, 8.507059e+37  ;;  %v4851_v62 = vld [vmem:[%s7925_s3 + $0x50] sm:$0xf0]  ;;  %v4857_v11 = vld [vmem:[%s7925_s3 + $0x48] sm:$0xf] }
 0x3f4   :  { %v1856_v49 = vsub.f32 1.0, %v1855_v60  ;;  %vm1880_vm9 = vmor %vm1878_vm7, %vm1879_vm5  ;;  %vm1883_vm11 = vcmp.eq.f32.partialorder %v1882_v54, 8.507059e+37  ;;  %v4711_v59 = vmul.f32 -1.442695, %v6922_v33  ;;  %v4723_v50 = vor.u32 %v5578_v43, %v4722_v36  ;;  %v4849_v33 = vld [vmem:[%s7925_s3 + $0x40] sm:$0xf] }
 0x3f5   :  { %v1875_v26 = vsub.f32 1.0, %v1874_v23  ;;  %2098 = vmatpush.bf16.msrb.mxu2 %v4739_v56  ;;  %v4724_v23 = vld [vmem:[#allocation5 + $0x18] sm:$0xf0]  ;;  %v5610_v3 = vld [vmem:[%s7925_s3 + $0x54] sm:$0xf0] }
 0x3f6   :  { %v5854_v35 = vpop.eup %5853  ;;  %v1857_v13 = vmul.f32 %v5850_v47, %v1856_v49  ;;  %2111 = vmatpush.bf16.msrb.mxu3 %v4743_v20  ;;  %5857 = vpow2.f32 %v4711_v59  ;;  %v4850_v49 = vor.u32 %v5609_v45, %v4849_v33  ;;  %v4858_v57 = vor.u32 %v5610_v3, %v4857_v11  ;;  %v5605_v20 = vld [vmem:[%s7925_s3 + $0x2c] sm:$0xf0]  ;;  %v4835_v54 = vld [vmem:[%s7925_s3 + $0x30] sm:$0xf0] }
 0x3f7   :  { %v1876_v63 = vmul.f32 %v5852_v34, %v1875_v26  ;;  %v1712_v22 = vmul.f32 %v5854_v35, %v1706_v29  ;;  %v5856_v4 = vpop.eup %5855  ;;  %v4854_v26 = vor.u32 %v5607_v24, %v4851_v62  ;;  %v4859_v29 = vld [vmem:[%s7925_s3 + $0x58] sm:$0xf0]  ;;  %v4833_v35 = vld [vmem:[%s7925_s3 + $0x20] sm:$0xf]  ;;  %v4819_v59 = vld [vmem:[%s7925_s3 + $0x10] sm:$0xf0] }
 0x3f8   :  { %v1858_v1 = vadd.f32 %v5850_v47, %v1857_v13  ;;  %v4862_v56 = vor.u32 %v5608_v31, %v4859_v29 }
 0x3f9   :  { %v1877_v61 = vadd.f32 %v5852_v34, %v1876_v63  ;;  %1914 = vrot.lane.b32.xlu1 %v1712_v22, %s6037_s5  ;;  %1713 = vst.msk [vmem:[#allocation3 + $0x10] sm:$0xff] %vm389_vm14, %v1712_v22  ;;  %2099 = vmatpush.bf16.msrb.mxu2 %v4723_v50  ;;  %v5603_v63 = vld [vmem:[%s7925_s3 + $0x24] sm:$0xf]  ;;  %v4834_v22 = vor.u32 %v5605_v20, %v4833_v35 }
 0x3fa   :  { %v1862_v27 = vsel %vm1861_vm8, %v5850_v47, %v1858_v1  ;;  %v4714_v47 = vld [vmem:[#allocation5] sm:$0xf]  ;;  %v4838_v1 = vor.u32 %v5603_v63, %v4835_v54 }
 0x3fb   :  { %v1867_v44 = vsel %vm1864_vm10, %v1866_v17, %v1862_v27  ;;  %v1881_v2 = vsel %vm1880_vm9, %v5852_v34, %v1877_v61  ;;  %v4715_v60 = vor.u32 %v5577_v30, %v4714_v47  ;;  %v4716_v34 = vld [vmem:[#allocation5 + $0x10] sm:$0xf0]  ;;  %v5606_v17 = vld [vmem:[%s7925_s3 + $0x34] sm:$0xf0]  ;;  %v5604_v61 = vld [vmem:[%s7925_s3 + $0x2c] sm:$0xf] }
 0x3fc   :  { %v1886_v7 = vsel %vm1883_vm11, %v1885_v14, %v1881_v2  ;;  %v1909_v28 = vmul.f32 %v5856_v4, %v1867_v44  ;;  %v5858_v51 = vpop.eup %5857  ;;  %v4719_v37 = vor.u32 %v5575_v48, %v4716_v34  ;;  %v4841_v4 = vld [vmem:[%s7925_s3 + $0x28] sm:$0xf]  ;;  %v4843_v27 = vld [vmem:[%s7925_s3 + $0x38] sm:$0xf0]  ;;  %v4817_v44 = vld [vmem:[%s7925_s3] sm:$0xf] }
 0x3fd   :  { %v1908_v42 = vmul.f32 %v1886_v7, %v6790_v41  ;;  %v7000_v40 = vadd.f32 1.0, %v5858_v51  ;;  %v5576_v41 = vld [vmem:[#allocation5 + $0xc] sm:$0xf]  ;;  %2073 = vmatpush.bf16.msrb.mxu0 %v4715_v60  ;;  %2293 = vmatpush.bf16.msra.mxu2 %v4858_v57  ;;  %v4842_v14 = vor.u32 %v5606_v17, %v4841_v4  ;;  %v5601_v2 = vld [vmem:[%s7925_s3 + $0xc] sm:$0xf0] }
 0x3fe   :  { %v4727_v19 = vor.u32 %v5576_v41, %v4724_v23  ;;  %2086 = vmatpush.bf16.msrb.mxu1 %v4719_v37  ;;  %v4825_v51 = vld [vmem:[%s7925_s3 + $0x8] sm:$0xf]  ;;  %v4818_v47 = vor.u32 %v5601_v2, %v4817_v44  ;;  %v5602_v30 = vld [vmem:[%s7925_s3 + $0x14] sm:$0xf0]  ;;  %v5600_v48 = vld [vmem:[%s7925_s3 + $0xc] sm:$0xf]  ;;  %v137_v44 = vadd.f32 %v6461_v55, %v6304_v21 }
 0x3ff   :  { %v6997_v32 = vadd.f32 %v1909_v28, %v1908_v42  ;;  %5859 = vrcp.f32 %v7000_v40  ;;  %v4846_v28 = vor.u32 %v5604_v61, %v4843_v27  ;;  %v5599_v42 = vld [vmem:[%s7925_s3 + $0x4] sm:$0xf]  ;;  %v4827_v60 = vld [vmem:[%s7925_s3 + $0x18] sm:$0xf0]  ;;  %v4826_v36 = vor.u32 %v5602_v30, %v4825_v51 }
 0x400   :  { %2112 = vmatpush.bf16.msrb.mxu3 %v4727_v19  ;;  %v4822_v34 = vor.u32 %v5599_v42, %v4819_v59  ;;  %v4830_v43 = vor.u32 %v5600_v48, %v4827_v60  ;;  %v1904_v23 = vand.u32 2147483648, %v7000_v40  ;;  %vm1898_vm13 = vweird.f32 %v7000_v40 }
 0x401   :  { %2267 = vmatpush.bf16.msra.mxu0 %v4850_v49  ;;  %2294 = vmatpush.bf16.msra.mxu2 %v4842_v14  ;;  %5861 = vtanh.f32 %v6997_v32  ;;  %v1902_v19 = vand.u32 2147483647, %v7000_v40 }
 0x402   :  { %2280 = vmatpush.bf16.msra.mxu1 %v4854_v26  ;;  %v1905_v24 = vor.u32 1.1754944e-38, %v1904_v23 }
 0x403   :  { %vm1903_vm1 = vcmp.eq.f32.partialorder %v1902_v19, 8.507059e+37  ;;  %v4952_v19 = vld [vmem:[#allocation5 + $0xa0] sm:$0xf] }
 0x404   :  { %2306 = vmatpush.bf16.msra.mxu3 %v4862_v56 }
 0x405   :  { %v5860_v13 = vpop.eup %5859  ;;  %2268 = vmatpush.bf16.msra.mxu0 %v4834_v22  ;;  %2295 = vmatpush.bf16.msra.mxu2 %v4826_v36 }
 0x406   :  { %v1894_v7 = vmul.f32 %v5860_v13, %v7000_v40  ;;  %2281 = vmatpush.bf16.msra.mxu1 %v4838_v1  ;;  %vm1899_vm12 = vweird.f32 %v5860_v13 }
 0x407   :  { %vm1900_vm0 = vmor %vm1898_vm13, %vm1899_vm12  ;;  %v5862_v45 = vpop.eup %5861 }
 0x408   :  { %2307 = vmatpush.bf16.msra.mxu3 %v4846_v28  ;;  %v1895_v37 = vsub.f32 1.0, %v1894_v7 }
 0x409   :  { %2269 = vmatpush.bf16.msra.mxu0 %v4818_v47 }
 0x40a   :  { %2282 = vmatpush.bf16.msra.mxu1 %v4822_v34  ;;  %v1896_v50 = vmul.f32 %v5860_v13, %v1895_v37 }
 0x40c   :  { %2308 = vmatpush.bf16.msra.mxu3 %v4830_v43  ;;  %v1897_v41 = vadd.f32 %v5860_v13, %v1896_v50 }
 0x40e   :  { %v1901_v33 = vsel %vm1900_vm0, %v5860_v13, %v1897_v41 }
 0x40f   :  { %v1906_v49 = vsel %vm1903_vm1, %v1905_v24, %v1901_v33  ;;  %v5633_v33 = vld [vmem:[#allocation5 + $0xac] sm:$0xf0]  ;;  %v5631_v24 = vld [vmem:[#allocation5 + $0xa4] sm:$0xf] }
 0x410   :  { %v1912_v62 = vmul.f32 %v5862_v45, %v1906_v49  ;;  %v4954_v49 = vld [vmem:[#allocation5 + $0xb0] sm:$0xf0] }
 0x412   :  { %v2186_v40 = vpack.c.bf16 %v1912_v62, %v1912_v62 }
 0x46b   :  { %v1915_v11 = vpop.permute.xlu1 %1914 }
 0x46c   :  { %v1917_v3 = vsel %vm389_vm14, %v1912_v62, %v1915_v11  ;;  %v4960_v62 = vld [vmem:[#allocation5 + $0xa8] sm:$0xf] }
 0x46d   :  { %v1918_v26 = vpack.c.bf16 %v1917_v3, %v1917_v3 }
 0x46f   :  { %4808 = vmatmul.msk.bf16.vlgmr.msrb.gmra.mxu0 %vm658_vm15, %v1918_v26  ;;  %4809 = vmatmul.msk.bf16.vlgmr.msrb.gmra.mxu1 %vm658_vm15, %v1918_v26 }
 0x470   :  { %4810 = vmatmul.msk.bf16.vlgmr.msrb.gmra.mxu2 %vm658_vm15, %v1918_v26  ;;  %4811 = vmatmul.msk.bf16.vlgmr.msrb.gmra.mxu3 %vm658_vm15, %v1918_v26 }
 0x47f   :  { %4863 = vmatmul.msk.bf16.vlgmr.msra.gmra.mxu0 %vm389_vm14, %v2186_v40  ;;  %4864 = vmatmul.msk.bf16.vlgmr.msra.gmra.mxu1 %vm389_vm14, %v2186_v40 }
 0x480   :  { %4865 = vmatmul.msk.bf16.vlgmr.msra.gmra.mxu2 %vm389_vm14, %v2186_v40  ;;  %4866 = vmatmul.msk.bf16.vlgmr.msra.gmra.mxu3 %vm389_vm14, %v2186_v40 }
 0x4ec   :  { %v2075_v57 = vpop.f32.mrf.mxu0  ;;  %v2088_v31 = vpop.f32.mrf.mxu1 }
 0x4ed   :  { %v2076_v29 = vadd.f32 %v2075_v57, %v6466_v38  ;;  %v2089_v35 = vadd.f32 %v2088_v31, %v6468_v39  ;;  %v4953_v57 = vor.u32 %v5633_v33, %v4952_v19  ;;  %v5634_v31 = vld [vmem:[#allocation5 + $0xb4] sm:$0xf0] }
 0x4ef   :  { %v4812_v13 = vmul.f32 -1.442695, %v2076_v29  ;;  %v4813_v56 = vmul.f32 -1.442695, %v2089_v35  ;;  %v5632_v29 = vld [vmem:[#allocation5 + $0xac] sm:$0xf]  ;;  %2536 = vmatpush.bf16.msrb.mxu0 %v4953_v57 }
 0x4f1   :  { %5863 = vpow2.f32 %v4812_v13 }
 0x4f2   :  { %5865 = vpow2.f32 %v4813_v56 }
 0x4f3   :  { %v2101_v20 = vpop.f32.mrf.mxu2  ;;  %v2114_v63 = vpop.f32.mrf.mxu3 }
 0x4f4   :  { %v2115_v54 = vadd.f32 %v2114_v63, %v6472_v46  ;;  %v2077_v22 = vpop.f32.mrf.mxu0  ;;  %v2090_v1 = vpop.f32.mrf.mxu1  ;;  %v2102_v28 = vadd.f32 %v2101_v20, %v6477_v8 }
 0x4f5   :  { %v4962_v22 = vld [vmem:[#allocation5 + $0xb8] sm:$0xf0]  ;;  %v4936_v1 = vld [vmem:[#allocation5 + $0x80] sm:$0xf] }
 0x4f6   :  { %v4814_v4 = vmul.f32 -1.442695, %v2115_v54 }
 0x4f7   :  { %v5864_v17 = vpop.eup %5863 }
 0x4f8   :  { %v5866_v61 = vpop.eup %5865  ;;  %v7092_v14 = vadd.f32 1.0, %v5864_v17  ;;  %5867 = vpow2.f32 %v4814_v4  ;;  %v4957_v17 = vor.u32 %v5631_v24, %v4954_v49 }
 0x4f9   :  { %v7094_v27 = vadd.f32 1.0, %v5866_v61  ;;  %v4961_v61 = vor.u32 %v5634_v31, %v4960_v62  ;;  %v4920_v31 = vld [vmem:[#allocation5 + $0x60] sm:$0xf] }
 0x4fa   :  { %5869 = vrcp.f32 %v7092_v14  ;;  %v2131_v51 = vand.u32 2147483647, %v7092_v14  ;;  %v2133_v60 = vand.u32 2147483648, %v7092_v14  ;;  %vm2127_vm3 = vweird.f32 %v7092_v14  ;;  %2549 = vmatpush.bf16.msrb.mxu1 %v4957_v17  ;;  %v4904_v17 = vld [vmem:[#allocation5 + $0x40] sm:$0xf] }
 0x4fb   :  { %5871 = vrcp.f32 %v7094_v27  ;;  %v2103_v2 = vpop.f32.mrf.mxu2  ;;  %v2116_v7 = vpop.f32.mrf.mxu3  ;;  %v2152_v37 = vand.u32 2147483648, %v7094_v27  ;;  %v2150_v50 = vand.u32 2147483647, %v7094_v27  ;;  %vm2146_vm7 = vweird.f32 %v7094_v27  ;;  %2562 = vmatpush.bf16.msrb.mxu2 %v4961_v61  ;;  %v5621_v61 = vld [vmem:[#allocation5 + $0x4c] sm:$0xf0] }
 0x4fc   :  { %v2271_v42 = vpop.f32.mrf.mxu0  ;;  %v2284_v59 = vpop.f32.mrf.mxu1  ;;  %5873 = vtanh.f32 %v2102_v28  ;;  %vm7114_vm2 = vcmp.eq.f32.partialorder %v2131_v51, 8.507059e+37  ;;  %v2134_v3 = vor.u32 1.1754944e-38, %v2133_v60  ;;  %v5627_v2 = vld [vmem:[#allocation5 + $0x84] sm:$0xf]  ;;  %v4965_v28 = vor.u32 %v5632_v29, %v4962_v22  ;;  %v5630_v60 = vld [vmem:[#allocation5 + $0x94] sm:$0xf0] }
 0x4fd   :  { %v2314_v47 = vadd.f32 %v2271_v42, %v137_v44  ;;  %v2315_v30 = vadd.f32 %v2284_v59, %v6278_v5  ;;  %v2153_v13 = vor.u32 1.1754944e-38, %v2152_v37  ;;  %v5629_v44 = vld [vmem:[#allocation5 + $0x8c] sm:$0xf0]  ;;  %vm7132_vm6 = vcmp.eq.f32.partialorder %v2150_v50, 8.507059e+37  ;;  %v4938_v42 = vld [vmem:[#allocation5 + $0x90] sm:$0xf0] }
 0x4fe   :  { %v5868_v48 = vpop.eup %5867  ;;  %v4944_v59 = vld [vmem:[#allocation5 + $0x88] sm:$0xf]  ;;  %2575 = vmatpush.bf16.msrb.mxu3 %v4965_v28  ;;  %v5625_v29 = vld [vmem:[#allocation5 + $0x6c] sm:$0xf0]  ;;  %v4922_v5 = vld [vmem:[#allocation5 + $0x70] sm:$0xf0] }
 0x4ff   :  { %v7104_v34 = vadd.f32 1.0, %v5868_v48  ;;  %v4867_v36 = vmul.f32 -1.442695, %v2314_v47  ;;  %v4868_v55 = vmul.f32 -1.442695, %v2315_v30  ;;  %v4937_v30 = vor.u32 %v5629_v44, %v4936_v1 }
 0x500   :  { %v7106_v43 = vpop.eup %5869  ;;  %v4941_v48 = vor.u32 %v5627_v2, %v4938_v42  ;;  %v4945_v49 = vor.u32 %v5630_v60, %v4944_v59  ;;  %v5626_v22 = vld [vmem:[#allocation5 + $0x74] sm:$0xf0]  ;;  %v5624_v1 = vld [vmem:[#allocation5 + $0x6c] sm:$0xf]  ;;  %v5619_v44 = vld [vmem:[#allocation5 + $0x44] sm:$0xf] }
 0x501   :  { %v7110_v41 = vpop.eup %5871  ;;  %v2123_v23 = vmul.f32 %v7106_v43, %v7092_v14  ;;  %5875 = vrcp.f32 %v7104_v34  ;;  %vm2128_vm4 = vweird.f32 %v7106_v43  ;;  %v2170_v19 = vand.u32 2147483647, %v7104_v34  ;;  %2537 = vmatpush.bf16.msrb.mxu0 %v4937_v30  ;;  %v4912_v28 = vld [vmem:[#allocation5 + $0x48] sm:$0xf]  ;;  %v5620_v59 = vld [vmem:[#allocation5 + $0x4c] sm:$0xf] }
 0x502   :  { %v2142_v45 = vmul.f32 %v7110_v41, %v7094_v27  ;;  %5877 = vpow2.f32 %v4867_v36  ;;  %v5874_v7 = vpop.eup %5873  ;;  %vm2147_vm5 = vweird.f32 %v7110_v41  ;;  %v5628_v36 = vld [vmem:[#allocation5 + $0x8c] sm:$0xf]  ;;  %vm2129_vm8 = vmor %vm2127_vm3, %vm2128_vm4  ;;  %v2172_v33 = vand.u32 2147483648, %v7104_v34  ;;  %2550 = vmatpush.bf16.msrb.mxu1 %v4941_v48  ;;  %2563 = vmatpush.bf16.msrb.mxu2 %v4945_v49  ;;  %v4890_v49 = vld [vmem:[#allocation5 + $0x30] sm:$0xf0] }
 0x503   :  { %v2124_v11 = vsub.f32 1.0, %v2123_v23  ;;  %5879 = vpow2.f32 %v4868_v55  ;;  %v2297_v26 = vpop.f32.mrf.mxu2  ;;  %v2310_v40 = vpop.f32.mrf.mxu3  ;;  %v4946_v55 = vld [vmem:[#allocation5 + $0x98] sm:$0xf0]  ;;  %vm2148_vm9 = vmor %vm2146_vm7, %vm2147_vm5  ;;  %vm2166_vm11 = vweird.f32 %v7104_v34  ;;  %vm7171_vm12 = vcmp.eq.f32.partialorder %v2170_v19, 8.507059e+37 }
 0x504   :  { %v2143_v35 = vsub.f32 1.0, %v2142_v45  ;;  %v7123_v56 = vadd.f32 %v2297_v26, %v6290_v12  ;;  %v7126_v20 = vadd.f32 %v2310_v40, %v6300_v18  ;;  %v2273_v63 = vpop.f32.mrf.mxu0  ;;  %v2286_v54 = vpop.f32.mrf.mxu1  ;;  %v4949_v62 = vor.u32 %v5628_v36, %v4946_v55  ;;  %v4906_v18 = vld [vmem:[#allocation5 + $0x50] sm:$0xf0]  ;;  %v4914_v36 = vld [vmem:[#allocation5 + $0x58] sm:$0xf0] }
 0x505   :  { %v2125_v4 = vmul.f32 %v7106_v43, %v2124_v11  ;;  %v5623_v54 = vld [vmem:[#allocation5 + $0x64] sm:$0xf]  ;;  %v4888_v55 = vld [vmem:[#allocation5 + $0x20] sm:$0xf] }
 0x506   :  { %v2144_v12 = vmul.f32 %v7110_v41, %v2143_v35  ;;  %2576 = vmatpush.bf16.msrb.mxu3 %v4949_v62 }
 0x507   :  { %v7136_v51 = vpop.eup %5875  ;;  %v2126_v47 = vadd.f32 %v7106_v43, %v2125_v4  ;;  %v4930_v4 = vld [vmem:[#allocation5 + $0x78] sm:$0xf0] }
 0x508   :  { %v5878_v37 = vpop.eup %5877  ;;  %v2145_v50 = vadd.f32 %v7110_v41, %v2144_v12  ;;  %v2162_v23 = vmul.f32 %v7136_v51, %v7104_v34  ;;  %vm2167_vm10 = vweird.f32 %v7136_v51  ;;  %v4925_v12 = vor.u32 %v5623_v54, %v4922_v5 }
 0x509   :  { %v5880_v45 = vpop.eup %5879  ;;  %v2130_v24 = vsel %vm2129_vm8, %v7106_v43, %v2126_v47  ;;  %v7154_v14 = vadd.f32 1.0, %v5878_v37  ;;  %vm7176_vm13 = vmor %vm2166_vm11, %vm2167_vm10  ;;  %v4933_v60 = vor.u32 %v5624_v1, %v4930_v4 }
 0x50a   :  { %v2135_v11 = vsel %vm7114_vm2, %v2134_v3, %v2130_v24  ;;  %v2149_v26 = vsel %vm2148_vm9, %v7110_v41, %v2145_v50  ;;  %v7159_v40 = vadd.f32 1.0, %v5880_v45  ;;  %v2163_v57 = vsub.f32 1.0, %v2162_v23  ;;  %v4928_v3 = vld [vmem:[#allocation5 + $0x68] sm:$0xf]  ;;  %2551 = vmatpush.bf16.msrb.mxu1 %v4925_v12  ;;  %v5617_v45 = vld [vmem:[#allocation5 + $0x2c] sm:$0xf0] }
 0x50b   :  { %v2154_v27 = vsel %vm7132_vm6, %v2153_v13, %v2149_v26  ;;  %v2177_v35 = vmul.f32 %v5874_v7, %v2135_v11  ;;  %5881 = vrcp.f32 %v7154_v14  ;;  %v2299_v43 = vpop.f32.mrf.mxu2  ;;  %v2312_v63 = vpop.f32.mrf.mxu3  ;;  %v4921_v7 = vor.u32 %v5625_v29, %v4920_v31  ;;  %v5615_v24 = vld [vmem:[#allocation5 + $0x24] sm:$0xf]  ;;  %2577 = vmatpush.bf16.msrb.mxu3 %v4933_v60  ;;  %v4896_v29 = vld [vmem:[#allocation5 + $0x28] sm:$0xf] }
 0x50c   :  { %v2176_v41 = vmul.f32 %v2154_v27, %v6964_v9  ;;  %5883 = vrcp.f32 %v7159_v40  ;;  %v2164_v13 = vmul.f32 %v7136_v51, %v2163_v57  ;;  %v5622_v9 = vld [vmem:[#allocation5 + $0x54] sm:$0xf0]  ;;  %v4929_v48 = vor.u32 %v5626_v22, %v4928_v3  ;;  %v5616_v43 = vld [vmem:[#allocation5 + $0x2c] sm:$0xf]  ;;  %v4898_v63 = vld [vmem:[#allocation5 + $0x38] sm:$0xf0] }
 0x50d   :  { %2538 = vmatpush.bf16.msrb.mxu0 %v4921_v7  ;;  %v4905_v50 = vor.u32 %v5621_v61, %v4904_v17  ;;  %v4909_v23 = vor.u32 %v5619_v44, %v4906_v18  ;;  %v4913_v19 = vor.u32 %v5622_v9, %v4912_v28  ;;  %v2173_v57 = vor.u32 1.1754944e-38, %v2172_v33 }
 0x50e   :  { %v7168_v2 = vadd.f32 %v2177_v35, %v2176_v41  ;;  %v2165_v47 = vadd.f32 %v7136_v51, %v2164_v13  ;;  %2564 = vmatpush.bf16.msrb.mxu2 %v4929_v48  ;;  %v4917_v31 = vor.u32 %v5620_v59, %v4914_v36  ;;  %v5618_v35 = vld [vmem:[#allocation5 + $0x34] sm:$0xf0]  ;;  %v2352_v5 = vand.u32 2147483648, %v7159_v40 }
 0x50f   :  { %2552 = vmatpush.bf16.msrb.mxu1 %v4909_v23  ;;  %v4893_v3 = vor.u32 %v5615_v24, %v4890_v49  ;;  %v2331_v33 = vand.u32 2147483647, %v7154_v14  ;;  %v2333_v41 = vand.u32 2147483648, %v7154_v14  ;;  %v4897_v4 = vor.u32 %v5618_v35, %v4896_v29  ;;  %v5611_v23 = vld [vmem:[#allocation5 + $0x4] sm:$0xf] }
 0x510   :  { %5885 = vtanh.f32 %v7168_v2  ;;  %v2169_v26 = vsel %vm7176_vm13, %v7136_v51, %v2165_v47  ;;  %v4889_v51 = vor.u32 %v5617_v45, %v4888_v55  ;;  %2578 = vmatpush.bf16.msrb.mxu3 %v4917_v31  ;;  %v4901_v13 = vor.u32 %v5616_v43, %v4898_v63  ;;  %v4874_v45 = vld [vmem:[#allocation5 + $0x10] sm:$0xf0]  ;;  %v4880_v24 = vld [vmem:[#allocation5 + $0x8] sm:$0xf]  ;;  %v5614_v49 = vld [vmem:[#allocation5 + $0x14] sm:$0xf0] }
 0x511   :  { %v5882_v37 = vpop.eup %5881  ;;  %5887 = vtanh.f32 %v7123_v56  ;;  %2539 = vmatpush.bf16.msrb.mxu0 %v4905_v50  ;;  %v2174_v22 = vsel %vm7171_vm12, %v2173_v57, %v2169_v26  ;;  %v2350_v61 = vand.u32 2147483647, %v7159_v40  ;;  %vm2327_vm2 = vweird.f32 %v7154_v14  ;;  %v5613_v50 = vld [vmem:[#allocation5 + $0xc] sm:$0xf0]  ;;  %v4882_v26 = vld [vmem:[#allocation5 + $0x18] sm:$0xf0] }
 0x512   :  { %v5884_v62 = vpop.eup %5883  ;;  %v2323_v11 = vmul.f32 %v5882_v37, %v7154_v14  ;;  %vm2328_vm0 = vweird.f32 %v5882_v37  ;;  %2565 = vmatpush.bf16.msrb.mxu2 %v4913_v19  ;;  %vm2346_vm3 = vweird.f32 %v7159_v40  ;;  %v2334_v18 = vor.u32 1.1754944e-38, %v2333_v41  ;;  %v5645_v31 = vld [vmem:[%s7925_s3 + $0x4c] sm:$0xf0]  ;;  %v5643_v29 = vld [vmem:[%s7925_s3 + $0x44] sm:$0xf] }
 0x513   :  { %v2342_v27 = vmul.f32 %v5884_v62, %v7159_v40  ;;  %vm2347_vm1 = vweird.f32 %v5884_v62  ;;  %2553 = vmatpush.bf16.msrb.mxu1 %v4893_v3  ;;  %vm2329_vm4 = vmor %vm2327_vm2, %vm2328_vm0  ;;  %v2353_v9 = vor.u32 1.1754944e-38, %v2352_v5  ;;  %vm2332_vm6 = vcmp.eq.f32.partialorder %v2331_v33, 8.507059e+37  ;;  %v5009_v35 = vld [vmem:[%s7925_s3 + $0x50] sm:$0xf0]  ;;  %v5015_v43 = vld [vmem:[%s7925_s3 + $0x48] sm:$0xf] }
 0x514   :  { %v2324_v54 = vsub.f32 1.0, %v2323_v11  ;;  %vm2348_vm5 = vmor %vm2346_vm3, %vm2347_vm1  ;;  %2579 = vmatpush.bf16.msrb.mxu3 %v4901_v13  ;;  %vm2351_vm7 = vcmp.eq.f32.partialorder %v2350_v61, 8.507059e+37  ;;  %v4869_v60 = vmul.f32 -1.442695, %v7126_v20  ;;  %v4881_v11 = vor.u32 %v5614_v49, %v4880_v24  ;;  %v5007_v20 = vld [vmem:[%s7925_s3 + $0x40] sm:$0xf] }
 0x515   :  { %v2343_v34 = vsub.f32 1.0, %v2342_v27  ;;  %2540 = vmatpush.bf16.msrb.mxu0 %v4889_v51  ;;  %v5008_v27 = vor.u32 %v5645_v31, %v5007_v20  ;;  %v5646_v63 = vld [vmem:[%s7925_s3 + $0x54] sm:$0xf0]  ;;  %v5644_v51 = vld [vmem:[%s7925_s3 + $0x4c] sm:$0xf] }
 0x516   :  { %v5886_v1 = vpop.eup %5885  ;;  %v2325_v56 = vmul.f32 %v5882_v37, %v2324_v54  ;;  %2566 = vmatpush.bf16.msrb.mxu2 %v4897_v4  ;;  %5889 = vpow2.f32 %v4869_v60  ;;  %v5012_v54 = vor.u32 %v5643_v29, %v5009_v35  ;;  %v5016_v5 = vor.u32 %v5646_v63, %v5015_v43  ;;  %v5017_v3 = vld [vmem:[%s7925_s3 + $0x58] sm:$0xf0]  ;;  %v5642_v61 = vld [vmem:[%s7925_s3 + $0x34] sm:$0xf0]  ;;  %v5636_v60 = vld [vmem:[%s7925_s3 + $0xc] sm:$0xf] }
 0x517   :  { %v2344_v17 = vmul.f32 %v5884_v62, %v2343_v34  ;;  %v2180_v44 = vmul.f32 %v5886_v1, %v2174_v22  ;;  %v5888_v12 = vpop.eup %5887  ;;  %v4991_v34 = vld [vmem:[%s7925_s3 + $0x20] sm:$0xf]  ;;  %v5020_v41 = vor.u32 %v5644_v51, %v5017_v3  ;;  %v5641_v22 = vld [vmem:[%s7925_s3 + $0x2c] sm:$0xf0]  ;;  %v5639_v1 = vld [vmem:[%s7925_s3 + $0x24] sm:$0xf] }
 0x518   :  { %v2326_v7 = vadd.f32 %v5882_v37, %v2325_v56  ;;  %v4993_v56 = vld [vmem:[%s7925_s3 + $0x30] sm:$0xf0]  ;;  %v4992_v4 = vor.u32 %v5641_v22, %v4991_v34 }
 0x519   :  { %v2345_v28 = vadd.f32 %v5884_v62, %v2344_v17  ;;  %2382 = vrot.lane.b32.xlu1 %v2180_v44, %s6037_s5  ;;  %2181 = vst.msk [vmem:[#allocation3 + $0x18] sm:$0xff] %vm389_vm14, %v2180_v44  ;;  %v4996_v13 = vor.u32 %v5639_v1, %v4993_v56  ;;  %v4999_v17 = vld [vmem:[%s7925_s3 + $0x28] sm:$0xf]  ;;  %v5640_v44 = vld [vmem:[%s7925_s3 + $0x2c] sm:$0xf] }
 0x51a   :  { %v2330_v42 = vsel %vm2329_vm4, %v5882_v37, %v2326_v7  ;;  %v4872_v37 = vld [vmem:[#allocation5] sm:$0xf]  ;;  %2567 = vmatpush.bf16.msrb.mxu2 %v4881_v11  ;;  %v5000_v7 = vor.u32 %v5642_v61, %v4999_v17  ;;  %v140_v61 = vadd.f32 %v6246_v52, %v6304_v21 }
 0x51b   :  { %v2335_v14 = vsel %vm2332_vm6, %v2334_v18, %v2330_v42  ;;  %v2349_v59 = vsel %vm2348_vm5, %v5884_v62, %v2345_v28  ;;  %v4873_v19 = vor.u32 %v5613_v50, %v4872_v37  ;;  %v4877_v62 = vor.u32 %v5611_v23, %v4874_v45  ;;  %v4975_v18 = vld [vmem:[%s7925_s3] sm:$0xf]  ;;  %v5637_v28 = vld [vmem:[%s7925_s3 + $0xc] sm:$0xf0] }
 0x51c   :  { %v2354_v47 = vsel %vm2351_vm7, %v2353_v9, %v2349_v59  ;;  %v2377_v30 = vmul.f32 %v5888_v12, %v2335_v14  ;;  %v5890_v36 = vpop.eup %5889  ;;  %v5001_v12 = vld [vmem:[%s7925_s3 + $0x38] sm:$0xf0]  ;;  %v5635_v14 = vld [vmem:[%s7925_s3 + $0x4] sm:$0xf]  ;;  %v4977_v59 = vld [vmem:[%s7925_s3 + $0x10] sm:$0xf0] }
 0x51d   :  { %v2376_v40 = vmul.f32 %v2354_v47, %v6997_v32  ;;  %v7204_v55 = vadd.f32 1.0, %v5890_v36  ;;  %v5612_v32 = vld [vmem:[#allocation5 + $0xc] sm:$0xf]  ;;  %2541 = vmatpush.bf16.msrb.mxu0 %v4873_v19  ;;  %2554 = vmatpush.bf16.msrb.mxu1 %v4877_v62  ;;  %v5004_v42 = vor.u32 %v5640_v44, %v5001_v12  ;;  %v4983_v47 = vld [vmem:[%s7925_s3 + $0x8] sm:$0xf]  ;;  %v4980_v37 = vor.u32 %v5635_v14, %v4977_v59 }
 0x51e   :  { %v4885_v57 = vor.u32 %v5612_v32, %v4882_v26  ;;  %2761 = vmatpush.bf16.msra.mxu2 %v5016_v5  ;;  %v4985_v36 = vld [vmem:[%s7925_s3 + $0x18] sm:$0xf0]  ;;  %v181_v44 = vadd.f32 %v6287_v10, %v6259_v58 }
 0x51f   :  { %v7201_v48 = vadd.f32 %v2377_v30, %v2376_v40  ;;  %5891 = vrcp.f32 %v7204_v55  ;;  %v4976_v30 = vor.u32 %v5637_v28, %v4975_v18  ;;  %v5638_v40 = vld [vmem:[%s7925_s3 + $0x14] sm:$0xf0]  ;;  %v4988_v23 = vor.u32 %v5636_v60, %v4985_v36 }
 0x520   :  { %2580 = vmatpush.bf16.msrb.mxu3 %v4885_v57  ;;  %v4984_v50 = vor.u32 %v5638_v40, %v4983_v47  ;;  %v2372_v49 = vand.u32 2147483648, %v7204_v55  ;;  %vm2366_vm9 = vweird.f32 %v7204_v55  ;;  %v2370_v62 = vand.u32 2147483647, %v7204_v55 }
 0x521   :  { %2735 = vmatpush.bf16.msra.mxu0 %v5008_v27  ;;  %2748 = vmatpush.bf16.msra.mxu1 %v5012_v54  ;;  %5893 = vtanh.f32 %v7201_v48 }
 0x522   :  { %2762 = vmatpush.bf16.msra.mxu2 %v5000_v7  ;;  %v2373_v26 = vor.u32 1.1754944e-38, %v2372_v49  ;;  %vm2371_vm11 = vcmp.eq.f32.partialorder %v2370_v62, 8.507059e+37  ;;  %v5669_v49 = vld [vmem:[#allocation5 + $0xac] sm:$0xf0]  ;;  %v263_v62 = vadd.f32 %v6310_v25, %v6280_v6 }
 0x524   :  { %2774 = vmatpush.bf16.msra.mxu3 %v5020_v41 }
 0x525   :  { %v5892_v33 = vpop.eup %5891  ;;  %2736 = vmatpush.bf16.msra.mxu0 %v4992_v4  ;;  %2749 = vmatpush.bf16.msra.mxu1 %v4996_v13 }
 0x526   :  { %v2362_v9 = vmul.f32 %v5892_v33, %v7204_v55  ;;  %2763 = vmatpush.bf16.msra.mxu2 %v4984_v50  ;;  %vm2367_vm8 = vweird.f32 %v5892_v33 }
 0x527   :  { %vm2368_vm10 = vmor %vm2366_vm9, %vm2367_vm8  ;;  %v5894_v32 = vpop.eup %5893 }
 0x528   :  { %2775 = vmatpush.bf16.msra.mxu3 %v5004_v42  ;;  %v2363_v19 = vsub.f32 1.0, %v2362_v9 }
 0x529   :  { %2737 = vmatpush.bf16.msra.mxu0 %v4976_v30  ;;  %2750 = vmatpush.bf16.msra.mxu1 %v4980_v37 }
 0x52a   :  { %v2364_v45 = vmul.f32 %v5892_v33, %v2363_v19 }
 0x52c   :  { %2776 = vmatpush.bf16.msra.mxu3 %v4988_v23  ;;  %v2365_v24 = vadd.f32 %v5892_v33, %v2364_v45  ;;  %v222_v23 = vadd.f32 %v6297_v16, %v6270_v0  ;;  %v5667_v16 = vld [vmem:[#allocation5 + $0xa4] sm:$0xf]  ;;  %v5080_v45 = vld [vmem:[#allocation5 + $0x70] sm:$0xf0] }
 0x52e   :  { %v2369_v11 = vsel %vm2368_vm10, %v5892_v33, %v2365_v24  ;;  %v5110_v24 = vld [vmem:[#allocation5 + $0xa0] sm:$0xf] }
 0x52f   :  { %v2374_v57 = vsel %vm2371_vm11, %v2373_v26, %v2369_v11  ;;  %v5118_v26 = vld [vmem:[#allocation5 + $0xa8] sm:$0xf] }
 0x530   :  { %v2380_v20 = vmul.f32 %v5894_v32, %v2374_v57  ;;  %v5112_v32 = vld [vmem:[#allocation5 + $0xb0] sm:$0xf0] }
 0x532   :  { %v2654_v55 = vpack.c.bf16 %v2380_v20, %v2380_v20 }
 0x58b   :  { %v2383_v31 = vpop.permute.xlu1 %2382 }
 0x58c   :  { %v2385_v29 = vsel %vm389_vm14, %v2380_v20, %v2383_v31 }
 0x58d   :  { %v2386_v27 = vpack.c.bf16 %v2385_v29, %v2385_v29 }
 0x58f   :  { %4966 = vmatmul.msk.bf16.vlgmr.msrb.gmra.mxu0 %vm658_vm15, %v2386_v27  ;;  %4967 = vmatmul.msk.bf16.vlgmr.msrb.gmra.mxu1 %vm658_vm15, %v2386_v27 }
 0x590   :  { %4968 = vmatmul.msk.bf16.vlgmr.msrb.gmra.mxu2 %vm658_vm15, %v2386_v27  ;;  %4969 = vmatmul.msk.bf16.vlgmr.msrb.gmra.mxu3 %vm658_vm15, %v2386_v27  ;;  %v5111_v27 = vor.u32 %v5669_v49, %v5110_v24 }
 0x592   :  { %3004 = vmatpush.bf16.msrb.mxu0 %v5111_v27 }
 0x59f   :  { %5021 = vmatmul.msk.bf16.vlgmr.msra.gmra.mxu0 %vm389_vm14, %v2654_v55  ;;  %5022 = vmatmul.msk.bf16.vlgmr.msra.gmra.mxu1 %vm389_vm14, %v2654_v55 }
 0x5a0   :  { %5023 = vmatmul.msk.bf16.vlgmr.msra.gmra.mxu2 %vm389_vm14, %v2654_v55  ;;  %5024 = vmatmul.msk.bf16.vlgmr.msra.gmra.mxu3 %vm389_vm14, %v2654_v55  ;;  %v5670_v55 = vld [vmem:[#allocation5 + $0xb4] sm:$0xf0] }
 0x60c   :  { %v2543_v35 = vpop.f32.mrf.mxu0  ;;  %v2556_v43 = vpop.f32.mrf.mxu1 }
 0x60d   :  { %v2544_v63 = vadd.f32 %v2543_v35, %v6466_v38  ;;  %v2557_v54 = vadd.f32 %v2556_v43, %v6468_v39  ;;  %v5668_v35 = vld [vmem:[#allocation5 + $0xac] sm:$0xf] }
 0x60f   :  { %v4970_v5 = vmul.f32 -1.442695, %v2544_v63  ;;  %v4971_v51 = vmul.f32 -1.442695, %v2557_v54 }
 0x611   :  { %5895 = vpow2.f32 %v4970_v5 }
 0x612   :  { %5897 = vpow2.f32 %v4971_v51 }
 0x613   :  { %v2569_v3 = vpop.f32.mrf.mxu2  ;;  %v2582_v34 = vpop.f32.mrf.mxu3 }
 0x614   :  { %v2583_v33 = vadd.f32 %v2582_v34, %v6472_v46  ;;  %v2545_v41 = vpop.f32.mrf.mxu0  ;;  %v2558_v22 = vpop.f32.mrf.mxu1  ;;  %v2570_v18 = vadd.f32 %v2569_v3, %v6477_v8  ;;  %v5120_v3 = vld [vmem:[#allocation5 + $0xb8] sm:$0xf0]  ;;  %v5094_v34 = vld [vmem:[#allocation5 + $0x80] sm:$0xf] }
 0x615   :  { %v5115_v41 = vor.u32 %v5667_v16, %v5112_v32  ;;  %v5119_v22 = vor.u32 %v5670_v55, %v5118_v26  ;;  %v5659_v55 = vld [vmem:[#allocation5 + $0x64] sm:$0xf] }
 0x616   :  { %v4972_v1 = vmul.f32 -1.442695, %v2583_v33 }
 0x617   :  { %v5896_v56 = vpop.eup %5895  ;;  %3017 = vmatpush.bf16.msrb.mxu1 %v5115_v41  ;;  %3030 = vmatpush.bf16.msrb.mxu2 %v5119_v22  ;;  %v5083_v22 = vor.u32 %v5659_v55, %v5080_v45 }
 0x618   :  { %v5898_v4 = vpop.eup %5897  ;;  %v7296_v13 = vadd.f32 1.0, %v5896_v56  ;;  %5899 = vpow2.f32 %v4972_v1  ;;  %v5665_v1 = vld [vmem:[#allocation5 + $0x8c] sm:$0xf0]  ;;  %v5663_v56 = vld [vmem:[#allocation5 + $0x84] sm:$0xf] }
 0x619   :  { %v7298_v17 = vadd.f32 1.0, %v5898_v4 }
 0x61a   :  { %5901 = vrcp.f32 %v7296_v13  ;;  %v2599_v42 = vand.u32 2147483647, %v7296_v13  ;;  %v2601_v30 = vand.u32 2147483648, %v7296_v13  ;;  %vm2595_vm13 = vweird.f32 %v7296_v13 }
 0x61b   :  { %5903 = vrcp.f32 %v7298_v17  ;;  %v2571_v7 = vpop.f32.mrf.mxu2  ;;  %v2584_v12 = vpop.f32.mrf.mxu3  ;;  %v2620_v36 = vand.u32 2147483648, %v7298_v17  ;;  %v2618_v37 = vand.u32 2147483647, %v7298_v17  ;;  %vm2614_vm3 = vweird.f32 %v7298_v17 }
 0x61c   :  { %v2739_v28 = vpop.f32.mrf.mxu0  ;;  %v2752_v9 = vpop.f32.mrf.mxu1  ;;  %5905 = vtanh.f32 %v2570_v18  ;;  %vm7321_vm12 = vcmp.eq.f32.partialorder %v2599_v42, 8.507059e+37  ;;  %v2602_v20 = vor.u32 1.1754944e-38, %v2601_v30  ;;  %v5123_v7 = vor.u32 %v5668_v35, %v5120_v3  ;;  %v5096_v12 = vld [vmem:[#allocation5 + $0x90] sm:$0xf0]  ;;  %v5102_v18 = vld [vmem:[#allocation5 + $0x88] sm:$0xf] }
 0x61d   :  { %v2782_v14 = vadd.f32 %v2739_v28, %v140_v61  ;;  %v2783_v59 = vadd.f32 %v2752_v9, %v181_v44  ;;  %v2621_v63 = vor.u32 1.1754944e-38, %v2620_v36  ;;  %vm7339_vm2 = vcmp.eq.f32.partialorder %v2618_v37, 8.507059e+37  ;;  %v5104_v30 = vld [vmem:[#allocation5 + $0x98] sm:$0xf0]  ;;  %v5662_v35 = vld [vmem:[#allocation5 + $0x74] sm:$0xf0] }
 0x61e   :  { %v5900_v47 = vpop.eup %5899  ;;  %v5095_v42 = vor.u32 %v5665_v1, %v5094_v34  ;;  %3043 = vmatpush.bf16.msrb.mxu3 %v5123_v7  ;;  %v5657_v3 = vld [vmem:[#allocation5 + $0x4c] sm:$0xf0]  ;;  %v5655_v34 = vld [vmem:[#allocation5 + $0x44] sm:$0xf]  ;;  %v5064_v1 = vld [vmem:[#allocation5 + $0x50] sm:$0xf0] }
 0x61f   :  { %v7309_v40 = vadd.f32 1.0, %v5900_v47  ;;  %v5025_v52 = vmul.f32 -1.442695, %v2782_v14  ;;  %v5026_v60 = vmul.f32 -1.442695, %v2783_v59  ;;  %v5099_v14 = vor.u32 %v5663_v56, %v5096_v12 }
 0x620   :  { %v7311_v10 = vpop.eup %5901  ;;  %v5666_v59 = vld [vmem:[#allocation5 + $0x94] sm:$0xf0]  ;;  %v5664_v47 = vld [vmem:[#allocation5 + $0x8c] sm:$0xf]  ;;  %3005 = vmatpush.bf16.msrb.mxu0 %v5095_v42  ;;  %v5070_v56 = vld [vmem:[#allocation5 + $0x48] sm:$0xf] }
 0x621   :  { %v7315_v50 = vpop.eup %5903  ;;  %v2591_v19 = vmul.f32 %v7311_v10, %v7296_v13  ;;  %5907 = vrcp.f32 %v7309_v40  ;;  %vm2596_vm0 = vweird.f32 %v7311_v10  ;;  %v2638_v37 = vand.u32 2147483647, %v7309_v40  ;;  %3018 = vmatpush.bf16.msrb.mxu1 %v5099_v14  ;;  %v5046_v42 = vld [vmem:[#allocation5 + $0x20] sm:$0xf] }
 0x622   :  { %v2610_v11 = vmul.f32 %v7315_v50, %v7298_v17  ;;  %5909 = vpow2.f32 %v5025_v52  ;;  %v5906_v4 = vpop.eup %5905  ;;  %vm2615_vm1 = vweird.f32 %v7315_v50  ;;  %vm2597_vm4 = vmor %vm2595_vm13, %vm2596_vm0  ;;  %v5103_v49 = vor.u32 %v5666_v59, %v5102_v18 }
 0x623   :  { %v2592_v57 = vsub.f32 1.0, %v2591_v19  ;;  %5911 = vpow2.f32 %v5026_v60  ;;  %v2765_v31 = vpop.f32.mrf.mxu2  ;;  %v2778_v29 = vpop.f32.mrf.mxu3  ;;  %vm2616_vm5 = vmor %vm2614_vm3, %vm2615_vm1  ;;  %vm2634_vm7 = vweird.f32 %v7309_v40  ;;  %vm7378_vm8 = vcmp.eq.f32.partialorder %v2638_v37, 8.507059e+37 }
 0x624   :  { %v2611_v43 = vsub.f32 1.0, %v2610_v11  ;;  %v7331_v25 = vadd.f32 %v2765_v31, %v222_v23  ;;  %v7333_v54 = vadd.f32 %v2778_v29, %v263_v62  ;;  %v2741_v5 = vpop.f32.mrf.mxu0  ;;  %v2754_v51 = vpop.f32.mrf.mxu1  ;;  %v2640_v23 = vand.u32 2147483648, %v7309_v40  ;;  %v5661_v31 = vld [vmem:[#allocation5 + $0x6c] sm:$0xf0]  ;;  %3031 = vmatpush.bf16.msrb.mxu2 %v5103_v49 }
 0x625   :  { %v2593_v33 = vmul.f32 %v7311_v10, %v2592_v57  ;;  %v5107_v62 = vor.u32 %v5664_v47, %v5104_v30  ;;  %v5078_v57 = vld [vmem:[#allocation5 + $0x60] sm:$0xf]  ;;  %v5088_v5 = vld [vmem:[#allocation5 + $0x78] sm:$0xf0]  ;;  %3019 = vmatpush.bf16.msrb.mxu1 %v5083_v22  ;;  %v5067_v47 = vor.u32 %v5655_v34, %v5064_v1 }
 0x626   :  { %v2612_v61 = vmul.f32 %v7315_v50, %v2611_v43  ;;  %v5660_v43 = vld [vmem:[#allocation5 + $0x6c] sm:$0xf]  ;;  %v5062_v51 = vld [vmem:[#allocation5 + $0x40] sm:$0xf]  ;;  %v5079_v41 = vor.u32 %v5661_v31, %v5078_v57  ;;  %v2641_v49 = vor.u32 1.1754944e-38, %v2640_v23 }
 0x627   :  { %v7343_v28 = vpop.eup %5907  ;;  %v2594_v9 = vadd.f32 %v7311_v10, %v2593_v33  ;;  %3044 = vmatpush.bf16.msrb.mxu3 %v5107_v62  ;;  %v5091_v18 = vor.u32 %v5660_v43, %v5088_v5  ;;  %v5063_v59 = vor.u32 %v5657_v3, %v5062_v51  ;;  %v5652_v57 = vld [vmem:[#allocation5 + $0x2c] sm:$0xf]  ;;  %v5056_v31 = vld [vmem:[#allocation5 + $0x38] sm:$0xf0] }
 0x628   :  { %v5910_v52 = vpop.eup %5909  ;;  %v2613_v60 = vadd.f32 %v7315_v50, %v2612_v61  ;;  %v2630_v36 = vmul.f32 %v7343_v28, %v7309_v40  ;;  %vm2635_vm6 = vweird.f32 %v7343_v28  ;;  %v5656_v61 = vld [vmem:[#allocation5 + $0x4c] sm:$0xf]  ;;  %3006 = vmatpush.bf16.msrb.mxu0 %v5079_v41 }
 0x629   :  { %v5912_v19 = vpop.eup %5911  ;;  %v2598_v24 = vsel %vm2597_vm4, %v7311_v10, %v2594_v9  ;;  %v7361_v13 = vadd.f32 1.0, %v5910_v52  ;;  %vm7383_vm9 = vmor %vm2634_vm7, %vm2635_vm6  ;;  %v5072_v9 = vld [vmem:[#allocation5 + $0x58] sm:$0xf0]  ;;  %v5653_v52 = vld [vmem:[#allocation5 + $0x2c] sm:$0xf0]  ;;  %3020 = vmatpush.bf16.msrb.mxu1 %v5067_v47 }
 0x62a   :  { %v2603_v11 = vsel %vm7321_vm12, %v2602_v20, %v2598_v24  ;;  %v2617_v16 = vsel %vm2616_vm5, %v7315_v50, %v2613_v60  ;;  %v7366_v32 = vadd.f32 1.0, %v5912_v19  ;;  %v2631_v26 = vsub.f32 1.0, %v2630_v36  ;;  %v5086_v20 = vld [vmem:[#allocation5 + $0x68] sm:$0xf]  ;;  %v5651_v60 = vld [vmem:[#allocation5 + $0x24] sm:$0xf] }
 0x62b   :  { %v2622_v17 = vsel %vm7339_vm2, %v2621_v63, %v2617_v16  ;;  %v2645_v29 = vmul.f32 %v5906_v4, %v2603_v11  ;;  %5913 = vrcp.f32 %v7361_v13  ;;  %v2767_v10 = vpop.f32.mrf.mxu2  ;;  %v2780_v27 = vpop.f32.mrf.mxu3  ;;  %v5087_v12 = vor.u32 %v5662_v35, %v5086_v20  ;;  %v5048_v36 = vld [vmem:[#allocation5 + $0x30] sm:$0xf0]  ;;  %3045 = vmatpush.bf16.msrb.mxu3 %v5091_v18  ;;  %v5054_v11 = vld [vmem:[#allocation5 + $0x28] sm:$0xf]  ;;  %v5649_v18 = vld [vmem:[#allocation5 + $0xc] sm:$0xf0] }
 0x62c   :  { %v2644_v50 = vmul.f32 %v2622_v17, %v7168_v2  ;;  %5915 = vrcp.f32 %v7366_v32  ;;  %v2632_v63 = vmul.f32 %v7343_v28, %v2631_v26  ;;  %v5658_v2 = vld [vmem:[#allocation5 + $0x54] sm:$0xf0]  ;;  %v5075_v62 = vor.u32 %v5656_v61, %v5072_v9  ;;  %3007 = vmatpush.bf16.msrb.mxu0 %v5063_v59  ;;  %v5647_v9 = vld [vmem:[#allocation5 + $0x4] sm:$0xf]  ;;  %v5038_v59 = vld [vmem:[#allocation5 + $0x8] sm:$0xf] }
 0x62d   :  { %v5071_v30 = vor.u32 %v5658_v2, %v5070_v56  ;;  %3032 = vmatpush.bf16.msrb.mxu2 %v5087_v12  ;;  %v5654_v26 = vld [vmem:[#allocation5 + $0x34] sm:$0xf0]  ;;  %v5051_v10 = vor.u32 %v5651_v60, %v5048_v36  ;;  %v2799_v23 = vand.u32 2147483647, %v7361_v13  ;;  %v2801_v27 = vand.u32 2147483648, %v7361_v13 }
 0x62e   :  { %v7375_v33 = vadd.f32 %v2645_v29, %v2644_v50  ;;  %v2633_v44 = vadd.f32 %v7343_v28, %v2632_v63  ;;  %v2820_v29 = vand.u32 2147483648, %v7366_v32  ;;  %v5055_v20 = vor.u32 %v5654_v26, %v5054_v11  ;;  %v5030_v12 = vld [vmem:[#allocation5] sm:$0xf]  ;;  %v5650_v47 = vld [vmem:[#allocation5 + $0x14] sm:$0xf0] }
 0x62f   :  { %3046 = vmatpush.bf16.msrb.mxu3 %v5075_v62  ;;  %v5059_v50 = vor.u32 %v5652_v57, %v5056_v31  ;;  %v2818_v43 = vand.u32 2147483647, %v7366_v32  ;;  %vm2795_vm12 = vweird.f32 %v7361_v13  ;;  %3021 = vmatpush.bf16.msrb.mxu1 %v5051_v10  ;;  %vm2814_vm13 = vweird.f32 %v7366_v32  ;;  %v5040_v60 = vld [vmem:[#allocation5 + $0x18] sm:$0xf0]  ;;  %v5682_v11 = vld [vmem:[%s7925_s3 + $0x54] sm:$0xf0] }
 0x630   :  { %5917 = vtanh.f32 %v7375_v33  ;;  %v2637_v24 = vsel %vm7383_vm9, %v7343_v28, %v2633_v44  ;;  %v5047_v28 = vor.u32 %v5653_v52, %v5046_v42  ;;  %v2802_v3 = vor.u32 1.1754944e-38, %v2801_v27  ;;  %v5173_v62 = vld [vmem:[%s7925_s3 + $0x48] sm:$0xf]  ;;  %v5680_v57 = vld [vmem:[%s7925_s3 + $0x4c] sm:$0xf] }
 0x631   :  { %v5914_v14 = vpop.eup %5913  ;;  %5919 = vtanh.f32 %v7331_v25  ;;  %v2642_v55 = vsel %vm7378_vm8, %v2641_v49, %v2637_v24  ;;  %3033 = vmatpush.bf16.msrb.mxu2 %v5071_v30  ;;  %v2821_v41 = vor.u32 1.1754944e-38, %v2820_v29  ;;  %vm2800_vm2 = vcmp.eq.f32.partialorder %v2799_v23, 8.507059e+37  ;;  %v5167_v49 = vld [vmem:[%s7925_s3 + $0x50] sm:$0xf0]  ;;  %v5175_v31 = vld [vmem:[%s7925_s3 + $0x58] sm:$0xf0] }
 0x632   :  { %v5916_v37 = vpop.eup %5915  ;;  %v2791_v19 = vmul.f32 %v5914_v14, %v7361_v13  ;;  %vm2796_vm10 = vweird.f32 %v5914_v14  ;;  %3008 = vmatpush.bf16.msrb.mxu0 %v5047_v28  ;;  %vm2819_vm3 = vcmp.eq.f32.partialorder %v2818_v43, 8.507059e+37  ;;  %v5027_v61 = vmul.f32 -1.442695, %v7333_v54  ;;  %v5165_v54 = vld [vmem:[%s7925_s3 + $0x40] sm:$0xf] }
 0x633   :  { %v2810_v16 = vmul.f32 %v5916_v37, %v7366_v32  ;;  %vm2815_vm11 = vweird.f32 %v5916_v37  ;;  %vm2797_vm0 = vmor %vm2795_vm12, %vm2796_vm10  ;;  %3047 = vmatpush.bf16.msrb.mxu3 %v5059_v50  ;;  %v5031_v42 = vor.u32 %v5649_v18, %v5030_v12  ;;  %v5039_v52 = vor.u32 %v5650_v47, %v5038_v59  ;;  %v5677_v10 = vld [vmem:[%s7925_s3 + $0x2c] sm:$0xf0]  ;;  %v5151_v23 = vld [vmem:[%s7925_s3 + $0x30] sm:$0xf0] }
 0x634   :  { %v2792_v17 = vsub.f32 1.0, %v2791_v19  ;;  %vm2816_vm1 = vmor %vm2814_vm13, %vm2815_vm11  ;;  %5921 = vpow2.f32 %v5027_v61  ;;  %v5679_v19 = vld [vmem:[%s7925_s3 + $0x44] sm:$0xf]  ;;  %v5174_v26 = vor.u32 %v5682_v11, %v5173_v62  ;;  %v5178_v28 = vor.u32 %v5680_v57, %v5175_v31  ;;  %v5133_v43 = vld [vmem:[%s7925_s3] sm:$0xf] }
 0x635   :  { %v2811_v40 = vsub.f32 1.0, %v2810_v16  ;;  %3034 = vmatpush.bf16.msrb.mxu2 %v5055_v20  ;;  %v5170_v16 = vor.u32 %v5679_v19, %v5167_v49  ;;  %v5676_v20 = vld [vmem:[%s7925_s3 + $0x2c] sm:$0xf] }
 0x636   :  { %v5918_v45 = vpop.eup %5917  ;;  %v2793_v25 = vmul.f32 %v5914_v14, %v2792_v17  ;;  %3009 = vmatpush.bf16.msrb.mxu0 %v5031_v42  ;;  %v5149_v17 = vld [vmem:[%s7925_s3 + $0x20] sm:$0xf] }
 0x637   :  { %v2812_v35 = vmul.f32 %v5916_v37, %v2811_v40  ;;  %v2648_v5 = vmul.f32 %v5918_v45, %v2642_v55  ;;  %v5920_v51 = vpop.eup %5919  ;;  %v5675_v40 = vld [vmem:[%s7925_s3 + $0x24] sm:$0xf]  ;;  %v5150_v27 = vor.u32 %v5677_v10, %v5149_v17  ;;  %v5157_v45 = vld [vmem:[%s7925_s3 + $0x28] sm:$0xf] }
 0x638   :  { %v2794_v63 = vadd.f32 %v5914_v14, %v2793_v25  ;;  %v5154_v55 = vor.u32 %v5675_v40, %v5151_v23  ;;  %v5678_v25 = vld [vmem:[%s7925_s3 + $0x34] sm:$0xf0]  ;;  %v143_v23 = vadd.f32 %v6248_v53, %v6304_v21 }
 0x639   :  { %v2813_v34 = vadd.f32 %v5916_v37, %v2812_v35  ;;  %2850 = vrot.lane.b32.xlu2 %v2648_v5, %s6037_s5  ;;  %2649 = vst.msk [vmem:[#allocation3 + $0x20] sm:$0xff] %vm389_vm14, %v2648_v5  ;;  %3035 = vmatpush.bf16.msrb.mxu2 %v5039_v52  ;;  %v5158_v50 = vor.u32 %v5678_v25, %v5157_v45  ;;  %v5159_v35 = vld [vmem:[%s7925_s3 + $0x38] sm:$0xf0]  ;;  %v5673_v5 = vld [vmem:[%s7925_s3 + $0xc] sm:$0xf0] }
 0x63a   :  { %v2798_v22 = vsel %vm2797_vm0, %v5914_v14, %v2794_v63  ;;  %v5922_v44 = vpop.eup %5921  ;;  %v5032_v14 = vld [vmem:[#allocation5 + $0x10] sm:$0xf0] }
 0x63b   :  { %v2803_v13 = vsel %vm2800_vm2, %v2802_v3, %v2798_v22  ;;  %v2817_v1 = vsel %vm2816_vm1, %v5916_v37, %v2813_v34  ;;  %v7411_v7 = vadd.f32 1.0, %v5922_v44  ;;  %v5035_v30 = vor.u32 %v5647_v9, %v5032_v14  ;;  %v5681_v37 = vld [vmem:[%s7925_s3 + $0x4c] sm:$0xf0]  ;;  %v5671_v3 = vld [vmem:[%s7925_s3 + $0x4] sm:$0xf] }
 0x63c   :  { %v2822_v56 = vsel %vm2819_vm3, %v2821_v41, %v2817_v1  ;;  %v2845_v2 = vmul.f32 %v5920_v51, %v2803_v13  ;;  %v5166_v24 = vor.u32 %v5681_v37, %v5165_v54  ;;  %v5162_v51 = vor.u32 %v5676_v20, %v5159_v35  ;;  %v5135_v34 = vld [vmem:[%s7925_s3 + $0x10] sm:$0xf0]  ;;  %v5141_v41 = vld [vmem:[%s7925_s3 + $0x8] sm:$0xf]  ;;  %v5674_v13 = vld [vmem:[%s7925_s3 + $0x14] sm:$0xf0] }
 0x63d   :  { %v2844_v32 = vmul.f32 %v2822_v56, %v7201_v48  ;;  %5923 = vrcp.f32 %v7411_v7  ;;  %v5648_v48 = vld [vmem:[#allocation5 + $0xc] sm:$0xf]  ;;  %3022 = vmatpush.bf16.msrb.mxu1 %v5035_v30  ;;  %3229 = vmatpush.bf16.msra.mxu2 %v5174_v26  ;;  %v5134_v22 = vor.u32 %v5673_v5, %v5133_v43  ;;  %v5672_v1 = vld [vmem:[%s7925_s3 + $0xc] sm:$0xf]  ;;  %v5143_v56 = vld [vmem:[%s7925_s3 + $0x18] sm:$0xf0]  ;;  %vm2834_vm5 = vweird.f32 %v7411_v7 }
 0x63e   :  { %v5043_v36 = vor.u32 %v5648_v48, %v5040_v60  ;;  %3203 = vmatpush.bf16.msra.mxu0 %v5166_v24  ;;  %v5146_v61 = vor.u32 %v5672_v1, %v5143_v56  ;;  %v2840_v9 = vand.u32 2147483648, %v7411_v7  ;;  %v2838_v42 = vand.u32 2147483647, %v7411_v7  ;;  %v5268_v56 = vld [vmem:[#allocation5 + $0xa0] sm:$0xf] }
 0x63f   :  { %v7408_v4 = vadd.f32 %v2845_v2, %v2844_v32  ;;  %v5138_v2 = vor.u32 %v5671_v3, %v5135_v34  ;;  %v5142_v32 = vor.u32 %v5674_v13, %v5141_v41 }
 0x640   :  { %3048 = vmatpush.bf16.msrb.mxu3 %v5043_v36  ;;  %v2841_v47 = vor.u32 1.1754944e-38, %v2840_v9  ;;  %vm2839_vm7 = vcmp.eq.f32.partialorder %v2838_v42, 8.507059e+37 }
 0x641   :  { %3216 = vmatpush.bf16.msra.mxu1 %v5170_v16  ;;  %3230 = vmatpush.bf16.msra.mxu2 %v5158_v50  ;;  %5925 = vtanh.f32 %v7408_v4 }
 0x642   :  { %3204 = vmatpush.bf16.msra.mxu0 %v5150_v27 }
 0x643   :  { %v5924_v29 = vpop.eup %5923 }
 0x644   :  { %3242 = vmatpush.bf16.msra.mxu3 %v5178_v28  ;;  %v2830_v63 = vmul.f32 %v5924_v29, %v7411_v7  ;;  %vm2835_vm4 = vweird.f32 %v5924_v29 }
 0x645   :  { %3217 = vmatpush.bf16.msra.mxu1 %v5154_v55  ;;  %3231 = vmatpush.bf16.msra.mxu2 %v5142_v32  ;;  %vm2836_vm6 = vmor %vm2834_vm5, %vm2835_vm4 }
 0x646   :  { %v2831_v44 = vsub.f32 1.0, %v2830_v63  ;;  %3205 = vmatpush.bf16.msra.mxu0 %v5134_v22 }
 0x647   :  { %v5926_v59 = vpop.eup %5925 }
 0x648   :  { %3243 = vmatpush.bf16.msra.mxu3 %v5162_v51  ;;  %v2832_v12 = vmul.f32 %v5924_v29, %v2831_v44  ;;  %v5270_v44 = vld [vmem:[#allocation5 + $0xb0] sm:$0xf0] }
 0x649   :  { %3218 = vmatpush.bf16.msra.mxu1 %v5138_v2  ;;  %v5705_v2 = vld [vmem:[#allocation5 + $0xac] sm:$0xf0] }
 0x64a   :  { %v2833_v18 = vadd.f32 %v5924_v29, %v2832_v12  ;;  %v5276_v12 = vld [vmem:[#allocation5 + $0xa8] sm:$0xf] }
 0x64c   :  { %3244 = vmatpush.bf16.msra.mxu3 %v5146_v61  ;;  %v2837_v14 = vsel %vm2836_vm6, %v5924_v29, %v2833_v18  ;;  %v5703_v61 = vld [vmem:[#allocation5 + $0xa4] sm:$0xf] }
 0x64d   :  { %v2842_v30 = vsel %vm2839_vm7, %v2841_v47, %v2837_v14  ;;  %v5706_v47 = vld [vmem:[#allocation5 + $0xb4] sm:$0xf0] }
 0x64e   :  { %v2848_v52 = vmul.f32 %v5926_v59, %v2842_v30  ;;  %v5269_v59 = vor.u32 %v5705_v2, %v5268_v56  ;;  %v5704_v30 = vld [vmem:[#allocation5 + $0xac] sm:$0xf] }
 0x650   :  { %v3122_v7 = vpack.c.bf16 %v2848_v52, %v2848_v52 }
 0x693   :  { %v2851_v48 = vpop.permute.xlu2 %2850 }
 0x694   :  { %v2853_v60 = vsel %vm389_vm14, %v2848_v52, %v2851_v48 }
 0x695   :  { %v2854_v36 = vpack.c.bf16 %v2853_v60, %v2853_v60  ;;  %v7981_v60 = vld [vmem:[#allocation10_spill] sm:$0xff] }
 0x697   :  { %5124 = vmatmul.msk.bf16.vlgmr.msrb.gmra.mxu0 %vm658_vm15, %v2854_v36  ;;  %5125 = vmatmul.msk.bf16.vlgmr.msrb.gmra.mxu1 %vm658_vm15, %v2854_v36 }
 0x698   :  { %5126 = vmatmul.msk.bf16.vlgmr.msrb.gmra.mxu2 %vm658_vm15, %v2854_v36  ;;  %5127 = vmatmul.msk.bf16.vlgmr.msrb.gmra.mxu3 %vm658_vm15, %v2854_v36 }
 0x699   :  { %3472 = vmatpush.bf16.msrb.mxu0 %v5269_v59 }
 0x6a7   :  { %5179 = vmatmul.msk.bf16.vlgmr.msra.gmra.mxu0 %vm389_vm14, %v3122_v7  ;;  %5180 = vmatmul.msk.bf16.vlgmr.msra.gmra.mxu1 %vm389_vm14, %v3122_v7 }
 0x6a8   :  { %5181 = vmatmul.msk.bf16.vlgmr.msra.gmra.mxu2 %vm389_vm14, %v3122_v7  ;;  %5182 = vmatmul.msk.bf16.vlgmr.msra.gmra.mxu3 %vm389_vm14, %v3122_v7  ;;  %v7982_v7 = vld [vmem:[#allocation12_spill] sm:$0xff] }
 0x714   :  { %v3011_v54 = vpop.f32.mrf.mxu0  ;;  %v3024_v37 = vpop.f32.mrf.mxu1 }
 0x715   :  { %v3012_v19 = vadd.f32 %v3011_v54, %v6466_v38  ;;  %v3025_v24 = vadd.f32 %v3024_v37, %v6468_v39 }
 0x717   :  { %v5128_v49 = vmul.f32 -1.442695, %v3012_v19  ;;  %v5129_v62 = vmul.f32 -1.442695, %v3025_v24  ;;  %v5278_v24 = vld [vmem:[#allocation5 + $0xb8] sm:$0xf0] }
 0x719   :  { %5927 = vpow2.f32 %v5128_v49  ;;  %v5252_v49 = vld [vmem:[#allocation5 + $0x80] sm:$0xf] }
 0x71a   :  { %5929 = vpow2.f32 %v5129_v62 }
 0x71b   :  { %v3037_v11 = vpop.f32.mrf.mxu2  ;;  %v3050_v16 = vpop.f32.mrf.mxu3 }
 0x71c   :  { %v3051_v26 = vadd.f32 %v3050_v16, %v6472_v46  ;;  %v3013_v57 = vpop.f32.mrf.mxu0  ;;  %v3026_v31 = vpop.f32.mrf.mxu1  ;;  %v3038_v45 = vadd.f32 %v3037_v11, %v6477_v8  ;;  %v5273_v11 = vor.u32 %v5703_v61, %v5270_v44  ;;  %v5277_v16 = vor.u32 %v5706_v47, %v5276_v12  ;;  %v5695_v47 = vld [vmem:[#allocation5 + $0x64] sm:$0xf] }
 0x71d   :  { %v5699_v57 = vld [vmem:[#allocation5 + $0x84] sm:$0xf] }
 0x71e   :  { %v5130_v17 = vmul.f32 -1.442695, %v3051_v26  ;;  %v5701_v26 = vld [vmem:[#allocation5 + $0x8c] sm:$0xf0]  ;;  %3485 = vmatpush.bf16.msrb.mxu1 %v5273_v11  ;;  %3498 = vmatpush.bf16.msrb.mxu2 %v5277_v16  ;;  %v5222_v11 = vld [vmem:[#allocation5 + $0x50] sm:$0xf0] }
 0x71f   :  { %v5928_v29 = vpop.eup %5927  ;;  %v5228_v16 = vld [vmem:[#allocation5 + $0x48] sm:$0xf] }
 0x720   :  { %v5930_v28 = vpop.eup %5929  ;;  %v7503_v10 = vadd.f32 1.0, %v5928_v29  ;;  %5931 = vpow2.f32 %v5130_v17 }
 0x721   :  { %v7505_v40 = vadd.f32 1.0, %v5930_v28  ;;  %v5281_v28 = vor.u32 %v5704_v30, %v5278_v24  ;;  %v5698_v30 = vld [vmem:[#allocation5 + $0x74] sm:$0xf0] }
 0x722   :  { %5933 = vrcp.f32 %v7503_v10  ;;  %v3067_v50 = vand.u32 2147483647, %v7503_v10  ;;  %v3069_v63 = vand.u32 2147483648, %v7503_v10  ;;  %vm3063_vm9 = vweird.f32 %v7503_v10 }
 0x723   :  { %5935 = vrcp.f32 %v7505_v40  ;;  %v3039_v27 = vpop.f32.mrf.mxu2  ;;  %v3052_v55 = vpop.f32.mrf.mxu3  ;;  %v3088_v41 = vand.u32 2147483648, %v7505_v40  ;;  %v3086_v22 = vand.u32 2147483647, %v7505_v40  ;;  %vm3082_vm13 = vweird.f32 %v7505_v40  ;;  %3511 = vmatpush.bf16.msrb.mxu3 %v5281_v28 }
 0x724   :  { %v3207_v25 = vpop.f32.mrf.mxu0  ;;  %v3220_v20 = vpop.f32.mrf.mxu1  ;;  %5937 = vtanh.f32 %v3038_v45  ;;  %vm7525_vm8 = vcmp.eq.f32.partialorder %v3067_v50, 8.507059e+37  ;;  %v3070_v9 = vor.u32 1.1754944e-38, %v3069_v63  ;;  %v5260_v27 = vld [vmem:[#allocation5 + $0x88] sm:$0xf]  ;;  %v5702_v50 = vld [vmem:[#allocation5 + $0x94] sm:$0xf0] }
 0x725   :  { %v3250_v35 = vadd.f32 %v3207_v25, %v143_v23  ;;  %v3251_v43 = vadd.f32 %v3220_v20, %v6295_v15  ;;  %v3089_v48 = vor.u32 1.1754944e-38, %v3088_v41  ;;  %vm7543_vm12 = vcmp.eq.f32.partialorder %v3086_v22, 8.507059e+37  ;;  %v5254_v23 = vld [vmem:[#allocation5 + $0x90] sm:$0xf0] }
 0x726   :  { %v5932_v5 = vpop.eup %5931  ;;  %v5253_v25 = vor.u32 %v5701_v26, %v5252_v49  ;;  %v5257_v20 = vor.u32 %v5699_v57, %v5254_v23  ;;  %v5261_v56 = vor.u32 %v5702_v50, %v5260_v27  ;;  %v5238_v15 = vld [vmem:[#allocation5 + $0x70] sm:$0xf0]  ;;  %v5692_v57 = vld [vmem:[#allocation5 + $0x4c] sm:$0xf]  ;;  %v5230_v23 = vld [vmem:[#allocation5 + $0x58] sm:$0xf0] }
 0x727   :  { %v7515_v51 = vadd.f32 1.0, %v5932_v5  ;;  %v5183_v3 = vmul.f32 -1.442695, %v3250_v35  ;;  %v5184_v53 = vmul.f32 -1.442695, %v3251_v43 }
 0x728   :  { %v7517_v34 = vpop.eup %5933  ;;  %v5700_v35 = vld [vmem:[#allocation5 + $0x8c] sm:$0xf]  ;;  %v5262_v43 = vld [vmem:[#allocation5 + $0x98] sm:$0xf0]  ;;  %3473 = vmatpush.bf16.msrb.mxu0 %v5253_v25  ;;  %3486 = vmatpush.bf16.msrb.mxu1 %v5257_v20  ;;  %v5204_v27 = vld [vmem:[#allocation5 + $0x20] sm:$0xf] }
 0x729   :  { %v7521_v13 = vpop.eup %5935  ;;  %v3059_v1 = vmul.f32 %v7517_v34, %v7503_v10  ;;  %5939 = vrcp.f32 %v7515_v51  ;;  %vm3064_vm10 = vweird.f32 %v7517_v34  ;;  %v3108_v41 = vand.u32 2147483648, %v7515_v51  ;;  %3499 = vmatpush.bf16.msrb.mxu2 %v5261_v56  ;;  %v5212_v56 = vld [vmem:[#allocation5 + $0x28] sm:$0xf] }
 0x72a   :  { %v3078_v32 = vmul.f32 %v7521_v13, %v7505_v40  ;;  %5941 = vpow2.f32 %v5183_v3  ;;  %v5938_v31 = vpop.eup %5937  ;;  %vm3083_vm11 = vweird.f32 %v7521_v13  ;;  %vm3065_vm0 = vmor %vm3063_vm9, %vm3064_vm10  ;;  %v5265_v2 = vor.u32 %v5700_v35, %v5262_v43  ;;  %v5689_v35 = vld [vmem:[#allocation5 + $0x2c] sm:$0xf0]  ;;  %v5687_v43 = vld [vmem:[#allocation5 + $0x24] sm:$0xf] }
 0x72b   :  { %v3060_v18 = vsub.f32 1.0, %v3059_v1  ;;  %5943 = vpow2.f32 %v5184_v53  ;;  %v3233_v42 = vpop.f32.mrf.mxu2  ;;  %v3246_v14 = vpop.f32.mrf.mxu3  ;;  %v3106_v53 = vand.u32 2147483647, %v7515_v51  ;;  %vm3084_vm1 = vmor %vm3082_vm13, %vm3083_vm11  ;;  %vm3102_vm3 = vweird.f32 %v7515_v51 }
 0x72c   :  { %v3079_v52 = vsub.f32 1.0, %v3078_v32  ;;  %v7534_v36 = vadd.f32 %v3233_v42, %v7981_v60  ;;  %v7537_v54 = vadd.f32 %v3246_v14, %v7982_v7  ;;  %v3209_v37 = vpop.f32.mrf.mxu0  ;;  %v3222_v19 = vpop.f32.mrf.mxu1  ;;  %v5697_v42 = vld [vmem:[#allocation5 + $0x6c] sm:$0xf0]  ;;  %3512 = vmatpush.bf16.msrb.mxu3 %v5265_v2  ;;  %v5246_v60 = vld [vmem:[#allocation5 + $0x78] sm:$0xf0] }
 0x72d   :  { %v3061_v62 = vmul.f32 %v7517_v34, %v3060_v18  ;;  %v5236_v18 = vld [vmem:[#allocation5 + $0x60] sm:$0xf]  ;;  %v5693_v37 = vld [vmem:[#allocation5 + $0x4c] sm:$0xf0]  ;;  %v5691_v19 = vld [vmem:[#allocation5 + $0x44] sm:$0xf] }
 0x72e   :  { %v3080_v17 = vmul.f32 %v7521_v13, %v3079_v52  ;;  %v5696_v52 = vld [vmem:[#allocation5 + $0x6c] sm:$0xf]  ;;  %v5220_v7 = vld [vmem:[#allocation5 + $0x40] sm:$0xf]  ;;  %v5237_v49 = vor.u32 %v5697_v42, %v5236_v18  ;;  %vm7582_vm4 = vcmp.eq.f32.partialorder %v3106_v53, 8.507059e+37  ;;  %v5225_v20 = vor.u32 %v5691_v19, %v5222_v11 }
 0x72f   :  { %v7547_v55 = vpop.eup %5939  ;;  %v3062_v45 = vadd.f32 %v7517_v34, %v3061_v62  ;;  %v5241_v62 = vor.u32 %v5695_v47, %v5238_v15  ;;  %v5249_v28 = vor.u32 %v5696_v52, %v5246_v60  ;;  %v5221_v25 = vor.u32 %v5693_v37, %v5220_v7 }
 0x730   :  { %v5942_v5 = vpop.eup %5941  ;;  %v3081_v63 = vadd.f32 %v7521_v13, %v3080_v17  ;;  %v3098_v3 = vmul.f32 %v7547_v55, %v7515_v51  ;;  %vm3103_vm2 = vweird.f32 %v7547_v55  ;;  %3474 = vmatpush.bf16.msrb.mxu0 %v5237_v49  ;;  %v5685_v17 = vld [vmem:[#allocation5 + $0xc] sm:$0xf0] }
 0x731   :  { %v5944_v22 = vpop.eup %5943  ;;  %v3066_v1 = vsel %vm3065_vm0, %v7517_v34, %v3062_v45  ;;  %v7565_v10 = vadd.f32 1.0, %v5942_v5  ;;  %vm7587_vm5 = vmor %vm3102_vm3, %vm3103_vm2  ;;  %3487 = vmatpush.bf16.msrb.mxu1 %v5241_v62  ;;  %v5206_v5 = vld [vmem:[#allocation5 + $0x30] sm:$0xf0]  ;;  %3513 = vmatpush.bf16.msrb.mxu3 %v5249_v28 }
 0x732   :  { %v3071_v32 = vsel %vm7525_vm8, %v3070_v9, %v3066_v1  ;;  %v3085_v61 = vsel %vm3084_vm1, %v7521_v13, %v3081_v63  ;;  %v7570_v44 = vadd.f32 1.0, %v5944_v22  ;;  %v3099_v12 = vsub.f32 1.0, %v3098_v3  ;;  %v5244_v9 = vld [vmem:[#allocation5 + $0x68] sm:$0xf] }
 0x733   :  { %v3090_v40 = vsel %vm7543_vm12, %v3089_v48, %v3085_v61  ;;  %v3113_v14 = vmul.f32 %v5938_v31, %v3071_v32  ;;  %5945 = vrcp.f32 %v7565_v10  ;;  %v3235_v34 = vpop.f32.mrf.mxu2  ;;  %v3248_v59 = vpop.f32.mrf.mxu3  ;;  %v5245_v29 = vor.u32 %v5698_v30, %v5244_v9  ;;  %v5690_v32 = vld [vmem:[#allocation5 + $0x34] sm:$0xf0]  ;;  %v5688_v61 = vld [vmem:[#allocation5 + $0x2c] sm:$0xf] }
 0x734   :  { %v3112_v13 = vmul.f32 %v3090_v40, %v7375_v33  ;;  %5947 = vrcp.f32 %v7570_v44  ;;  %v3100_v48 = vmul.f32 %v7547_v55, %v3099_v12  ;;  %v5694_v33 = vld [vmem:[#allocation5 + $0x54] sm:$0xf0]  ;;  %v3109_v22 = vor.u32 1.1754944e-38, %v3108_v41  ;;  %v5214_v12 = vld [vmem:[#allocation5 + $0x38] sm:$0xf0]  ;;  %3475 = vmatpush.bf16.msrb.mxu0 %v5221_v25 }
 0x735   :  { %v5229_v50 = vor.u32 %v5694_v33, %v5228_v16  ;;  %3500 = vmatpush.bf16.msrb.mxu2 %v5245_v29  ;;  %v5233_v1 = vor.u32 %v5692_v57, %v5230_v23  ;;  %v3288_v42 = vand.u32 2147483648, %v7570_v44  ;;  %3488 = vmatpush.bf16.msrb.mxu1 %v5225_v20  ;;  %v5209_v40 = vor.u32 %v5687_v43, %v5206_v5  ;;  %v5683_v29 = vld [vmem:[#allocation5 + $0x4] sm:$0xf]  ;;  %v5190_v23 = vld [vmem:[#allocation5 + $0x10] sm:$0xf0] }
 0x736   :  { %v7579_v24 = vadd.f32 %v3113_v14, %v3112_v13  ;;  %v3101_v31 = vadd.f32 %v7547_v55, %v3100_v48  ;;  %v3267_v41 = vand.u32 2147483647, %v7565_v10  ;;  %v3269_v14 = vand.u32 2147483648, %v7565_v10  ;;  %v5717_v43 = vld [vmem:[%s7925_s3 + $0x4c] sm:$0xf0] }
 0x737   :  { %3514 = vmatpush.bf16.msrb.mxu3 %v5233_v1  ;;  %v5213_v47 = vor.u32 %v5690_v32, %v5212_v56  ;;  %v5217_v15 = vor.u32 %v5688_v61, %v5214_v12  ;;  %v3286_v13 = vand.u32 2147483647, %v7570_v44  ;;  %vm3263_vm8 = vweird.f32 %v7565_v10  ;;  %v5715_v5 = vld [vmem:[%s7925_s3 + $0x44] sm:$0xf]  ;;  %v5333_v32 = vld [vmem:[%s7925_s3 + $0x58] sm:$0xf0] }
 0x738   :  { %5949 = vtanh.f32 %v7579_v24  ;;  %v3105_v53 = vsel %vm7587_vm5, %v7547_v55, %v3101_v31  ;;  %v5205_v55 = vor.u32 %v5689_v35, %v5204_v27  ;;  %vm3282_vm9 = vweird.f32 %v7570_v44  ;;  %v5188_v31 = vld [vmem:[#allocation5] sm:$0xf]  ;;  %v5196_v27 = vld [vmem:[#allocation5 + $0x8] sm:$0xf]  ;;  %v5307_v61 = vld [vmem:[%s7925_s3 + $0x20] sm:$0xf] }
 0x739   :  { %v5946_v45 = vpop.eup %5945  ;;  %5951 = vtanh.f32 %v7534_v36  ;;  %v3110_v34 = vsel %vm7582_vm4, %v3109_v22, %v3105_v53  ;;  %3501 = vmatpush.bf16.msrb.mxu2 %v5229_v50  ;;  %3489 = vmatpush.bf16.msrb.mxu1 %v5209_v40  ;;  %v3270_v48 = vor.u32 1.1754944e-38, %v3269_v14  ;;  %v3289_v37 = vor.u32 1.1754944e-38, %v3288_v42  ;;  %v5198_v50 = vld [vmem:[#allocation5 + $0x18] sm:$0xf0]  ;;  %v5718_v22 = vld [vmem:[%s7925_s3 + $0x54] sm:$0xf0] }
 0x73a   :  { %v5948_v63 = vpop.eup %5947  ;;  %v3259_v3 = vmul.f32 %v5946_v45, %v7565_v10  ;;  %vm3264_vm6 = vweird.f32 %v5946_v45  ;;  %3476 = vmatpush.bf16.msrb.mxu0 %v5205_v55  ;;  %vm3268_vm12 = vcmp.eq.f32.partialorder %v3267_v41, 8.507059e+37  ;;  %vm3287_vm13 = vcmp.eq.f32.partialorder %v3286_v13, 8.507059e+37  ;;  %v5331_v53 = vld [vmem:[%s7925_s3 + $0x48] sm:$0xf]  ;;  %v5713_v42 = vld [vmem:[%s7925_s3 + $0x2c] sm:$0xf0] }
 0x73b   :  { %v3278_v2 = vmul.f32 %v5948_v63, %v7570_v44  ;;  %vm3283_vm7 = vweird.f32 %v5948_v63  ;;  %vm3265_vm10 = vmor %vm3263_vm8, %vm3264_vm6  ;;  %3515 = vmatpush.bf16.msrb.mxu3 %v5217_v15  ;;  %v5185_v33 = vmul.f32 -1.442695, %v7537_v54  ;;  %v5189_v28 = vor.u32 %v5685_v17, %v5188_v31  ;;  %v5323_v54 = vld [vmem:[%s7925_s3 + $0x40] sm:$0xf]  ;;  %v5711_v55 = vld [vmem:[%s7925_s3 + $0x24] sm:$0xf] }
 0x73c   :  { %v3260_v18 = vsub.f32 1.0, %v3259_v3  ;;  %vm3284_vm11 = vmor %vm3282_vm9, %vm3283_vm7  ;;  %v5193_v25 = vor.u32 %v5683_v29, %v5190_v23  ;;  %v5325_v3 = vld [vmem:[%s7925_s3 + $0x50] sm:$0xf0]  ;;  %v5332_v56 = vor.u32 %v5718_v22, %v5331_v53  ;;  %v5315_v14 = vld [vmem:[%s7925_s3 + $0x28] sm:$0xf] }
 0x73d   :  { %v3279_v51 = vsub.f32 1.0, %v3278_v2  ;;  %3502 = vmatpush.bf16.msrb.mxu2 %v5213_v47  ;;  %5953 = vpow2.f32 %v5185_v33  ;;  %v5328_v1 = vor.u32 %v5715_v5, %v5325_v3  ;;  %v5716_v2 = vld [vmem:[%s7925_s3 + $0x4c] sm:$0xf]  ;;  %v5309_v40 = vld [vmem:[%s7925_s3 + $0x30] sm:$0xf0] }
 0x73e   :  { %v5950_v59 = vpop.eup %5949  ;;  %v3261_v36 = vmul.f32 %v5946_v45, %v3260_v18  ;;  %3477 = vmatpush.bf16.msrb.mxu0 %v5189_v28  ;;  %3490 = vmatpush.bf16.msrb.mxu1 %v5193_v25  ;;  %v5336_v18 = vor.u32 %v5716_v2, %v5333_v32  ;;  %v5312_v41 = vor.u32 %v5711_v55, %v5309_v40  ;;  %v5317_v47 = vld [vmem:[%s7925_s3 + $0x38] sm:$0xf0]  ;;  %v5291_v15 = vld [vmem:[%s7925_s3] sm:$0xf]  ;;  %v7990_v40 = vld [vmem:[#allocation9_spill] sm:$0xff] }
 0x73f   :  { %v3280_v9 = vmul.f32 %v5948_v63, %v3279_v51  ;;  %v3116_v30 = vmul.f32 %v5950_v59, %v3110_v34  ;;  %v5952_v60 = vpop.eup %5951  ;;  %v5308_v51 = vor.u32 %v5713_v42, %v5307_v61  ;;  %v5714_v34 = vld [vmem:[%s7925_s3 + $0x34] sm:$0xf0]  ;;  %v5712_v59 = vld [vmem:[%s7925_s3 + $0x2c] sm:$0xf] }
 0x740   :  { %v3262_v52 = vadd.f32 %v5946_v45, %v3261_v36  ;;  %v5316_v36 = vor.u32 %v5714_v34, %v5315_v14  ;;  %v7989_v42 = vld [vmem:[#allocation8_spill] sm:$0xff] }
 0x741   :  { %v3281_v7 = vadd.f32 %v5948_v63, %v3280_v9  ;;  %3318 = vrot.lane.b32.xlu2 %v3116_v30, %s6037_s5  ;;  %3117 = vst.msk [vmem:[#allocation3 + $0x28] sm:$0xff] %vm389_vm14, %v3116_v30  ;;  %v5709_v9 = vld [vmem:[%s7925_s3 + $0xc] sm:$0xf0]  ;;  %v5320_v30 = vor.u32 %v5712_v59, %v5317_v47  ;;  %v146_v55 = vadd.f32 %v7989_v42, %v6304_v21 }
 0x742   :  { %v3266_v19 = vsel %vm3265_vm10, %v5946_v45, %v3262_v52  ;;  %v5686_v45 = vld [vmem:[#allocation5 + $0x14] sm:$0xf0]  ;;  %3684 = vmatpush.bf16.msra.mxu1 %v5328_v1 }
 0x743   :  { %v3271_v10 = vsel %vm3268_vm12, %v3270_v48, %v3266_v19  ;;  %v3285_v49 = vsel %vm3284_vm11, %v5948_v63, %v3281_v7  ;;  %v5954_v26 = vpop.eup %5953  ;;  %v5197_v20 = vor.u32 %v5686_v45, %v5196_v27  ;;  %v5324_v63 = vor.u32 %v5717_v43, %v5323_v54  ;;  %v5707_v52 = vld [vmem:[%s7925_s3 + $0x4] sm:$0xf]  ;;  %v5299_v48 = vld [vmem:[%s7925_s3 + $0x8] sm:$0xf]  ;;  %v5708_v19 = vld [vmem:[%s7925_s3 + $0xc] sm:$0xf] }
 0x744   :  { %v3290_v62 = vsel %vm3287_vm13, %v3289_v37, %v3285_v49  ;;  %v3313_v11 = vmul.f32 %v5952_v60, %v3271_v10  ;;  %v7615_v57 = vadd.f32 1.0, %v5954_v26  ;;  %v5293_v60 = vld [vmem:[%s7925_s3 + $0x10] sm:$0xf0]  ;;  %v5292_v7 = vor.u32 %v5709_v9, %v5291_v15  ;;  %v5710_v37 = vld [vmem:[%s7925_s3 + $0x14] sm:$0xf0] }
 0x745   :  { %v3312_v44 = vmul.f32 %v3290_v62, %v7408_v4  ;;  %v5684_v4 = vld [vmem:[#allocation5 + $0xc] sm:$0xf]  ;;  %3503 = vmatpush.bf16.msrb.mxu2 %v5197_v20  ;;  %3671 = vmatpush.bf16.msra.mxu0 %v5324_v63  ;;  %v5301_v10 = vld [vmem:[%s7925_s3 + $0x18] sm:$0xf0]  ;;  %v5296_v49 = vor.u32 %v5707_v52, %v5293_v60  ;;  %v5300_v62 = vor.u32 %v5710_v37, %v5299_v48  ;;  %v7991_v37 = vld [vmem:[#allocation11_spill] sm:$0xff] }
 0x746   :  { %5955 = vrcp.f32 %v7615_v57  ;;  %v5201_v35 = vor.u32 %v5684_v4, %v5198_v50  ;;  %3685 = vmatpush.bf16.msra.mxu1 %v5312_v41  ;;  %v3308_v31 = vand.u32 2147483648, %v7615_v57  ;;  %vm3302_vm1 = vweird.f32 %v7615_v57 }
 0x747   :  { %v7612_v16 = vadd.f32 %v3313_v11, %v3312_v44  ;;  %v5304_v11 = vor.u32 %v5708_v19, %v5301_v10  ;;  %v3306_v17 = vand.u32 2147483647, %v7615_v57  ;;  %v228_v19 = vadd.f32 %v7991_v37, %v6270_v0  ;;  %v7994_v0 = vld [vmem:[#allocation13_spill] sm:$0xff] }
 0x748   :  { %3516 = vmatpush.bf16.msrb.mxu3 %v5201_v35  ;;  %v3309_v23 = vor.u32 1.1754944e-38, %v3308_v31  ;;  %v269_v31 = vadd.f32 %v7994_v0, %v6280_v6  ;;  %v5740_v6 = vld [vmem:[#allocation5 + $0xac] sm:$0xf] }
 0x749   :  { %3697 = vmatpush.bf16.msra.mxu2 %v5332_v56  ;;  %3672 = vmatpush.bf16.msra.mxu0 %v5308_v51  ;;  %5957 = vtanh.f32 %v7612_v16  ;;  %vm3307_vm3 = vcmp.eq.f32.partialorder %v3306_v17, 8.507059e+37  ;;  %v187_v51 = vadd.f32 %v7990_v40, %v6259_v58 }
 0x74a   :  { %3686 = vmatpush.bf16.msra.mxu1 %v5296_v49 }
 0x74c   :  { %v5956_v12 = vpop.eup %5955  ;;  %3710 = vmatpush.bf16.msra.mxu3 %v5336_v18 }
 0x74d   :  { %v3298_v13 = vmul.f32 %v5956_v12, %v7615_v57  ;;  %3698 = vmatpush.bf16.msra.mxu2 %v5316_v36  ;;  %3673 = vmatpush.bf16.msra.mxu0 %v5292_v7  ;;  %vm3303_vm0 = vweird.f32 %v5956_v12 }
 0x74e   :  { %vm3304_vm2 = vmor %vm3302_vm1, %vm3303_vm0 }
 0x74f   :  { %v3299_v44 = vsub.f32 1.0, %v3298_v13  ;;  %v5958_v28 = vpop.eup %5957 }
 0x750   :  { %3711 = vmatpush.bf16.msra.mxu3 %v5320_v30 }
 0x751   :  { %3699 = vmatpush.bf16.msra.mxu2 %v5300_v62  ;;  %v3300_v33 = vmul.f32 %v5956_v12, %v3299_v44 }
 0x753   :  { %v3301_v26 = vadd.f32 %v5956_v12, %v3300_v33  ;;  %v5426_v33 = vld [vmem:[#allocation5 + $0xa0] sm:$0xf] }
 0x754   :  { %3712 = vmatpush.bf16.msra.mxu3 %v5304_v11  ;;  %v5731_v11 = vld [vmem:[#allocation5 + $0x64] sm:$0xf] }
 0x755   :  { %v3305_v29 = vsel %vm3304_vm2, %v5956_v12, %v3301_v26  ;;  %v5741_v26 = vld [vmem:[#allocation5 + $0xac] sm:$0xf0] }
 0x756   :  { %v3310_v27 = vsel %vm3307_vm3, %v3309_v23, %v3305_v29  ;;  %v5739_v29 = vld [vmem:[#allocation5 + $0xa4] sm:$0xf]  ;;  %v5434_v23 = vld [vmem:[#allocation5 + $0xa8] sm:$0xf] }
 0x757   :  { %v3316_v45 = vmul.f32 %v5958_v28, %v3310_v27  ;;  %v5428_v28 = vld [vmem:[#allocation5 + $0xb0] sm:$0xf0] }
 0x759   :  { %v3590_v57 = vpack.c.bf16 %v3316_v45, %v3316_v45 }
 0x79b   :  { %v3319_v25 = vpop.permute.xlu2 %3318 }
 0x79c   :  { %v3321_v20 = vsel %vm389_vm14, %v3316_v45, %v3319_v25  ;;  %v5378_v45 = vld [vmem:[#allocation5 + $0x40] sm:$0xf] }
 0x79d   :  { %v3322_v4 = vpack.c.bf16 %v3321_v20, %v3321_v20 }
 0x79f   :  { %5282 = vmatmul.msk.bf16.vlgmr.msrb.gmra.mxu0 %vm658_vm15, %v3322_v4  ;;  %5283 = vmatmul.msk.bf16.vlgmr.msrb.gmra.mxu1 %vm658_vm15, %v3322_v4 }
 0x7a0   :  { %5284 = vmatmul.msk.bf16.vlgmr.msrb.gmra.mxu2 %vm658_vm15, %v3322_v4  ;;  %5285 = vmatmul.msk.bf16.vlgmr.msrb.gmra.mxu3 %vm658_vm15, %v3322_v4  ;;  %v5427_v4 = vor.u32 %v5741_v26, %v5426_v33 }
 0x7a2   :  { %3940 = vmatpush.bf16.msrb.mxu0 %v5427_v4  ;;  %v5729_v4 = vld [vmem:[#allocation5 + $0x4c] sm:$0xf0] }
 0x7af   :  { %5337 = vmatmul.msk.bf16.vlgmr.msra.gmra.mxu0 %vm389_vm14, %v3590_v57  ;;  %5338 = vmatmul.msk.bf16.vlgmr.msra.gmra.mxu1 %vm389_vm14, %v3590_v57 }
 0x7b0   :  { %5339 = vmatmul.msk.bf16.vlgmr.msra.gmra.mxu2 %vm389_vm14, %v3590_v57  ;;  %5340 = vmatmul.msk.bf16.vlgmr.msra.gmra.mxu3 %vm389_vm14, %v3590_v57  ;;  %v5742_v57 = vld [vmem:[#allocation5 + $0xb4] sm:$0xf0] }
 0x81c   :  { %v3479_v50 = vpop.f32.mrf.mxu0  ;;  %v3492_v35 = vpop.f32.mrf.mxu1 }
 0x81d   :  { %v3480_v54 = vadd.f32 %v3479_v50, %v6466_v38  ;;  %v3493_v43 = vadd.f32 %v3492_v35, %v6468_v39 }
 0x81f   :  { %v5286_v5 = vmul.f32 -1.442695, %v3480_v54  ;;  %v5287_v63 = vmul.f32 -1.442695, %v3493_v43 }
 0x821   :  { %5959 = vpow2.f32 %v5286_v5 }
 0x822   :  { %5961 = vpow2.f32 %v5287_v63  ;;  %v5436_v63 = vld [vmem:[#allocation5 + $0xb8] sm:$0xf0] }
 0x823   :  { %v3505_v3 = vpop.f32.mrf.mxu2  ;;  %v3518_v53 = vpop.f32.mrf.mxu3  ;;  %v5439_v40 = vor.u32 %v5740_v6, %v5436_v63  ;;  %v5730_v63 = vld [vmem:[#allocation5 + $0x54] sm:$0xf0] }
 0x824   :  { %v3519_v22 = vadd.f32 %v3518_v53, %v6472_v46  ;;  %v3481_v1 = vpop.f32.mrf.mxu0  ;;  %v3494_v56 = vpop.f32.mrf.mxu1  ;;  %v3506_v34 = vadd.f32 %v3505_v3, %v6477_v8  ;;  %v5410_v3 = vld [vmem:[#allocation5 + $0x80] sm:$0xf] }
 0x825   :  { %v5431_v1 = vor.u32 %v5739_v29, %v5428_v28  ;;  %v5435_v56 = vor.u32 %v5742_v57, %v5434_v23  ;;  %3979 = vmatpush.bf16.msrb.mxu3 %v5439_v40  ;;  %v5402_v23 = vld [vmem:[#allocation5 + $0x68] sm:$0xf]  ;;  %v5727_v57 = vld [vmem:[#allocation5 + $0x44] sm:$0xf]  ;;  %v5379_v40 = vor.u32 %v5729_v4, %v5378_v45 }
 0x826   :  { %v5288_v2 = vmul.f32 -1.442695, %v3519_v22 }
 0x827   :  { %v5960_v32 = vpop.eup %5959  ;;  %3953 = vmatpush.bf16.msrb.mxu1 %v5431_v1  ;;  %3966 = vmatpush.bf16.msrb.mxu2 %v5435_v56  ;;  %v5728_v1 = vld [vmem:[#allocation5 + $0x4c] sm:$0xf] }
 0x828   :  { %v5962_v61 = vpop.eup %5961  ;;  %v7707_v12 = vadd.f32 1.0, %v5960_v32  ;;  %5963 = vpow2.f32 %v5288_v2  ;;  %v5737_v2 = vld [vmem:[#allocation5 + $0x8c] sm:$0xf0]  ;;  %v5735_v32 = vld [vmem:[#allocation5 + $0x84] sm:$0xf] }
 0x829   :  { %v7709_v18 = vadd.f32 1.0, %v5962_v61 }
 0x82a   :  { %5965 = vrcp.f32 %v7707_v12  ;;  %v3535_v59 = vand.u32 2147483647, %v7707_v12  ;;  %v3537_v9 = vand.u32 2147483648, %v7707_v12  ;;  %vm3531_vm5 = vweird.f32 %v7707_v12 }
 0x82b   :  { %5967 = vrcp.f32 %v7709_v18  ;;  %v3507_v41 = vpop.f32.mrf.mxu2  ;;  %v3520_v14 = vpop.f32.mrf.mxu3  ;;  %v3556_v15 = vand.u32 2147483648, %v7709_v18  ;;  %v3554_v52 = vand.u32 2147483647, %v7709_v18  ;;  %vm3550_vm9 = vweird.f32 %v7709_v18 }
 0x82c   :  { %v3675_v36 = vpop.f32.mrf.mxu0  ;;  %v3688_v47 = vpop.f32.mrf.mxu1  ;;  %5969 = vtanh.f32 %v3506_v34  ;;  %vm7734_vm4 = vcmp.eq.f32.partialorder %v3535_v59, 8.507059e+37  ;;  %v7738_v44 = vor.u32 1.1754944e-38, %v3537_v9  ;;  %v5418_v41 = vld [vmem:[#allocation5 + $0x88] sm:$0xf]  ;;  %v5411_v59 = vor.u32 %v5737_v2, %v5410_v3  ;;  %v5420_v9 = vld [vmem:[#allocation5 + $0x98] sm:$0xf0] }
 0x82d   :  { %v3718_v13 = vadd.f32 %v3675_v36, %v146_v55  ;;  %v3719_v30 = vadd.f32 %v3688_v47, %v187_v51  ;;  %v7732_v62 = vor.u32 1.1754944e-38, %v3556_v15  ;;  %vm7746_vm6 = vcmp.eq.f32.partialorder %v3554_v52, 8.507059e+37  ;;  %v5412_v51 = vld [vmem:[#allocation5 + $0x90] sm:$0xf0]  ;;  %v5738_v47 = vld [vmem:[#allocation5 + $0x94] sm:$0xf0] }
 0x82e   :  { %v5964_v21 = vpop.eup %5963  ;;  %v5415_v36 = vor.u32 %v5735_v32, %v5412_v51  ;;  %v5736_v15 = vld [vmem:[#allocation5 + $0x8c] sm:$0xf]  ;;  %3941 = vmatpush.bf16.msrb.mxu0 %v5411_v59  ;;  %v5723_v59 = vld [vmem:[#allocation5 + $0x24] sm:$0xf] }
 0x82f   :  { %v7722_v58 = vadd.f32 1.0, %v5964_v21  ;;  %v5341_v60 = vmul.f32 -1.442695, %v3718_v13  ;;  %v5342_v48 = vmul.f32 -1.442695, %v3719_v30 }
 0x830   :  { %v7724_v7 = vpop.eup %5965  ;;  %3954 = vmatpush.bf16.msrb.mxu1 %v5415_v36  ;;  %v5364_v36 = vld [vmem:[#allocation5 + $0x30] sm:$0xf0] }
 0x831   :  { %v7728_v10 = vpop.eup %5967  ;;  %v3527_v49 = vmul.f32 %v7724_v7, %v7707_v12  ;;  %5971 = vrcp.f32 %v7722_v58  ;;  %vm3532_vm7 = vweird.f32 %v7724_v7  ;;  %v3574_v22 = vand.u32 2147483647, %v7722_v58 }
 0x832   :  { %v3546_v17 = vmul.f32 %v7728_v10, %v7709_v18  ;;  %5973 = vpow2.f32 %v5341_v60  ;;  %v5970_v61 = vpop.eup %5969  ;;  %vm3551_vm8 = vweird.f32 %v7728_v10  ;;  %vm3533_vm10 = vmor %vm3531_vm5, %vm3532_vm7  ;;  %v3576_v52 = vand.u32 2147483648, %v7722_v58 }
 0x833   :  { %v3528_v27 = vsub.f32 1.0, %v3527_v49  ;;  %5975 = vpow2.f32 %v5342_v48  ;;  %v3701_v25 = vpop.f32.mrf.mxu2  ;;  %v3714_v20 = vpop.f32.mrf.mxu3  ;;  %vm3552_vm11 = vmor %vm3550_vm9, %vm3551_vm8  ;;  %v5419_v12 = vor.u32 %v5738_v47, %v5418_v41  ;;  %vm3570_vm13 = vweird.f32 %v7722_v58 }
 0x834   :  { %v3547_v50 = vsub.f32 1.0, %v3546_v17  ;;  %v7751_v35 = vadd.f32 %v3701_v25, %v228_v19  ;;  %v3721_v54 = vadd.f32 %v3714_v20, %v269_v31  ;;  %v3677_v43 = vpop.f32.mrf.mxu0  ;;  %v3690_v5 = vpop.f32.mrf.mxu1  ;;  %v5423_v19 = vor.u32 %v5736_v15, %v5420_v9  ;;  %v5394_v31 = vld [vmem:[#allocation5 + $0x60] sm:$0xf]  ;;  %v5733_v17 = vld [vmem:[#allocation5 + $0x6c] sm:$0xf0] }
 0x835   :  { %v3529_v53 = vmul.f32 %v7724_v7, %v3528_v27  ;;  %3967 = vmatpush.bf16.msrb.mxu2 %v5419_v12  ;;  %v5734_v27 = vld [vmem:[#allocation5 + $0x74] sm:$0xf0]  ;;  %v5732_v25 = vld [vmem:[#allocation5 + $0x6c] sm:$0xf]  ;;  %v5404_v20 = vld [vmem:[#allocation5 + $0x78] sm:$0xf0] }
 0x836   :  { %v3548_v42 = vmul.f32 %v7728_v10, %v3547_v50  ;;  %v5343_v55 = vmul.f32 -1.442695, %v3721_v54  ;;  %3980 = vmatpush.bf16.msrb.mxu3 %v5423_v19  ;;  %v5395_v54 = vor.u32 %v5733_v17, %v5394_v31  ;;  %v5380_v5 = vld [vmem:[#allocation5 + $0x50] sm:$0xf0]  ;;  %vm7797_vm0 = vcmp.eq.f32.partialorder %v3574_v22, 8.507059e+37 }
 0x837   :  { %v7757_v14 = vpop.eup %5971  ;;  %v3530_v34 = vadd.f32 %v7724_v7, %v3529_v53  ;;  %v5403_v32 = vor.u32 %v5734_v27, %v5402_v23  ;;  %v5362_v22 = vld [vmem:[#allocation5 + $0x20] sm:$0xf]  ;;  %v5383_v51 = vor.u32 %v5727_v57, %v5380_v5  ;;  %v5724_v12 = vld [vmem:[#allocation5 + $0x2c] sm:$0xf]  ;;  %v5372_v19 = vld [vmem:[#allocation5 + $0x38] sm:$0xf0] }
 0x838   :  { %v5974_v13 = vpop.eup %5973  ;;  %v3549_v30 = vadd.f32 %v7728_v10, %v3548_v42  ;;  %v3566_v21 = vmul.f32 %v7757_v14, %v7722_v58  ;;  %5977 = vpow2.f32 %v5343_v55  ;;  %vm3571_vm12 = vweird.f32 %v7757_v14  ;;  %3942 = vmatpush.bf16.msrb.mxu0 %v5395_v54  ;;  %v5388_v42 = vld [vmem:[#allocation5 + $0x58] sm:$0xf0] }
 0x839   :  { %v5976_v60 = vpop.eup %5975  ;;  %v3534_v48 = vsel %vm3533_vm10, %v7724_v7, %v3530_v34  ;;  %v7774_v37 = vadd.f32 1.0, %v5974_v13  ;;  %vm7804_vm1 = vmor %vm3570_vm13, %vm3571_vm12  ;;  %v5725_v34 = vld [vmem:[#allocation5 + $0x2c] sm:$0xf0]  ;;  %v3577_v13 = vor.u32 1.1754944e-38, %v3576_v52  ;;  %3968 = vmatpush.bf16.msrb.mxu2 %v5403_v32 }
 0x83a   :  { %v3539_v49 = vsel %vm7734_vm4, %v7738_v44, %v3534_v48  ;;  %v3553_v33 = vsel %vm3552_vm11, %v7728_v10, %v3549_v30  ;;  %v7780_v26 = vadd.f32 1.0, %v5976_v60  ;;  %v3567_v0 = vsub.f32 1.0, %v3566_v21  ;;  %v5396_v44 = vld [vmem:[#allocation5 + $0x70] sm:$0xf0]  ;;  %v5370_v21 = vld [vmem:[#allocation5 + $0x28] sm:$0xf] }
 0x83b   :  { %v3558_v18 = vsel %vm7746_vm6, %v7732_v62, %v3553_v33  ;;  %v3581_v7 = vmul.f32 %v5970_v61, %v3539_v49  ;;  %5979 = vrcp.f32 %v7774_v37  ;;  %v3703_v29 = vpop.f32.mrf.mxu2  ;;  %v3716_v28 = vpop.f32.mrf.mxu3  ;;  %v5399_v43 = vor.u32 %v5731_v11, %v5396_v44  ;;  %v5726_v48 = vld [vmem:[#allocation5 + $0x34] sm:$0xf0] }
 0x83c   :  { %v3580_v10 = vmul.f32 %v3558_v18, %v7579_v24  ;;  %5981 = vrcp.f32 %v7780_v26  ;;  %v3568_v62 = vmul.f32 %v7757_v14, %v3567_v0  ;;  %v5386_v24 = vld [vmem:[#allocation5 + $0x48] sm:$0xf]  ;;  %v5407_v61 = vor.u32 %v5732_v25, %v5404_v20  ;;  %3943 = vmatpush.bf16.msrb.mxu0 %v5379_v40 }
 0x83d   :  { %3955 = vmatpush.bf16.msrb.mxu1 %v5399_v43  ;;  %v5387_v41 = vor.u32 %v5730_v63, %v5386_v24  ;;  %v5391_v30 = vor.u32 %v5728_v1, %v5388_v42  ;;  %v3756_v33 = vand.u32 2147483648, %v7780_v26  ;;  %v5367_v0 = vor.u32 %v5723_v59, %v5364_v36 }
 0x83e   :  { %v5978_v6 = vpop.eup %5977  ;;  %v7790_v50 = vadd.f32 %v3581_v7, %v3580_v10  ;;  %v3569_v56 = vadd.f32 %v7757_v14, %v3568_v62  ;;  %3981 = vmatpush.bf16.msrb.mxu3 %v5407_v61  ;;  %v3735_v52 = vand.u32 2147483647, %v7774_v37  ;;  %v3737_v31 = vand.u32 2147483648, %v7774_v37 }
 0x83f   :  { %v7792_v3 = vadd.f32 1.0, %v5978_v6  ;;  %3969 = vmatpush.bf16.msrb.mxu2 %v5387_v41  ;;  %v5371_v7 = vor.u32 %v5726_v48, %v5370_v21  ;;  %v5375_v29 = vor.u32 %v5724_v12, %v5372_v19  ;;  %v3754_v44 = vand.u32 2147483647, %v7780_v26  ;;  %v5354_v41 = vld [vmem:[#allocation5 + $0x8] sm:$0xf]  ;;  %v4062_v48 = vld [vmem:[%s7928_s6] sm:$0xff] }
 0x840   :  { %5983 = vtanh.f32 %v7790_v50  ;;  %v3573_v9 = vsel %vm7804_vm1, %v7757_v14, %v3569_v56  ;;  %v5363_v14 = vor.u32 %v5725_v34, %v5362_v22  ;;  %vm3731_vm4 = vweird.f32 %v7774_v37  ;;  %v5346_v22 = vld [vmem:[#allocation5] sm:$0xf]  ;;  %v5722_v34 = vld [vmem:[#allocation5 + $0x14] sm:$0xf0]  ;;  %v4064_v21 = vld [vmem:[%s7928_s6 + $0x10] sm:$0xff] }
 0x841   :  { %v7809_v55 = vpop.eup %5979  ;;  %5985 = vrcp.f32 %v7792_v3  ;;  %3956 = vmatpush.bf16.msrb.mxu1 %v5383_v51  ;;  %v3578_v17 = vsel %vm7797_vm0, %v3577_v13, %v3573_v9  ;;  %vm3750_vm5 = vweird.f32 %v7780_v26  ;;  %v3738_v20 = vor.u32 1.1754944e-38, %v3737_v31  ;;  %v5348_v51 = vld [vmem:[#allocation5 + $0x10] sm:$0xf0]  ;;  %v4067_v9 = vld [vmem:[%s7928_s6 + $0x28] sm:$0xff]  ;;  %v4059_v31 = vld [vmem:[#allocation3 + $0x28] sm:$0xff] }
 0x842   :  { %v5982_v47 = vpop.eup %5981  ;;  %v3727_v15 = vmul.f32 %v7809_v55, %v7774_v37  ;;  %5987 = vtanh.f32 %v7751_v35  ;;  %vm3732_vm2 = vweird.f32 %v7809_v55  ;;  %3982 = vmatpush.bf16.msrb.mxu3 %v5391_v30  ;;  %3944 = vmatpush.bf16.msrb.mxu0 %v5363_v14  ;;  %v3757_v45 = vor.u32 1.1754944e-38, %v3756_v33  ;;  %v4066_v13 = vld [vmem:[%s7928_s6 + $0x20] sm:$0xff]  ;;  %v4065_v30 = vld [vmem:[%s7928_s6 + $0x18] sm:$0xff]  ;;  %v4054_v33 = vld [vmem:[#allocation3] sm:$0xff] }
 0x843   :  { %v3746_v60 = vmul.f32 %v5982_v47, %v7780_v26  ;;  %vm3751_vm3 = vweird.f32 %v5982_v47  ;;  %vm3733_vm6 = vmor %vm3731_vm4, %vm3732_vm2  ;;  %vm3736_vm8 = vcmp.eq.f32.partialorder %v3735_v52, 8.507059e+37  ;;  %3970 = vmatpush.bf16.msrb.mxu2 %v5371_v7  ;;  %vm3755_vm9 = vcmp.eq.f32.partialorder %v3754_v44, 8.507059e+37  ;;  %v4055_v14 = vld [vmem:[#allocation3 + $0x8] sm:$0xff]  ;;  %v4058_v52 = vld [vmem:[#allocation3 + $0x20] sm:$0xff] }
 0x844   :  { %v3728_v49 = vsub.f32 1.0, %v3727_v15  ;;  %vm3752_vm7 = vmor %vm3750_vm5, %vm3751_vm3  ;;  %v3776_v53 = vand.u32 2147483648, %v7792_v3  ;;  %vm3770_vm11 = vweird.f32 %v7792_v3  ;;  %v3774_v1 = vand.u32 2147483647, %v7792_v3  ;;  %v5356_v15 = vld [vmem:[#allocation5 + $0x18] sm:$0xf0] }
 0x845   :  { %v3747_v58 = vsub.f32 1.0, %v3746_v60  ;;  %3957 = vmatpush.bf16.msrb.mxu1 %v5367_v0  ;;  %v5355_v36 = vor.u32 %v5722_v34, %v5354_v41  ;;  %v4063_v60 = vld [vmem:[%s7928_s6 + $0x8] sm:$0xff]  ;;  %v4056_v0 = vld [vmem:[#allocation3 + $0x10] sm:$0xff] }
 0x846   :  { %v5984_v18 = vpop.eup %5983  ;;  %v3729_v35 = vmul.f32 %v7809_v55, %v3728_v49  ;;  %3983 = vmatpush.bf16.msrb.mxu3 %v5375_v29  ;;  %v3777_v2 = vor.u32 1.1754944e-38, %v3776_v53  ;;  %vm3775_vm13 = vcmp.eq.f32.partialorder %v3774_v1, 8.507059e+37 }
 0x847   :  { %v5986_v28 = vpop.eup %5985  ;;  %v3748_v11 = vmul.f32 %v5982_v47, %v3747_v58  ;;  %v3584_v23 = vmul.f32 %v5984_v18, %v3578_v17  ;;  %3971 = vmatpush.bf16.msrb.mxu2 %v5355_v36  ;;  %v4057_v58 = vld [vmem:[#allocation3 + $0x18] sm:$0xff] }
 0x848   :  { %v3730_v10 = vadd.f32 %v7809_v55, %v3729_v35  ;;  %v3766_v27 = vmul.f32 %v5986_v28, %v7792_v3  ;;  %v5988_v25 = vpop.eup %5987  ;;  %vm3771_vm10 = vweird.f32 %v5986_v28 }
 0x849   :  { %v3749_v62 = vadd.f32 %v5982_v47, %v3748_v11  ;;  %3786 = vrot.lane.b32.xlu0 %v3584_v23, %s6037_s5  ;;  %3585 = vst.msk [vmem:[#allocation3 + $0x30] sm:$0xff] %vm389_vm14, %v3584_v23  ;;  %vm3772_vm12 = vmor %vm3770_vm11, %vm3771_vm10 }
 0x84a   :  { %v3734_v37 = vsel %vm3733_vm6, %v7809_v55, %v3730_v10  ;;  %v3767_v4 = vsub.f32 1.0, %v3766_v27  ;;  %v5721_v55 = vld [vmem:[#allocation5 + $0xc] sm:$0xf0] }
 0x84b   :  { %v3739_v57 = vsel %vm3736_vm8, %v3738_v20, %v3734_v37  ;;  %v3753_v26 = vsel %vm3752_vm7, %v5982_v47, %v3749_v62  ;;  %v5347_v40 = vor.u32 %v5721_v55, %v5346_v22  ;;  %v5720_v47 = vld [vmem:[#allocation5 + $0xc] sm:$0xf] }
 0x84c   :  { %v3758_v6 = vsel %vm3755_vm9, %v3757_v45, %v3753_v26  ;;  %v3781_v54 = vmul.f32 %v5988_v25, %v3739_v57  ;;  %v3768_v43 = vmul.f32 %v5986_v28, %v3767_v4  ;;  %v5359_v3 = vor.u32 %v5720_v47, %v5356_v15  ;;  %v7876_v57 = vld [vmem:[#allocation4] ss:$0 sm:$0xff] }
 0x84d   :  { %v3780_v5 = vmul.f32 %v3758_v6, %v7612_v16  ;;  %v5719_v16 = vld [vmem:[#allocation5 + $0x4] sm:$0xf]  ;;  %3945 = vmatpush.bf16.msrb.mxu0 %v5347_v40 }
 0x84e   :  { %v3769_v63 = vadd.f32 %v5986_v28, %v3768_v43  ;;  %v5351_v59 = vor.u32 %v5719_v16, %v5348_v51  ;;  %3984 = vmatpush.bf16.msrb.mxu3 %v5359_v3 }
 0x84f   :  { %v3782_v24 = vadd.f32 %v3781_v54, %v3780_v5 }
 0x850   :  { %v3773_v56 = vsel %vm3772_vm12, %v5986_v28, %v3769_v63  ;;  %3958 = vmatpush.bf16.msrb.mxu1 %v5351_v59  ;;  %v4060_v17 = vld [vmem:[#allocation3 + $0x30] sm:$0xff] }
 0x851   :  { %5989 = vtanh.f32 %v3782_v24  ;;  %v3778_v61 = vsel %vm3775_vm13, %v3777_v2, %v3773_v56  ;;  %4106 = vmatpush.msra.mxu0 %v4067_v9 }
 0x853   :  { %4107 = vmatpush.msra.mxu0 %v4066_v13 }
 0x855   :  { %4108 = vmatpush.msra.mxu0 %v4065_v30 }
 0x857   :  { %v5990_v32 = vpop.eup %5989  ;;  %4109 = vmatpush.msra.mxu0 %v4064_v21 }
 0x858   :  { %v3784_v42 = vmul.f32 %v5990_v32, %v3778_v61 }
 0x859   :  { %4110 = vmatpush.msra.mxu0 %v4063_v60 }
 0x85b   :  { %4111 = vmatpush.msra.mxu0 %v4062_v48 }
 0x8bb   :  { %v3787_v12 = vpop.permute.xlu0 %3786 }
 0x8bc   :  { %v3789_v19 = vsel %vm389_vm14, %v3784_v42, %v3787_v12 }
 0x8bd   :  { %v3790_v49 = vpack.c.bf16 %v3789_v19, %v3789_v19 }
 0x8bf   :  { %5440 = vmatmul.msk.bf16.vlgmr.msrb.gmra.mxu0 %vm658_vm15, %v3790_v49  ;;  %5441 = vmatmul.msk.bf16.vlgmr.msrb.gmra.mxu1 %vm658_vm15, %v3790_v49 }
 0x8c0   :  { %5442 = vmatmul.msk.bf16.vlgmr.msrb.gmra.mxu2 %vm658_vm15, %v3790_v49  ;;  %5443 = vmatmul.msk.bf16.vlgmr.msrb.gmra.mxu3 %vm658_vm15, %v3790_v49  ;;  %vm4137_vm15 = vcmask 7168  }
 0x8cf   :  { %5447 = vmatmul.msk.f32.vlgmr.msra.gmra.mxu0 %vm389_vm14, %v4054_v33 }
 0x8d7   :  { %5448 = vmatmul.msk.f32.gmra.mxu0 %vm389_vm14, %v4055_v14 }
 0x8df   :  { %5449 = vmatmul.msk.f32.gmra.mxu0 %vm389_vm14, %v4056_v0 }
 0x8e7   :  { %5450 = vmatmul.msk.f32.gmra.mxu0 %vm389_vm14, %v4057_v58 }
 0x8ef   :  { %5451 = vmatmul.msk.f32.gmra.mxu0 %vm389_vm14, %v4058_v52 }
 0x8f7   :  { %5452 = vmatmul.msk.f32.gmra.mxu0 %vm389_vm14, %v4059_v31 }
 0x8ff   :  { %5453 = vmatmul.msk.f32.gmra.mxu0 %vm389_vm14, %v4060_v17 }
 0x93c   :  { %v3947_v18 = vpop.f32.mrf.mxu0  ;;  %v3960_v35 = vpop.f32.mrf.mxu1 }
 0x93d   :  { %v3948_v7 = vadd.f32 %v3947_v18, %v6466_v38  ;;  %v3961_v29 = vadd.f32 %v3960_v35, %v6468_v39 }
 0x93f   :  { %v5444_v28 = vmul.f32 -1.442695, %v3948_v7  ;;  %v5445_v11 = vmul.f32 -1.442695, %v3961_v29 }
 0x941   :  { %5991 = vpow2.f32 %v5444_v28 }
 0x942   :  { %5993 = vpow2.f32 %v5445_v11 }
 0x943   :  { %v3973_v44 = vpop.f32.mrf.mxu2  ;;  %v3986_v23 = vpop.f32.mrf.mxu3 }
 0x944   :  { %v3987_v10 = vadd.f32 %v3986_v23, %v6472_v46  ;;  %v3949_v27 = vpop.f32.mrf.mxu0  ;;  %v3962_v25 = vpop.f32.mrf.mxu1  ;;  %v3974_v5 = vadd.f32 %v3973_v44, %v6477_v8 }
 0x946   :  { %v5446_v20 = vmul.f32 -1.442695, %v3987_v10 }
 0x947   :  { %v5992_v62 = vpop.eup %5991 }
 0x948   :  { %v5994_v45 = vpop.eup %5993  ;;  %v3993_v37 = vadd.f32 1.0, %v5992_v62  ;;  %5995 = vpow2.f32 %v5446_v20 }
 0x949   :  { %v4012_v4 = vadd.f32 1.0, %v5994_v45 }
 0x94a   :  { %5997 = vrcp.f32 %v3993_v37  ;;  %v4003_v2 = vand.u32 2147483647, %v3993_v37  ;;  %v4005_v32 = vand.u32 2147483648, %v3993_v37  ;;  %vm3999_vm2 = vweird.f32 %v3993_v37 }
 0x94b   :  { %5999 = vrcp.f32 %v4012_v4  ;;  %v3975_v38 = vpop.f32.mrf.mxu2  ;;  %v3988_v39 = vpop.f32.mrf.mxu3  ;;  %v4024_v42 = vand.u32 2147483648, %v4012_v4  ;;  %v4022_v40 = vand.u32 2147483647, %v4012_v4  ;;  %vm4018_vm3 = vweird.f32 %v4012_v4 }
 0x94c   :  { %v4113_v26 = vpop.f32.mrf.mxu0  ;;  %v4006_v41 = vor.u32 1.1754944e-38, %v4005_v32  ;;  %vm4004_vm6 = vcmp.eq.f32.partialorder %v4003_v2, 8.507059e+37 }
 0x94d   :  { %v4114_v6 = vadd.f32 %v7876_v57, %v4113_v26  ;;  %v4025_v36 = vor.u32 1.1754944e-38, %v4024_v42  ;;  %vm4023_vm7 = vcmp.eq.f32.partialorder %v4022_v40, 8.507059e+37 }
 0x94e   :  { %v5996_v54 = vpop.eup %5995 }
 0x94f   :  { %v4032_v46 = vadd.f32 1.0, %v5996_v54  ;;  %4138 = vst.msk [vmem:[%s7930_s8] sm:$0xff] %vm4137_vm15, %v4114_v6 }
 0x950   :  { %v5998_v43 = vpop.eup %5997 }
 0x951   :  { %v6000_v24 = vpop.eup %5999  ;;  %v3995_v63 = vmul.f32 %v5998_v43, %v3993_v37  ;;  %6001 = vrcp.f32 %v4032_v46  ;;  %vm4000_vm0 = vweird.f32 %v5998_v43  ;;  %v4044_v14 = vand.u32 2147483648, %v4032_v46 }
 0x952   :  { %v4014_v53 = vmul.f32 %v6000_v24, %v4012_v4  ;;  %6003 = vtanh.f32 %v3974_v5  ;;  %vm4019_vm1 = vweird.f32 %v6000_v24  ;;  %vm4001_vm4 = vmor %vm3999_vm2, %vm4000_vm0  ;;  %vm4038_vm9 = vweird.f32 %v4032_v46 }
 0x953   :  { %v3996_v1 = vsub.f32 1.0, %v3995_v63  ;;  %vm4020_vm5 = vmor %vm4018_vm3, %vm4019_vm1  ;;  %v4042_v0 = vand.u32 2147483647, %v4032_v46  ;;  %v4045_v52 = vor.u32 1.1754944e-38, %v4044_v14 }
 0x954   :  { %v4015_v56 = vsub.f32 1.0, %v4014_v53  ;;  %v4116_v61 = vpop.f32.mrf.mxu0 }
 0x955   :  { %v3997_v22 = vmul.f32 %v5998_v43, %v3996_v1  ;;  %v4117_v55 = vadd.f32 %v7876_v57, %v4116_v61  ;;  %vm4043_vm11 = vcmp.eq.f32.partialorder %v4042_v0, 8.507059e+37 }
 0x956   :  { %v4016_v16 = vmul.f32 %v6000_v24, %v4015_v56 }
 0x957   :  { %v6002_v51 = vpop.eup %6001  ;;  %v3998_v8 = vadd.f32 %v5998_v43, %v3997_v22  ;;  %4139 = vst.msk [vmem:[%s7930_s8 + $0x8] sm:$0xff] %vm4137_vm15, %v4117_v55 }
 0x958   :  { %v4017_v34 = vadd.f32 %v6000_v24, %v4016_v16  ;;  %v4034_v59 = vmul.f32 %v6002_v51, %v4032_v46  ;;  %v6004_v15 = vpop.eup %6003  ;;  %vm4039_vm8 = vweird.f32 %v6002_v51 }
 0x959   :  { %v4002_v47 = vsel %vm4001_vm4, %v5998_v43, %v3998_v8  ;;  %vm4040_vm10 = vmor %vm4038_vm9, %vm4039_vm8 }
 0x95a   :  { %v4007_v3 = vsel %vm4004_vm6, %v4006_v41, %v4002_v47  ;;  %v4021_v9 = vsel %vm4020_vm5, %v6000_v24, %v4017_v34  ;;  %v4035_v13 = vsub.f32 1.0, %v4034_v59 }
 0x95b   :  { %v4026_v30 = vsel %vm4023_vm7, %v4025_v36, %v4021_v9  ;;  %v4049_v21 = vmul.f32 %v6004_v15, %v4007_v3 }
 0x95c   :  { %v4048_v60 = vmul.f32 %v4026_v30, %v7790_v50  ;;  %v4036_v48 = vmul.f32 %v6002_v51, %v4035_v13  ;;  %v4119_v12 = vpop.f32.mrf.mxu0 }
 0x95d   :  { %v4120_v19 = vadd.f32 %v7876_v57, %v4119_v12 }
 0x95e   :  { %v4050_v49 = vadd.f32 %v4049_v21, %v4048_v60  ;;  %v4037_v33 = vadd.f32 %v6002_v51, %v4036_v48 }
 0x95f   :  { %4140 = vst.msk [vmem:[%s7930_s8 + $0x10] sm:$0xff] %vm4137_vm15, %v4120_v19 }
 0x960   :  { %6005 = vtanh.f32 %v4050_v49  ;;  %v4041_v58 = vsel %vm4040_vm10, %v6002_v51, %v4037_v33 }
 0x961   :  { %v4046_v18 = vsel %vm4043_vm11, %v4045_v52, %v4041_v58 }
 0x964   :  { %v4122_v50 = vpop.f32.mrf.mxu0 }
 0x965   :  { %v4123_v31 = vadd.f32 %v7876_v57, %v4122_v50 }
 0x966   :  { %v6006_v17 = vpop.eup %6005 }
 0x967   :  { %v4052_v35 = vmul.f32 %v6006_v17, %v4046_v18  ;;  %4141 = vst.msk [vmem:[%s7930_s8 + $0x18] sm:$0xff] %vm4137_vm15, %v4123_v31 }
 0x969   :  { %4053 = vst.msk [vmem:[#allocation3 + $0x38] sm:$0xff] %vm389_vm14, %v4052_v35 }
 0x96c   :  { %v4125_v7 = vpop.f32.mrf.mxu0 }
 0x96d   :  { %v4126_v29 = vadd.f32 %v7876_v57, %v4125_v7 }
 0x96f   :  { %4142 = vst.msk [vmem:[%s7930_s8 + $0x20] sm:$0xff] %vm4137_vm15, %v4126_v29 }
 0x970   :  { %v4061_v28 = vld [vmem:[#allocation3 + $0x38] sm:$0xff] }
 0x971   :  { %5454 = vmatmul.msk.f32.gmra.mxu0 %vm389_vm14, %v4061_v28 }
 0x974   :  { %v4128_v11 = vpop.f32.mrf.mxu0 }
 0x975   :  { %v4129_v44 = vadd.f32 %v7876_v57, %v4128_v11 }
 0x977   :  { %4143 = vst.msk [vmem:[%s7930_s8 + $0x28] sm:$0xff] %vm4137_vm15, %v4129_v44 }
 0x97c   :  { %v4131_v23 = vpop.f32.mrf.mxu0 }
 0x97d   :  { %v4132_v10 = vadd.f32 %v7876_v57, %v4131_v23 }
 0x97f   :  { %4144 = vst.msk [vmem:[%s7930_s8 + $0x30] sm:$0xff] %vm4137_vm15, %v4132_v10 }
 0x9ee   :  { %v4134_v27 = vpop.f32.mrf.mxu0 }
 0x9ef   :  { %v4135_v25 = vadd.f32 %v7876_v57, %v4134_v27 }
 0x9f1   :  { %4145 = vst.msk [vmem:[%s7930_s8 + $0x38] sm:$0xff] %vm4137_vm15, %v4135_v25 }
 0x9f2   :  { %4150 = vsyncpa [#allocation6], 1 }

</bundles_post_ra>
